<compile_context>
chip_gen: v5e
topology: v5e:2x2
jax: 0.10.0
libtpu: 0.0.40
codegen_flags: <defaults>
</compile_context>

<pallas_src>
import functools

import jax
import jax.numpy as jnp
from jax.experimental import pallas as pl
from jax.experimental.pallas import tpu as pltpu

N_MATRICES = 5
EMBED_DIM = 300    # module default (padded to 384 inside the wrapper)
BATCH = 20         # small demo batch


def _round_up(x, m):
    return ((x + m - 1) // m) * m


def crim_kernel(b_ref, mall_ref, sel_ref, w_ref, batch_ref, cand_ref, out_ref,
                *, n_matrices, compute_dtype):
    """One batch tile of the CRIM forward.

    b_ref    : SMEM (1, 1) f32           prob_layer.bias
    mall_ref : VMEM (Dp, n*Dp) bf16/f32  concat of pre-transposed padded matrices
    sel_ref  : VMEM (n*Dp, 128) f32      block-diagonal 0/1 segment-sum selector
    w_ref    : VMEM (1, 128) f32         prob_layer.weight in the first n lanes
    batch_ref: VMEM (TB, Dp) f32         batch-embedding tile
    cand_ref : VMEM (TB, Dp) f32         candidate-embedding tile
    out_ref  : VMEM (TB, 1)  f32         logits tile
    """
    eps = 1e-8
    eps_sq = eps * eps

    cand = cand_ref[...]                                            # (TB, Dp) f32
    # 1/max(||c||, eps) == rsqrt(max(||c||^2, eps^2)); applied once to cand.
    inv_cn = jax.lax.rsqrt(
        jnp.maximum(jnp.sum(cand * cand, axis=-1, keepdims=True), eps_sq))
    cand_n = cand * inv_cn                                          # pre-normalized

    x = batch_ref[...].astype(compute_dtype)                        # MXU inputs

    # Single fused MXU matmul: columns [i*Dp:(i+1)*Dp] of proj_all hold the
    # i-th projection M_i @ batch[b] for every row b of the tile.
    proj_all = jnp.dot(x, mall_ref[...],
                       preferred_element_type=jnp.float32)          # (TB, n*Dp) f32

    # Per-matrix segment sums on the MXU instead of 2n+1 XLU lane reductions:
    # column i of each product below is the sum over matrix i's Dp columns.
    cand_rep = jnp.concatenate([cand_n] * n_matrices, axis=-1)      # (TB, n*Dp)
    sel = sel_ref[...]                                              # (n*Dp, 128)
    norms_sq = jnp.dot(proj_all * proj_all, sel,
                       preferred_element_type=jnp.float32)          # (TB, 128)
    dots = jnp.dot(proj_all * cand_rep, sel,
                   preferred_element_type=jnp.float32)              # (TB, 128)

    # EUP rsqrt of clamped squared norms == 1/max(||p||, eps).
    inv_pn = jax.lax.rsqrt(jnp.maximum(norms_sq, eps_sq))
    sims = dots * inv_pn        # (TB, 128); lanes >= n are exactly 0 (dots == 0)

    # prob_layer: logits = sims @ W^T + b.  W lives in the first n lanes of a
    # lane-dense row; a single 128-lane reduction finishes the tile.
    logits = jnp.sum(sims * w_ref[...], axis=-1, keepdims=True)     # (TB, 1)
    out_ref[...] = logits + b_ref[0, 0]


def crim_forward(matrices, prob_w, prob_b, batch_emb, candidate,
                 *, batch_tile=None, weight_dtype=jnp.bfloat16):
    """Pallas forward for CRIMModel.

    matrices : (n, D, D) f32, prob_w : (1, n), prob_b : (1, 1)
    batch_emb, candidate : (B, D) f32  ->  logits (B, 1) f32
    """
    n, d, _ = matrices.shape
    b = batch_emb.shape[0]

    d_pad = _round_up(d, 128)      # lane-align D (300 -> 384)
    n_lanes = 128                  # lane-dense width for sims / selector / W

    # Batch-tile heuristic:
    #   * small batches -> ONE grid step (tb = round_up(B, 8)): no per-step
    #     pipeline overhead and M_all is fetched exactly once;
    #   * large batches -> TB = 256: fills the 256-wide v6e/v7x MXU, fine on
    #     v5e's 128-wide MXU, and the (TB, n*Dp) proj_all scratch stays ~2 MB
    #     (safe under v5e's 16 MiB scoped VMEM with single-buffered weights).
    #   On v7x prefer an even number of tiles so both TensorCores get work.
    if batch_tile is None:
        tb = _round_up(b, 8) if b <= 256 else 256
    else:
        tb = _round_up(min(batch_tile, _round_up(b, 8)), 8)
    b_pad = _round_up(b, tb)
    n_tiles = b_pad // tb

    # --- one-time parameter layout prep (trace time / param load) -----------
    # M_all[:, i*Dp:(i+1)*Dp] = pad(M_i)^T so the kernel contracts on the
    # standard (LHS last, RHS first) dims — no in-kernel transposes.  bf16 by
    # default: halves the dominant HBM read and resident VMEM on every chip.
    mats_t = jnp.transpose(matrices, (0, 2, 1))                       # (n, D, D), M_i^T
    mats_t = jnp.pad(mats_t, ((0, 0), (0, d_pad - d), (0, d_pad - d)))
    m_all = (jnp.transpose(mats_t, (1, 0, 2))
             .reshape(d_pad, n * d_pad).astype(weight_dtype))         # (Dp, n*Dp)
    # TODO(synk): optional fp8(e4m3) M_all on v7x (fp8-native MXU) behind a
    # validation flag would halve the weight bytes again.

    # Block-diagonal 0/1 selector: row i*Dp + c has a 1 in column i, so
    # (X @ sel)[:, i] segment-sums matrix i's Dp columns of X on the MXU.
    sel = jnp.repeat(jnp.eye(n_lanes, dtype=jnp.float32)[:n], d_pad, axis=0)

    # prob_layer.weight scattered into the first n of 128 lanes.
    w_row = jnp.zeros((1, n_lanes), jnp.float32).at[0, :n].set(
        prob_w.reshape(n).astype(jnp.float32))
    bias = prob_b.reshape(1, 1).astype(jnp.float32)

    batch_p = jnp.pad(batch_emb.astype(jnp.float32),
                      ((0, b_pad - b), (0, d_pad - d)))
    cand_p = jnp.pad(candidate.astype(jnp.float32),
                     ((0, b_pad - b), (0, d_pad - d)))

    kernel = functools.partial(crim_kernel, n_matrices=n,
                               compute_dtype=weight_dtype)

    const = lambda i: (0, 0)   # resident operands: same block for every tile
    out = pl.pallas_call(
        kernel,
        out_shape=jax.ShapeDtypeStruct((b_pad, 1), jnp.float32),
        grid_spec=pltpu.PrefetchScalarGridSpec(
            num_scalar_prefetch=0,
            grid=(n_tiles,),
            in_specs=[
                pl.BlockSpec(memory_space=pltpu.MemorySpace.SMEM),    # bias (1,1)
                # Constant index_map + single-buffered: fetched once, stays
                # resident, no wasted second VMEM buffer.
                pl.BlockSpec((d_pad, n * d_pad), const,
                             pipeline_mode=pl.Buffered(1)),           # M_all
                pl.BlockSpec((n * d_pad, n_lanes), const,
                             pipeline_mode=pl.Buffered(1)),           # selector
                pl.BlockSpec((1, n_lanes), const,
                             pipeline_mode=pl.Buffered(1)),           # prob weight
                pl.BlockSpec((tb, d_pad), lambda i: (i, 0)),          # batch tile
                pl.BlockSpec((tb, d_pad), lambda i: (i, 0)),          # candidate tile
            ],
            out_specs=pl.BlockSpec((tb, 1), lambda i: (i, 0)),
        ),
        compiler_params=pltpu.CompilerParams(
            dimension_semantics=("parallel",)),    # batch tiles independent
    )(bias, m_all, sel, w_row, batch_p, cand_p)

    return out[:b]


def crim_reference(matrices, prob_w, prob_b, batch_emb, candidate):
    """Pure-JAX f32 reference mirroring the PyTorch forward."""
    eps = 1e-8
    proj = jnp.einsum('ndk,bk->bnd', matrices, batch_emb)             # (B, n, D)
    pn = jnp.maximum(jnp.sqrt(jnp.sum(proj * proj, axis=-1)), eps)    # (B, n)
    cn = jnp.maximum(jnp.sqrt(jnp.sum(candidate * candidate, axis=-1)), eps)[:, None]
    sims = jnp.sum(proj * candidate[:, None, :], axis=-1) / (pn * cn)
    return sims @ prob_w.T + prob_b                                   # (B, 1)


if __name__ == "__main__":
    key = jax.random.PRNGKey(0)
    k_noise, k_w, k_b, k_batch, k_cand = jax.random.split(key, 5)

    # Parameter init mirroring CRIMModel.__init__ (eye + N(0, init_sigma) per
    # matrix, prob weight ~ N(0, 0.1), prob bias ~ default nn.Linear uniform).
    init_sigma = 0.01
    eye = jnp.eye(EMBED_DIM, dtype=jnp.float32)
    noise = init_sigma * jax.random.normal(
        k_noise, (N_MATRICES, EMBED_DIM, EMBED_DIM), dtype=jnp.float32)
    matrices = eye[None, :, :] + noise                                # (n, D, D)

    prob_w = 0.1 * jax.random.normal(k_w, (1, N_MATRICES), dtype=jnp.float32)
    bound = 1.0 / (N_MATRICES ** 0.5)
    prob_b = jax.random.uniform(
        k_b, (1, 1), minval=-bound, maxval=bound, dtype=jnp.float32)

    batch_emb = jax.random.normal(k_batch, (BATCH, EMBED_DIM), dtype=jnp.float32)
    candidate = jax.random.normal(k_cand, (BATCH, EMBED_DIM), dtype=jnp.float32)

    ref = crim_reference(matrices, prob_w, prob_b, batch_emb, candidate)

    # Default fast path: bf16 weights, single grid step (B=20 -> TB=24).
    logits = crim_forward(matrices, prob_w, prob_b, batch_emb, candidate)
    logits = jax.block_until_ready(logits)
    assert logits.shape == (BATCH, 1)
    assert jnp.allclose(logits, ref, atol=2e-2, rtol=2e-2), (logits, ref)

    # f32-weight, multi-tile run: exercises the batch grid (TB=8 -> 3 steps)
    # and the resident single-buffered weight path.  Correctness coverage only;
    # use the default tiling for performance.
    logits_f32 = crim_forward(matrices, prob_w, prob_b, batch_emb, candidate,
                              batch_tile=8, weight_dtype=jnp.float32)
    logits_f32 = jax.block_until_ready(logits_f32)
    assert logits_f32.shape == (BATCH, 1)
    assert jnp.allclose(logits_f32, ref, atol=1e-2, rtol=1e-2), (logits_f32, ref)

    print("KERNEL_OK")
</pallas_src>

<mosaic_0001>
module attributes {stable_mosaic.version = 11 : i64} {
  func.func @crim_kernel(%arg0: i32, %arg1: memref<1x1xf32, #tpu.memory_space<smem>>, %arg2: memref<384x1920xbf16, #tpu.memory_space<vmem>>, %arg3: memref<1920x128xf32, #tpu.memory_space<vmem>>, %arg4: memref<1x128xf32, #tpu.memory_space<vmem>>, %arg5: memref<24x384xf32, #tpu.memory_space<vmem>>, %arg6: memref<24x384xf32, #tpu.memory_space<vmem>>, %arg7: memref<24x1xf32, #tpu.memory_space<vmem>>) attributes {dimension_semantics = [#tpu.dimension_semantics<parallel>], iteration_bounds = array<i64: 1>, scalar_prefetch = 0 : i64, scratch_operands = 0 : i64, tpu.core_type = #tpu.core_type<tc>, window_params = [{transform_indices = @transform_0, window_bounds = array<i64: 1, 1>}, {pipeline_mode = #tpu.pipeline_mode<synchronous>, transform_indices = @transform_1, window_bounds = array<i64: 384, 1920>}, {pipeline_mode = #tpu.pipeline_mode<synchronous>, transform_indices = @transform_2, window_bounds = array<i64: 1920, 128>}, {pipeline_mode = #tpu.pipeline_mode<synchronous>, transform_indices = @transform_3, window_bounds = array<i64: 1, 128>}, {transform_indices = @transform_4, window_bounds = array<i64: 24, 384>}, {transform_indices = @transform_5, window_bounds = array<i64: 24, 384>}, {transform_indices = @transform_6, window_bounds = array<i64: 24, 1>}]} {
    %c0 = arith.constant 0 : index
    %c0_0 = arith.constant 0 : index
    %0 = vector.load %arg6[%c0, %c0_0] : memref<24x384xf32, #tpu.memory_space<vmem>>, vector<24x384xf32>
    %1 = arith.mulf %0, %0 : vector<24x384xf32>
    %cst = arith.constant dense<0.000000e+00> : vector<24xf32>
    %2 = vector.multi_reduction <add>, %1, %cst [1] : vector<24x384xf32> to vector<24xf32>
    %3 = vector.shape_cast %2 : vector<24xf32> to vector<24x1xf32>
    %cst_1 = arith.constant 1.000000e-16 : f32
    %4 = vector.broadcast %cst_1 : f32 to vector<24x1xf32>
    %5 = arith.maximumf %3, %4 : vector<24x1xf32>
    %6 = math.rsqrt %5 : vector<24x1xf32>
    %7 = vector.broadcast %6 : vector<24x1xf32> to vector<24x384xf32>
    %8 = arith.mulf %0, %7 : vector<24x384xf32>
    %c0_2 = arith.constant 0 : index
    %c0_3 = arith.constant 0 : index
    %9 = vector.load %arg5[%c0_2, %c0_3] : memref<24x384xf32, #tpu.memory_space<vmem>>, vector<24x384xf32>
    %10 = arith.truncf %9 : vector<24x384xf32> to vector<24x384xbf16>
    %c0_4 = arith.constant 0 : index
    %c0_5 = arith.constant 0 : index
    %11 = vector.load %arg2[%c0_4, %c0_5] : memref<384x1920xbf16, #tpu.memory_space<vmem>>, vector<384x1920xbf16>
    %cst_6 = arith.constant dense<0.000000e+00> : vector<24x1920xf32>
    %12 = tpu.matmul %10, %11, %cst_6 {dimension_numbers = #tpu.dot_dimension_numbers<[1], [0], [0], [1], [0, 0, 1, 1], [], []>} : vector<24x384xbf16>, vector<384x1920xbf16>, vector<24x1920xf32> -> vector<24x1920xf32>
    %13 = tpu.concatenate %8, %8, %8, %8, %8 in 1 : vector<24x384xf32>, vector<24x384xf32>, vector<24x384xf32>, vector<24x384xf32>, vector<24x384xf32> -> vector<24x1920xf32>
    %c0_7 = arith.constant 0 : index
    %c0_8 = arith.constant 0 : index
    %14 = vector.load %arg3[%c0_7, %c0_8] : memref<1920x128xf32, #tpu.memory_space<vmem>>, vector<1920x128xf32>
    %15 = arith.mulf %12, %12 : vector<24x1920xf32>
    %cst_9 = arith.constant dense<0.000000e+00> : vector<24x128xf32>
    %16 = tpu.matmul %15, %14, %cst_9 {dimension_numbers = #tpu.dot_dimension_numbers<[1], [0], [0], [1], [0, 0, 1, 1], [], []>} : vector<24x1920xf32>, vector<1920x128xf32>, vector<24x128xf32> -> vector<24x128xf32>
    %17 = arith.mulf %12, %13 : vector<24x1920xf32>
    %cst_10 = arith.constant dense<0.000000e+00> : vector<24x128xf32>
    %18 = tpu.matmul %17, %14, %cst_10 {dimension_numbers = #tpu.dot_dimension_numbers<[1], [0], [0], [1], [0, 0, 1, 1], [], []>} : vector<24x1920xf32>, vector<1920x128xf32>, vector<24x128xf32> -> vector<24x128xf32>
    %cst_11 = arith.constant 1.000000e-16 : f32
    %19 = vector.broadcast %cst_11 : f32 to vector<24x128xf32>
    %20 = arith.maximumf %16, %19 : vector<24x128xf32>
    %21 = math.rsqrt %20 : vector<24x128xf32>
    %22 = arith.mulf %18, %21 : vector<24x128xf32>
    %c0_12 = arith.constant 0 : index
    %c0_13 = arith.constant 0 : index
    %23 = vector.load %arg4[%c0_12, %c0_13] : memref<1x128xf32, #tpu.memory_space<vmem>>, vector<1x128xf32>
    %24 = vector.broadcast %23 : vector<1x128xf32> to vector<24x128xf32>
    %25 = arith.mulf %22, %24 : vector<24x128xf32>
    %cst_14 = arith.constant dense<0.000000e+00> : vector<24xf32>
    %26 = vector.multi_reduction <add>, %25, %cst_14 [1] : vector<24x128xf32> to vector<24xf32>
    %27 = vector.shape_cast %26 : vector<24xf32> to vector<24x1xf32>
    %c0_15 = arith.constant 0 : index
    %c0_16 = arith.constant 0 : index
    %28 = memref.load %arg1[%c0_15, %c0_16] : memref<1x1xf32, #tpu.memory_space<smem>>
    %29 = vector.broadcast %28 : f32 to vector<24x1xf32>
    %30 = arith.addf %27, %29 : vector<24x1xf32>
    %c0_17 = arith.constant 0 : index
    %c0_18 = arith.constant 0 : index
    %31 = vector.load %arg7[%c0_17, %c0_18] : memref<24x1xf32, #tpu.memory_space<vmem>>, vector<24x1xf32>
    tpu.vector_store %arg7[%c0_17, %c0_18], %30 {strides = array<i32>} : memref<24x1xf32, #tpu.memory_space<vmem>>, vector<24x1xf32>,
    return
  }
  func.func @transform_0(%arg0: i32) -> (i32, i32) {
    %c0_i32 = arith.constant 0 : i32
    %c0_i32_0 = arith.constant 0 : i32
    %c0_i32_1 = arith.constant 0 : i32
    return %c0_i32, %c0_i32_0 : i32, i32
  }
  func.func @transform_1(%arg0: i32) -> (i32, i32) {
    %c0_i32 = arith.constant 0 : i32
    %c0_i32_0 = arith.constant 0 : i32
    %c0_i32_1 = arith.constant 0 : i32
    return %c0_i32, %c0_i32_0 : i32, i32
  }
  func.func @transform_2(%arg0: i32) -> (i32, i32) {
    %c0_i32 = arith.constant 0 : i32
    %c0_i32_0 = arith.constant 0 : i32
    %c0_i32_1 = arith.constant 0 : i32
    return %c0_i32, %c0_i32_0 : i32, i32
  }
  func.func @transform_3(%arg0: i32) -> (i32, i32) {
    %c0_i32 = arith.constant 0 : i32
    %c0_i32_0 = arith.constant 0 : i32
    %c0_i32_1 = arith.constant 0 : i32
    return %c0_i32, %c0_i32_0 : i32, i32
  }
  func.func @transform_4(%arg0: i32) -> (i32, i32) {
    %c0_i32 = arith.constant 0 : i32
    %c0_i32_0 = arith.constant 0 : i32
    return %arg0, %c0_i32 : i32, i32
  }
  func.func @transform_5(%arg0: i32) -> (i32, i32) {
    %c0_i32 = arith.constant 0 : i32
    %c0_i32_0 = arith.constant 0 : i32
    return %arg0, %c0_i32 : i32, i32
  }
  func.func @transform_6(%arg0: i32) -> (i32, i32) {
    %c0_i32 = arith.constant 0 : i32
    %c0_i32_0 = arith.constant 0 : i32
    return %arg0, %c0_i32 : i32, i32
  }
}

</mosaic_0001>

<bundles_post_ra>
// kernel: tpu_custom_call.1
= control target key start
LH: loop header
LB: loop body
LE: loop exit
PB: predicated region body
PF: predicated region fallthrough
CT: control target
= control target key end

     0   :  { %12 = vsyncpa [#allocation4], 0  ;;  %s7551_s0 = inlined_call_operand.<no memory space> [shape: f32[1,1], index: 0, kind: input, shape index: {}]   ;;  %s7552_s1 = inlined_call_operand.hbm [shape: bf16[384,1920], index: 1, kind: input, shape index: {}]   ;;  %s7553_s2 = inlined_call_operand.hbm [shape: f32[1920,128], index: 2, kind: input, shape index: {}]   ;;  %s7554_s3 = inlined_call_operand.hbm [shape: f32[1,128], index: 3, kind: input, shape index: {}]   ;;  %s7555_s4 = inlined_call_operand.hbm [shape: f32[24,384], index: 4, kind: input, shape index: {}]   ;;  %s7556_s5 = inlined_call_operand.hbm [shape: f32[24,384], index: 5, kind: input, shape index: {}]   ;;  %s7557_s6 = inlined_call_operand.vmem [shape: f32[24,1], index: 6, kind: output, shape index: {}]  }
   0x1   :  { %13 = vsyncpa [#allocation6], 0  ;;  %s34_s23 = sshll.u32 %s7553_s2, 4  ;;  %s35_s23 = int_to_ptr.hbm [resolvable:$true] %s34_s23 }
   0x2   :  { %14 = vsyncpa [#allocation9], 0  ;;  %s6573_s24 = smov [#allocation5]   ;;  %s58_s28 = sshll.u32 %s7555_s4, 4  ;;  %s59_s28 = int_to_ptr.hbm [resolvable:$true] %s58_s28 }
   0x3   :  { %s36_s25 = sshll.u32 %s6573_s24, 4  ;;  %s6574_s29 = smov 128   ;;  %s37_s25 = int_to_ptr.vmem [resolvable:$true] %s36_s25 }
   0x4   :  { %s6575_s30 = smov 8   ;;  %s6576_s7 = smov [#allocation8]  }
   0x5   :  { %42 = dma.hbm_to_vmem [thread:$0]  %s35_s23, 30720, %s37_s25, [#allocation6], %s6574_s29, %s6574_s29, %s6575_s30  }
   0x6   :  { %s60_s8 = sshll.u32 %s6576_s7, 4  ;;  %s6577_s9 = smov 384   ;;  %s61_s8 = int_to_ptr.vmem [resolvable:$true] %s60_s8 }
   0x7   :  { %s6578_s10 = smov 24   ;;  %s21_s12 = sshll.u32 %s7552_s1, 4  ;;  %s22_s12 = int_to_ptr.hbm [resolvable:$true] %s21_s12 }
   0x8   :  { %66 = dma.hbm_to_vmem [thread:$0]  %s59_s28, 1152, %s61_s8, [#allocation9], %s6577_s9, %s6577_s9, %s6578_s10  }
   0x9   :  { %s6579_s13 = smov [#allocation3]   ;;  %s48_s16 = sshll.u32 %s7554_s3, 4  ;;  %s49_s16 = int_to_ptr.hbm [resolvable:$true] %s48_s16 }
   0xa   :  { %s23_s14 = sshll.u32 %s6579_s13, 4  ;;  %s6580_s17 = smov 960   ;;  %s24_s14 = int_to_ptr.vmem [resolvable:$true] %s23_s14 }
   0xb   :  { %s6581_s18 = smov 60   ;;  %s6582_s19 = smov [#allocation7]  }
   0xc   :  { %29 = dma.hbm_to_vmem [thread:$0]  %s22_s12, 46080, %s24_s14, [#allocation4], %s6580_s17, %s6580_s17, %s6581_s18  }
   0xd   :  { %s50_s20 = sshll.u32 %s6582_s19, 4  ;;  %s71_s23 = sshll.u32 %s7556_s5, 4  ;;  %s51_s20 = int_to_ptr.vmem [resolvable:$true] %s50_s20  ;;  %s72_s23 = int_to_ptr.hbm [resolvable:$true] %s71_s23 }
   0xe   :  { %53 = dma.hbm_to_vmem [thread:$0]  %s49_s16, 16, %s51_s20, [#allocation6]  }
   0xf   :  { %s6583_s1 = smov [#allocation10]  }
  0x10   :  { %s73_s24 = sshll.u32 %s6583_s1, 4  ;;  %s74_s24 = int_to_ptr.vmem [resolvable:$true] %s73_s24 }
  0x11   :  { %79 = dma.hbm_to_vmem [thread:$0]  %s72_s23, 1152, %s74_s24, [#allocation9], %s6577_s9, %s6577_s9, %s6578_s10  }
  0x12   :  { %6567 = dma.done.wait [#allocation4], 46080  }
  0x13   :  { %6568 = vsyncadd [#allocation4], 4294921216 }
  0x14   :  { %6569 = dma.done.wait [#allocation6], 30736  }
  0x15   :  { %6570 = vsyncadd [#allocation6], 4294936560 }
  0x16   :  { %6571 = dma.done.wait [#allocation9], 2304  }
  0x17   :  { %6572 = vsyncadd [#allocation9], 4294964992  ;;  %v4802_v0 = vld [vmem:[#allocation3 + $0x348] sm:$0xf]  ;;  %v5932_v1 = vld [vmem:[#allocation3 + $0x380] sm:$0xf0] }
  0x18   :  { %v5282_v2 = vld [vmem:[#allocation3 + $0x708] sm:$0xf]  ;;  %v4803_v3 = vor.u32 %v5932_v1, %v4802_v0  ;;  %v6052_v4 = vld [vmem:[#allocation3 + $0x740] sm:$0xf0]  ;;  %v5925_v9 = vld [vmem:[#allocation3 + $0x34c] sm:$0xf] }
  0x19   :  { %v5762_v5 = vld [vmem:[#allocation3 + $0xac8] sm:$0xf]  ;;  %v6172_v6 = vld [vmem:[#allocation3 + $0xb00] sm:$0xf0]  ;;  %v5283_v7 = vor.u32 %v6052_v4, %v5282_v2  ;;  %v4742_v11 = vld [vmem:[#allocation3 + $0x2d0] sm:$0xf] }
  0x1a   :  { %v5763_v8 = vor.u32 %v6172_v6, %v5762_v5  ;;  %v4804_v10 = vld [vmem:[#allocation3 + $0x384] sm:$0xf0]  ;;  %2395 = vmatpush.bf16.msra.mxu0 %v4803_v3  ;;  %v5917_v13 = vld [vmem:[#allocation3 + $0x308] sm:$0xf0]  ;;  %v5222_v14 = vld [vmem:[#allocation3 + $0x690] sm:$0xf] }
  0x1b   :  { %v4807_v12 = vor.u32 %v5925_v9, %v4804_v10  ;;  %v6037_v15 = vld [vmem:[#allocation3 + $0x6c8] sm:$0xf0]  ;;  %2413 = vmatpush.bf16.msra.mxu1 %v5283_v7  ;;  %v4743_v16 = vor.u32 %v5917_v13, %v4742_v11  ;;  %v5702_v18 = vld [vmem:[#allocation3 + $0xa50] sm:$0xf]  ;;  %v5910_v20 = vld [vmem:[#allocation3 + $0x2d4] sm:$0xf] }
  0x1c   :  { %2431 = vmatpush.bf16.msra.mxu2 %v5763_v8  ;;  %v5223_v17 = vor.u32 %v6037_v15, %v5222_v14  ;;  %v6157_v19 = vld [vmem:[#allocation3 + $0xa88] sm:$0xf0]  ;;  %v4744_v22 = vld [vmem:[#allocation3 + $0x30c] sm:$0xf0]  ;;  %v4682_v23 = vld [vmem:[#allocation3 + $0x258] sm:$0xf] }
  0x1d   :  { %2449 = vmatpush.bf16.msra.mxu3 %v4807_v12  ;;  %v5703_v21 = vor.u32 %v6157_v19, %v5702_v18  ;;  %v5902_v24 = vld [vmem:[#allocation3 + $0x290] sm:$0xf0]  ;;  %v4747_v25 = vor.u32 %v5910_v20, %v4744_v22  ;;  %v5162_v26 = vld [vmem:[#allocation3 + $0x618] sm:$0xf]  ;;  %v5895_v31 = vld [vmem:[#allocation3 + $0x25c] sm:$0xf] }
  0x1e   :  { %v6022_v27 = vld [vmem:[#allocation3 + $0x650] sm:$0xf0]  ;;  %v5642_v28 = vld [vmem:[#allocation3 + $0x9d8] sm:$0xf]  ;;  %2396 = vmatpush.bf16.msra.mxu0 %v4743_v16  ;;  %v4683_v29 = vor.u32 %v5902_v24, %v4682_v23  ;;  %v4622_v35 = vld [vmem:[#allocation3 + $0x1e0] sm:$0xf] }
  0x1f   :  { %v6142_v30 = vld [vmem:[#allocation3 + $0xa10] sm:$0xf0]  ;;  %v4684_v32 = vld [vmem:[#allocation3 + $0x294] sm:$0xf0]  ;;  %2414 = vmatpush.bf16.msra.mxu1 %v5223_v17  ;;  %v5163_v33 = vor.u32 %v6022_v27, %v5162_v26  ;;  %v5887_v36 = vld [vmem:[#allocation3 + $0x218] sm:$0xf0] }
  0x20   :  { %2432 = vmatpush.bf16.msra.mxu2 %v5703_v21  ;;  %v5643_v34 = vor.u32 %v6142_v30, %v5642_v28  ;;  %v5102_v37 = vld [vmem:[#allocation3 + $0x5a0] sm:$0xf]  ;;  %v4687_v38 = vor.u32 %v5895_v31, %v4684_v32  ;;  %v6007_v39 = vld [vmem:[#allocation3 + $0x5d8] sm:$0xf0]  ;;  %v5880_v42 = vld [vmem:[#allocation3 + $0x1e4] sm:$0xf]  ;;  %v4623_v44 = vor.u32 %v5887_v36, %v4622_v35 }
  0x21   :  { %2450 = vmatpush.bf16.msra.mxu3 %v4747_v25  ;;  %v5582_v40 = vld [vmem:[#allocation3 + $0x960] sm:$0xf]  ;;  %v6127_v41 = vld [vmem:[#allocation3 + $0x998] sm:$0xf0]  ;;  %v5103_v45 = vor.u32 %v6007_v39, %v5102_v37  ;;  %v4562_v47 = vld [vmem:[#allocation3 + $0x168] sm:$0xf] }
  0x22   :  { %v4624_v43 = vld [vmem:[#allocation3 + $0x21c] sm:$0xf0]  ;;  %2397 = vmatpush.bf16.msra.mxu0 %v4683_v29  ;;  %v5583_v46 = vor.u32 %v6127_v41, %v5582_v40  ;;  %v5872_v48 = vld [vmem:[#allocation3 + $0x1a0] sm:$0xf0]  ;;  %v5042_v49 = vld [vmem:[#allocation3 + $0x528] sm:$0xf] }
  0x23   :  { %2415 = vmatpush.bf16.msra.mxu1 %v5163_v33  ;;  %v4627_v50 = vor.u32 %v5880_v42, %v4624_v43  ;;  %v5992_v51 = vld [vmem:[#allocation3 + $0x560] sm:$0xf0]  ;;  %v5522_v52 = vld [vmem:[#allocation3 + $0x8e8] sm:$0xf]  ;;  %v5865_v54 = vld [vmem:[#allocation3 + $0x16c] sm:$0xf]  ;;  %v4563_v56 = vor.u32 %v5872_v48, %v4562_v47 }
  0x24   :  { %2433 = vmatpush.bf16.msra.mxu2 %v5643_v34  ;;  %v6112_v53 = vld [vmem:[#allocation3 + $0x920] sm:$0xf0]  ;;  %v4564_v55 = vld [vmem:[#allocation3 + $0x1a4] sm:$0xf0]  ;;  %v4502_v57 = vld [vmem:[#allocation3 + $0xf0] sm:$0xf]  ;;  %v5043_v58 = vor.u32 %v5992_v51, %v5042_v49 }
  0x25   :  { %2451 = vmatpush.bf16.msra.mxu3 %v4687_v38  ;;  %v5523_v59 = vor.u32 %v6112_v53, %v5522_v52  ;;  %v5857_v60 = vld [vmem:[#allocation3 + $0x128] sm:$0xf0]  ;;  %v4982_v61 = vld [vmem:[#allocation3 + $0x4b0] sm:$0xf]  ;;  %v4567_v63 = vor.u32 %v5865_v54, %v4564_v55  ;;  %v5850_v2 = vld [vmem:[#allocation3 + $0xf4] sm:$0xf] }
  0x26   :  { %2398 = vmatpush.bf16.msra.mxu0 %v4623_v44  ;;  %v5977_v62 = vld [vmem:[#allocation3 + $0x4e8] sm:$0xf0]  ;;  %v5462_v0 = vld [vmem:[#allocation3 + $0x870] sm:$0xf]  ;;  %v4503_v5 = vor.u32 %v5857_v60, %v4502_v57  ;;  %v102_v8 = vld [vmem:[#allocation10 + $0x10] sm:$0xff] }
  0x27   :  { %2416 = vmatpush.bf16.msra.mxu1 %v5103_v45  ;;  %v6097_v1 = vld [vmem:[#allocation3 + $0x8a8] sm:$0xf0]  ;;  %v4504_v3 = vld [vmem:[#allocation3 + $0x12c] sm:$0xf0]  ;;  %v4983_v6 = vor.u32 %v5977_v62, %v4982_v61  ;;  %v4442_v11 = vld [vmem:[#allocation3 + $0x78] sm:$0xf]  ;;  %v111_v15 = vmul.f32 %v102_v8, %v102_v8 }
  0x28   :  { %2434 = vmatpush.bf16.msra.mxu2 %v5583_v46  ;;  %v100_v4 = vld [vmem:[#allocation10] sm:$0xff]  ;;  %v101_v7 = vld [vmem:[#allocation10 + $0x8] sm:$0xff]  ;;  %v5463_v10 = vor.u32 %v6097_v1, %v5462_v0  ;;  %v4507_v16 = vor.u32 %v5850_v2, %v4504_v3  ;;  %v5835_v20 = vld [vmem:[#allocation3 + $0x7c] sm:$0xf] }
  0x29   :  { %2452 = vmatpush.bf16.msra.mxu3 %v4627_v50  ;;  %v109_v9 = vmul.f32 %v100_v4, %v100_v4  ;;  %v5842_v12 = vld [vmem:[#allocation3 + $0xb0] sm:$0xf0]  ;;  %v4922_v13 = vld [vmem:[#allocation3 + $0x438] sm:$0xf]  ;;  %v110_v14 = vmul.f32 %v101_v7, %v101_v7  ;;  %v4382_v23 = vld [vmem:[#allocation3] sm:$0xf] }
  0x2a   :  { %2399 = vmatpush.bf16.msra.mxu0 %v4563_v56  ;;  %v5962_v17 = vld [vmem:[#allocation3 + $0x470] sm:$0xf0]  ;;  %v5402_v18 = vld [vmem:[#allocation3 + $0x7f8] sm:$0xf]  ;;  %v4443_v24 = vor.u32 %v5842_v12, %v4442_v11  ;;  %v5827_v25 = vld [vmem:[#allocation3 + $0x38] sm:$0xf0] }
  0x2b   :  { %2417 = vmatpush.bf16.msra.mxu1 %v5043_v58  ;;  %v6082_v19 = vld [vmem:[#allocation3 + $0x830] sm:$0xf0]  ;;  %v4444_v21 = vld [vmem:[#allocation3 + $0xb4] sm:$0xf0]  ;;  %v118_v22 = vadd.f32 %v110_v14, %v109_v9  ;;  %v4862_v26 = vld [vmem:[#allocation3 + $0x3c0] sm:$0xf]  ;;  %v4923_v28 = vor.u32 %v5962_v17, %v4922_v13  ;;  %v4383_v43 = vor.u32 %v5827_v25, %v4382_v23 }
  0x2c   :  { %2435 = vmatpush.bf16.msra.mxu2 %v5523_v59  ;;  %v5947_v27 = vld [vmem:[#allocation3 + $0x3f8] sm:$0xf0]  ;;  %v5403_v29 = vor.u32 %v6082_v19, %v5402_v18  ;;  %v5342_v31 = vld [vmem:[#allocation3 + $0x780] sm:$0xf]  ;;  %v5820_v33 = vld [vmem:[#allocation3 + $0x4] sm:$0xf]  ;;  %v4447_v34 = vor.u32 %v5835_v20, %v4444_v21 }
  0x2d   :  { %2453 = vmatpush.bf16.msra.mxu3 %v4567_v63  ;;  %v119_v30 = vadd.f32 %v118_v22, %v111_v15  ;;  %v6067_v32 = vld [vmem:[#allocation3 + $0x7b8] sm:$0xf0]  ;;  %v4384_v35 = vld [vmem:[#allocation3 + $0x3c] sm:$0xf0]  ;;  %v173_v38 = vld [vmem:[#allocation8 + $0x8] sm:$0xff]  ;;  %v4863_v47 = vor.u32 %v5947_v27, %v4862_v26 }
  0x2e   :  { %2400 = vmatpush.bf16.msra.mxu0 %v4503_v5  ;;  %v172_v36 = vld [vmem:[#allocation8] sm:$0xff]  ;;  %v175_v37 = vld [vmem:[#allocation8 + $0x18] sm:$0xff]  ;;  %v174_v40 = vld [vmem:[#allocation8 + $0x10] sm:$0xff]  ;;  %v5343_v48 = vor.u32 %v6067_v32, %v5342_v31  ;;  %v4387_v52 = vor.u32 %v5820_v33, %v4384_v35 }
  0x2f   :  { %2418 = vmatpush.bf16.msra.mxu1 %v4983_v6  ;;  %120 = vadd.xlane.f32.xlu0 %v119_v30  ;;  %v176_v39 = vld [vmem:[#allocation8 + $0x20] sm:$0xff]  ;;  %v6045_v41 = vld [vmem:[#allocation3 + $0x70c] sm:$0xf]  ;;  %v4810_v49 = vld [vmem:[#allocation3 + $0x350] sm:$0xf]  ;;  %v6634_v59 = vpack.c.bf16 %v175_v37, %v172_v36 }
  0x30   :  { %2436 = vmatpush.bf16.msra.mxu2 %v5463_v10  ;;  %v5284_v42 = vld [vmem:[#allocation3 + $0x744] sm:$0xf0]  ;;  %v6165_v45 = vld [vmem:[#allocation3 + $0xacc] sm:$0xf]  ;;  %v5290_v55 = vld [vmem:[#allocation3 + $0x710] sm:$0xf]  ;;  %v6636_v1 = vpack.c.bf16 %v176_v39, %v173_v38 }
  0x31   :  { %2454 = vmatpush.bf16.msra.mxu3 %v4507_v16  ;;  %v177_v44 = vld [vmem:[#allocation8 + $0x28] sm:$0xff]  ;;  %v103_v50 = vld [vmem:[#allocation10 + $0x18] sm:$0xff]  ;;  %v5287_v53 = vor.u32 %v6045_v41, %v5284_v42  ;;  %v105_v56 = vld [vmem:[#allocation10 + $0x28] sm:$0xff] }
  0x32   :  { %2401 = vmatpush.bf16.msra.mxu0 %v4443_v24  ;;  %v5764_v46 = vld [vmem:[#allocation3 + $0xb04] sm:$0xf0]  ;;  %v5933_v54 = vld [vmem:[#allocation3 + $0x388] sm:$0xf0]  ;;  %v112_v57 = vmul.f32 %v103_v50, %v103_v50  ;;  %v6030_v62 = vld [vmem:[#allocation3 + $0x694] sm:$0xf]  ;;  %v114_v0 = vmul.f32 %v105_v56, %v105_v56  ;;  %v6638_v2 = vpack.c.bf16 %v177_v44, %v174_v40 }
  0x33   :  { %2419 = vmatpush.bf16.msra.mxu1 %v4923_v28  ;;  %v104_v51 = vld [vmem:[#allocation10 + $0x20] sm:$0xff]  ;;  %v5767_v60 = vor.u32 %v6165_v45, %v5764_v46  ;;  %v6150_v3 = vld [vmem:[#allocation3 + $0xa54] sm:$0xf]  ;;  %v4811_v6 = vor.u32 %v5933_v54, %v4810_v49  ;;  %v4750_v7 = vld [vmem:[#allocation3 + $0x2d8] sm:$0xf] }
  0x34   :  { %2437 = vmatpush.bf16.msra.mxu2 %v5403_v29  ;;  %v113_v58 = vmul.f32 %v104_v51, %v104_v51  ;;  %v6053_v61 = vld [vmem:[#allocation3 + $0x748] sm:$0xf0]  ;;  %v5224_v63 = vld [vmem:[#allocation3 + $0x6cc] sm:$0xf0]  ;;  %v5918_v8 = vld [vmem:[#allocation3 + $0x310] sm:$0xf0] }
  0x35   :  { %2455 = vmatpush.bf16.msra.mxu3 %v4447_v34  ;;  %v5704_v4 = vld [vmem:[#allocation3 + $0xa8c] sm:$0xf0]  ;;  %v5291_v9 = vor.u32 %v6053_v61, %v5290_v55  ;;  %v5227_v10 = vor.u32 %v6030_v62, %v5224_v63  ;;  %v5230_v11 = vld [vmem:[#allocation3 + $0x698] sm:$0xf]  ;;  %v6038_v12 = vld [vmem:[#allocation3 + $0x6d0] sm:$0xf0]  ;;  %v4751_v23 = vor.u32 %v5918_v8, %v4750_v7 }
  0x36   :  { %2402 = vmatpush.bf16.msra.mxu0 %v4383_v43  ;;  %v122_v5 = vadd.f32 %v113_v58, %v112_v57  ;;  %v6015_v13 = vld [vmem:[#allocation3 + $0x61c] sm:$0xf]  ;;  %v5707_v14 = vor.u32 %v6150_v3, %v5704_v4  ;;  %v5164_v16 = vld [vmem:[#allocation3 + $0x654] sm:$0xf0]  ;;  %v107_v20 = vld [vmem:[#allocation10 + $0x38] sm:$0xff]  ;;  %v5231_v26 = vor.u32 %v6038_v12, %v5230_v11 }
  0x37   :  { %2420 = vmatpush.bf16.msra.mxu1 %v4863_v47  ;;  %v6135_v17 = vld [vmem:[#allocation3 + $0x9dc] sm:$0xf]  ;;  %v5644_v19 = vld [vmem:[#allocation3 + $0xa14] sm:$0xf0]  ;;  %v108_v21 = vld [vmem:[#allocation10 + $0x40] sm:$0xff]  ;;  %v116_v24 = vmul.f32 %v107_v20, %v107_v20  ;;  %v5167_v27 = vor.u32 %v6015_v13, %v5164_v16 }
  0x38   :  { %2438 = vmatpush.bf16.msra.mxu2 %v5343_v48  ;;  %v123_v15 = vadd.f32 %v122_v5, %v114_v0  ;;  %v106_v18 = vld [vmem:[#allocation10 + $0x30] sm:$0xff]  ;;  %v117_v25 = vmul.f32 %v108_v21, %v108_v21  ;;  %v5647_v31 = vor.u32 %v6135_v17, %v5644_v19  ;;  %v6000_v33 = vld [vmem:[#allocation3 + $0x5a4] sm:$0xf]  ;;  %v4630_v42 = vld [vmem:[#allocation3 + $0x1e8] sm:$0xf] }
  0x39   :  { %2456 = vmatpush.bf16.msra.mxu3 %v4387_v52  ;;  %2403 = vmatmul.bf16.vlgmr.msra.gmra.mxu0 %v6634_v59  ;;  %v115_v22 = vmul.f32 %v106_v18, %v106_v18  ;;  %v4690_v28 = vld [vmem:[#allocation3 + $0x260] sm:$0xf]  ;;  %v5903_v29 = vld [vmem:[#allocation3 + $0x298] sm:$0xf0]  ;;  %v6120_v36 = vld [vmem:[#allocation3 + $0x964] sm:$0xf] }
  0x3a   :  { %2467 = vmatpush.bf16.msrb.mxu0 %v5287_v53  ;;  %2421 = vmatmul.bf16.vlgmr.msra.gmra.mxu1 %v6636_v1  ;;  %v5170_v30 = vld [vmem:[#allocation3 + $0x620] sm:$0xf]  ;;  %v6023_v32 = vld [vmem:[#allocation3 + $0x658] sm:$0xf0]  ;;  %v4691_v38 = vor.u32 %v5903_v29, %v4690_v28  ;;  %v5888_v43 = vld [vmem:[#allocation3 + $0x220] sm:$0xf0] }
  0x3b   :  { %2485 = vmatpush.bf16.msrb.mxu1 %v5767_v60  ;;  %2439 = vmatmul.bf16.vlgmr.msra.gmra.mxu2 %v6638_v2  ;;  %v5104_v34 = vld [vmem:[#allocation3 + $0x5dc] sm:$0xf0]  ;;  %v126_v35 = vadd.f32 %v116_v24, %v115_v22  ;;  %v5171_v40 = vor.u32 %v6023_v32, %v5170_v30  ;;  %v5110_v44 = vld [vmem:[#allocation3 + $0x5a8] sm:$0xf]  ;;  %v6008_v46 = vld [vmem:[#allocation3 + $0x5e0] sm:$0xf0]  ;;  %v4631_v52 = vor.u32 %v5888_v43, %v4630_v42 }
  0x3c   :  { %2457 = vmatmul.bf16.vlgmr.msra.gmra.mxu3 %v6634_v59  ;;  %2503 = vmatpush.bf16.msrb.mxu2 %v4811_v6  ;;  %v5584_v37 = vld [vmem:[#allocation3 + $0x99c] sm:$0xf0]  ;;  %v5107_v41 = vor.u32 %v6000_v33, %v5104_v34  ;;  %v5985_v47 = vld [vmem:[#allocation3 + $0x52c] sm:$0xf]  ;;  %v5044_v48 = vld [vmem:[#allocation3 + $0x564] sm:$0xf0]  ;;  %v5111_v55 = vor.u32 %v6008_v46, %v5110_v44 }
  0x3d   :  { %2521 = vmatpush.bf16.msrb.mxu3 %v5291_v9  ;;  %124 = vadd.xlane.f32.xlu0 %v123_v15  ;;  %v127_v39 = vadd.f32 %v126_v35, %v117_v25  ;;  %v5587_v45 = vor.u32 %v6120_v36, %v5584_v37  ;;  %v178_v49 = vld [vmem:[#allocation8 + $0x30] sm:$0xff]  ;;  %v6105_v50 = vld [vmem:[#allocation3 + $0x8ec] sm:$0xf]  ;;  %v5524_v51 = vld [vmem:[#allocation3 + $0x924] sm:$0xf0]  ;;  %v5047_v56 = vor.u32 %v5985_v47, %v5044_v48 }
  0x3e   :  { %2468 = vmatpush.bf16.msrb.mxu0 %v5227_v10  ;;  %v179_v53 = vld [vmem:[#allocation8 + $0x38] sm:$0xff]  ;;  %v180_v54 = vld [vmem:[#allocation8 + $0x40] sm:$0xff]  ;;  %v4570_v57 = vld [vmem:[#allocation3 + $0x170] sm:$0xf]  ;;  %v6644_v61 = vpack.c.bf16 %v178_v49, %v178_v49  ;;  %v5527_v62 = vor.u32 %v6105_v50, %v5524_v51 }
  0x3f   :  { %2486 = vmatpush.bf16.msrb.mxu1 %v5707_v14  ;;  %128 = vadd.xlane.f32.xlu1 %v127_v39  ;;  %v5873_v58 = vld [vmem:[#allocation3 + $0x1a8] sm:$0xf0]  ;;  %v5050_v60 = vld [vmem:[#allocation3 + $0x530] sm:$0xf]  ;;  %v5970_v0 = vld [vmem:[#allocation3 + $0x4b4] sm:$0xf]  ;;  %v6646_v4 = vpack.c.bf16 %v179_v53, %v179_v53  ;;  %v6648_v5 = vpack.c.bf16 %v180_v54, %v180_v54 }
  0x40   :  { %2504 = vmatpush.bf16.msrb.mxu2 %v4751_v23  ;;  %v5993_v63 = vld [vmem:[#allocation3 + $0x568] sm:$0xf0]  ;;  %v4984_v3 = vld [vmem:[#allocation3 + $0x4ec] sm:$0xf0]  ;;  %v6090_v6 = vld [vmem:[#allocation3 + $0x874] sm:$0xf]  ;;  %v4571_v8 = vor.u32 %v5873_v58, %v4570_v57 }
  0x41   :  { %2522 = vmatpush.bf16.msrb.mxu3 %v5231_v26  ;;  %v5464_v7 = vld [vmem:[#allocation3 + $0x8ac] sm:$0xf0]  ;;  %v5051_v9 = vor.u32 %v5993_v63, %v5050_v60  ;;  %v4987_v10 = vor.u32 %v5970_v0, %v4984_v3  ;;  %v4510_v11 = vld [vmem:[#allocation3 + $0xf8] sm:$0xf]  ;;  %v5858_v12 = vld [vmem:[#allocation3 + $0x130] sm:$0xf0] }
  0x42   :  { %2469 = vmatpush.bf16.msrb.mxu0 %v5167_v27  ;;  %v4990_v13 = vld [vmem:[#allocation3 + $0x4b8] sm:$0xf]  ;;  %v5467_v14 = vor.u32 %v6090_v6, %v5464_v7  ;;  %v5978_v15 = vld [vmem:[#allocation3 + $0x4f0] sm:$0xf0]  ;;  %v5955_v16 = vld [vmem:[#allocation3 + $0x43c] sm:$0xf]  ;;  %v4511_v20 = vor.u32 %v5858_v12, %v4510_v11 }
  0x43   :  { %2487 = vmatpush.bf16.msrb.mxu1 %v5647_v31  ;;  %v4924_v17 = vld [vmem:[#allocation3 + $0x474] sm:$0xf0]  ;;  %v6075_v18 = vld [vmem:[#allocation3 + $0x7fc] sm:$0xf]  ;;  %v4450_v21 = vld [vmem:[#allocation3 + $0x80] sm:$0xf]  ;;  %v4991_v22 = vor.u32 %v5978_v15, %v4990_v13 }
  0x44   :  { %2505 = vmatpush.bf16.msrb.mxu2 %v4691_v38  ;;  %v5404_v19 = vld [vmem:[#allocation3 + $0x834] sm:$0xf0]  ;;  %v4927_v23 = vor.u32 %v5955_v16, %v4924_v17  ;;  %v5843_v24 = vld [vmem:[#allocation3 + $0xb8] sm:$0xf0]  ;;  %v4930_v25 = vld [vmem:[#allocation3 + $0x440] sm:$0xf] }
  0x45   :  { %2523 = vmatpush.bf16.msrb.mxu3 %v5171_v40  ;;  %v5963_v26 = vld [vmem:[#allocation3 + $0x478] sm:$0xf0]  ;;  %v5407_v27 = vor.u32 %v6075_v18, %v5404_v19  ;;  %v5940_v28 = vld [vmem:[#allocation3 + $0x3c4] sm:$0xf]  ;;  %v4864_v29 = vld [vmem:[#allocation3 + $0x3fc] sm:$0xf0]  ;;  %v4451_v34 = vor.u32 %v5843_v24, %v4450_v21 }
  0x46   :  { %2470 = vmatpush.bf16.msrb.mxu0 %v5107_v41  ;;  %v6060_v30 = vld [vmem:[#allocation3 + $0x784] sm:$0xf]  ;;  %v5344_v31 = vld [vmem:[#allocation3 + $0x7bc] sm:$0xf0]  ;;  %v5770_v32 = vld [vmem:[#allocation3 + $0xad0] sm:$0xf]  ;;  %v4931_v37 = vor.u32 %v5963_v26, %v4930_v25  ;;  %v4867_v38 = vor.u32 %v5940_v28, %v4864_v29 }
  0x47   :  { %2488 = vmatpush.bf16.msrb.mxu1 %v5587_v45  ;;  %v6173_v33 = vld [vmem:[#allocation3 + $0xb08] sm:$0xf0]  ;;  %v5926_v35 = vld [vmem:[#allocation3 + $0x354] sm:$0xf]  ;;  %v4812_v36 = vld [vmem:[#allocation3 + $0x38c] sm:$0xf0]  ;;  %v5347_v42 = vor.u32 %v6060_v30, %v5344_v31 }
  0x48   :  { %2506 = vmatpush.bf16.msrb.mxu2 %v4631_v52  ;;  %v4390_v39 = vld [vmem:[#allocation3 + $0x8] sm:$0xf]  ;;  %v5828_v40 = vld [vmem:[#allocation3 + $0x40] sm:$0xf0]  ;;  %v5771_v44 = vor.u32 %v6173_v33, %v5770_v32  ;;  %v6046_v45 = vld [vmem:[#allocation3 + $0x714] sm:$0xf]  ;;  %v4815_v47 = vor.u32 %v5926_v35, %v4812_v36 }
  0x49   :  { %2524 = vmatpush.bf16.msrb.mxu3 %v5111_v55  ;;  %2408 = vmatmul.bf16.gmra.mxu0 %v6644_v61  ;;  %v4870_v41 = vld [vmem:[#allocation3 + $0x3c8] sm:$0xf]  ;;  %v5948_v43 = vld [vmem:[#allocation3 + $0x400] sm:$0xf0]  ;;  %v5292_v46 = vld [vmem:[#allocation3 + $0x74c] sm:$0xf0]  ;;  %v4391_v50 = vor.u32 %v5828_v40, %v4390_v39 }
  0x4a   :  { %2471 = vmatpush.bf16.msrb.mxu0 %v5047_v56  ;;  %2426 = vmatmul.bf16.gmra.mxu1 %v6646_v4  ;;  %v6166_v48 = vld [vmem:[#allocation3 + $0xad4] sm:$0xf]  ;;  %v5772_v49 = vld [vmem:[#allocation3 + $0xb0c] sm:$0xf0]  ;;  %v4871_v51 = vor.u32 %v5948_v43, %v4870_v41  ;;  %v5911_v52 = vld [vmem:[#allocation3 + $0x2dc] sm:$0xf]  ;;  %v5295_v54 = vor.u32 %v6046_v45, %v5292_v46 }
  0x4b   :  { %2489 = vmatpush.bf16.msrb.mxu1 %v5527_v62  ;;  %2444 = vmatmul.bf16.gmra.mxu2 %v6648_v5  ;;  %v4752_v53 = vld [vmem:[#allocation3 + $0x314] sm:$0xf0]  ;;  %v5775_v56 = vor.u32 %v6166_v48, %v5772_v49  ;;  %v6158_v57 = vld [vmem:[#allocation3 + $0xa90] sm:$0xf0]  ;;  %v6031_v58 = vld [vmem:[#allocation3 + $0x69c] sm:$0xf] }
  0x4c   :  { %2462 = vmatmul.bf16.gmra.mxu3 %v6644_v61  ;;  %2507 = vmatpush.bf16.msrb.mxu2 %v4571_v8  ;;  %v5710_v55 = vld [vmem:[#allocation3 + $0xa58] sm:$0xf]  ;;  %v6151_v62 = vld [vmem:[#allocation3 + $0xa5c] sm:$0xf]  ;;  %v4755_v0 = vor.u32 %v5911_v52, %v4752_v53  ;;  %v5896_v6 = vld [vmem:[#allocation3 + $0x264] sm:$0xf] }
  0x4d   :  { %2525 = vmatpush.bf16.msrb.mxu3 %v5051_v9  ;;  %v5232_v60 = vld [vmem:[#allocation3 + $0x6d4] sm:$0xf0]  ;;  %v5711_v3 = vor.u32 %v6158_v57, %v5710_v55  ;;  %v4692_v7 = vld [vmem:[#allocation3 + $0x29c] sm:$0xf0]  ;;  %v6143_v11 = vld [vmem:[#allocation3 + $0xa18] sm:$0xf0] }
  0x4e   :  { %2472 = vmatpush.bf16.msrb.mxu0 %v4987_v10  ;;  %v5712_v63 = vld [vmem:[#allocation3 + $0xa94] sm:$0xf0]  ;;  %v5235_v8 = vor.u32 %v6031_v58, %v5232_v60  ;;  %v5650_v9 = vld [vmem:[#allocation3 + $0x9e0] sm:$0xf]  ;;  %v6016_v12 = vld [vmem:[#allocation3 + $0x624] sm:$0xf]  ;;  %v4695_v16 = vor.u32 %v5896_v6, %v4692_v7 }
  0x4f   :  { %2490 = vmatpush.bf16.msrb.mxu1 %v5467_v14  ;;  %v5715_v10 = vor.u32 %v6151_v62, %v5712_v63  ;;  %v5172_v13 = vld [vmem:[#allocation3 + $0x65c] sm:$0xf0]  ;;  %v6136_v14 = vld [vmem:[#allocation3 + $0x9e4] sm:$0xf]  ;;  %v5651_v17 = vor.u32 %v6143_v11, %v5650_v9  ;;  %v5881_v18 = vld [vmem:[#allocation3 + $0x1ec] sm:$0xf] }
  0x50   :  { %2508 = vmatpush.bf16.msrb.mxu2 %v4511_v20  ;;  %v5652_v15 = vld [vmem:[#allocation3 + $0xa1c] sm:$0xf0]  ;;  %v4632_v19 = vld [vmem:[#allocation3 + $0x224] sm:$0xf0]  ;;  %v5175_v20 = vor.u32 %v6016_v12, %v5172_v13  ;;  %v6001_v24 = vld [vmem:[#allocation3 + $0x5ac] sm:$0xf] }
  0x51   :  { %2526 = vmatpush.bf16.msrb.mxu3 %v4991_v22  ;;  %v5590_v21 = vld [vmem:[#allocation3 + $0x968] sm:$0xf]  ;;  %v5655_v22 = vor.u32 %v6136_v14, %v5652_v15  ;;  %v6121_v26 = vld [vmem:[#allocation3 + $0x96c] sm:$0xf]  ;;  %v4635_v28 = vor.u32 %v5881_v18, %v4632_v19  ;;  %v5866_v30 = vld [vmem:[#allocation3 + $0x174] sm:$0xf] }
  0x52   :  { %2473 = vmatpush.bf16.msrb.mxu0 %v4927_v23  ;;  %v6128_v23 = vld [vmem:[#allocation3 + $0x9a0] sm:$0xf0]  ;;  %v5112_v25 = vld [vmem:[#allocation3 + $0x5e4] sm:$0xf0]  ;;  %v4572_v31 = vld [vmem:[#allocation3 + $0x1ac] sm:$0xf0] }
  0x53   :  { %2491 = vmatpush.bf16.msrb.mxu1 %v5407_v27  ;;  %v5592_v27 = vld [vmem:[#allocation3 + $0x9a4] sm:$0xf0]  ;;  %v5591_v29 = vor.u32 %v6128_v23, %v5590_v21  ;;  %v5115_v32 = vor.u32 %v6001_v24, %v5112_v25  ;;  %v5530_v33 = vld [vmem:[#allocation3 + $0x8f0] sm:$0xf]  ;;  %v6113_v35 = vld [vmem:[#allocation3 + $0x928] sm:$0xf0]  ;;  %v4575_v40 = vor.u32 %v5866_v30, %v4572_v31 }
  0x54   :  { %2509 = vmatpush.bf16.msrb.mxu2 %v4451_v34  ;;  %v5595_v34 = vor.u32 %v6121_v26, %v5592_v27  ;;  %v5986_v36 = vld [vmem:[#allocation3 + $0x534] sm:$0xf]  ;;  %v5532_v39 = vld [vmem:[#allocation3 + $0x92c] sm:$0xf0]  ;;  %v5531_v41 = vor.u32 %v6113_v35, %v5530_v33  ;;  %v4512_v43 = vld [vmem:[#allocation3 + $0x134] sm:$0xf0] }
  0x55   :  { %2527 = vmatpush.bf16.msrb.mxu3 %v4931_v37  ;;  %v5052_v37 = vld [vmem:[#allocation3 + $0x56c] sm:$0xf0]  ;;  %v5470_v45 = vld [vmem:[#allocation3 + $0x878] sm:$0xf]  ;;  %v5971_v48 = vld [vmem:[#allocation3 + $0x4bc] sm:$0xf] }
  0x56   :  { %2474 = vmatpush.bf16.msrb.mxu0 %v4867_v38  ;;  %v6106_v38 = vld [vmem:[#allocation3 + $0x8f4] sm:$0xf]  ;;  %v4992_v49 = vld [vmem:[#allocation3 + $0x4f4] sm:$0xf0]  ;;  %v4452_v55 = vld [vmem:[#allocation3 + $0xbc] sm:$0xf0] }
  0x57   :  { %2492 = vmatpush.bf16.msrb.mxu1 %v5347_v42  ;;  %v5851_v42 = vld [vmem:[#allocation3 + $0xfc] sm:$0xf]  ;;  %v5535_v46 = vor.u32 %v6106_v38, %v5532_v39  ;;  %v5410_v57 = vld [vmem:[#allocation3 + $0x800] sm:$0xf]  ;;  %v5956_v62 = vld [vmem:[#allocation3 + $0x444] sm:$0xf] }
  0x58   :  { %2510 = vmatpush.bf16.msrb.mxu2 %v4391_v50  ;;  %v6091_v50 = vld [vmem:[#allocation3 + $0x87c] sm:$0xf]  ;;  %v4515_v52 = vor.u32 %v5851_v42, %v4512_v43  ;;  %v4932_v63 = vld [vmem:[#allocation3 + $0x47c] sm:$0xf0]  ;;  %v5821_v7 = vld [vmem:[#allocation3 + $0xc] sm:$0xf] }
  0x59   :  { %2528 = vmatpush.bf16.msrb.mxu3 %v4871_v51  ;;  %2475 = vmatmul.bf16.vlgmr.msrb.gmra.mxu0 %v6636_v1  ;;  %v5472_v51 = vld [vmem:[#allocation3 + $0x8b4] sm:$0xf0]  ;;  %v6083_v60 = vld [vmem:[#allocation3 + $0x838] sm:$0xf0]  ;;  %v4935_v11 = vor.u32 %v5956_v62, %v4932_v63  ;;  %v6054_v12 = vld [vmem:[#allocation3 + $0x750] sm:$0xf0] }
  0x5a   :  { %2539 = vmatpush.bf16.msra.mxu0 %v5771_v44  ;;  %2493 = vmatmul.bf16.vlgmr.msrb.gmra.mxu1 %v6638_v2  ;;  %v5055_v44 = vor.u32 %v5986_v36, %v5052_v37  ;;  %v5475_v58 = vor.u32 %v6091_v50, %v5472_v51  ;;  %v5298_v9 = vld [vmem:[#allocation3 + $0x718] sm:$0xf]  ;;  %v5350_v13 = vld [vmem:[#allocation3 + $0x788] sm:$0xf]  ;;  %v6068_v14 = vld [vmem:[#allocation3 + $0x7c0] sm:$0xf0] }
  0x5b   :  { %2557 = vmatpush.bf16.msra.mxu1 %v4815_v47  ;;  %2511 = vmatmul.bf16.vlgmr.msrb.gmra.mxu2 %v6634_v59  ;;  %v6098_v47 = vld [vmem:[#allocation3 + $0x8b0] sm:$0xf0]  ;;  %v6061_v18 = vld [vmem:[#allocation3 + $0x78c] sm:$0xf]  ;;  %v5352_v19 = vld [vmem:[#allocation3 + $0x7c4] sm:$0xf0]  ;;  %v5299_v25 = vor.u32 %v6054_v12, %v5298_v9  ;;  %v5351_v26 = vor.u32 %v6068_v14, %v5350_v13 }
  0x5c   :  { %2575 = vmatpush.bf16.msra.mxu2 %v5295_v54  ;;  %2529 = vmatmul.bf16.vlgmr.msrb.gmra.mxu3 %v6636_v1  ;;  %v5471_v53 = vor.u32 %v6098_v47, %v5470_v45  ;;  %v5836_v54 = vld [vmem:[#allocation3 + $0x84] sm:$0xf]  ;;  %v5934_v21 = vld [vmem:[#allocation3 + $0x390] sm:$0xf0]  ;;  %v5778_v23 = vld [vmem:[#allocation3 + $0xad8] sm:$0xf]  ;;  %v5355_v30 = vor.u32 %v6061_v18, %v5352_v19 }
  0x5d   :  { %2593 = vmatpush.bf16.msra.mxu3 %v5775_v56  ;;  %v4995_v56 = vor.u32 %v5971_v48, %v4992_v49  ;;  %v4455_v6 = vor.u32 %v5836_v54, %v4452_v55  ;;  %v6174_v24 = vld [vmem:[#allocation3 + $0xb10] sm:$0xf0]  ;;  %v5927_v27 = vld [vmem:[#allocation3 + $0x35c] sm:$0xf]  ;;  %v5238_v31 = vld [vmem:[#allocation3 + $0x6a0] sm:$0xf] }
  0x5e   :  { %2540 = vmatpush.bf16.msra.mxu0 %v5711_v3  ;;  %v5412_v3 = vld [vmem:[#allocation3 + $0x83c] sm:$0xf0]  ;;  %v5919_v38 = vld [vmem:[#allocation3 + $0x318] sm:$0xf0]  ;;  %v5178_v39 = vld [vmem:[#allocation3 + $0x628] sm:$0xf] }
  0x5f   :  { %2558 = vmatpush.bf16.msra.mxu1 %v4755_v0  ;;  %v6076_v0 = vld [vmem:[#allocation3 + $0x804] sm:$0xf]  ;;  %v4758_v37 = vld [vmem:[#allocation3 + $0x2e0] sm:$0xf]  ;;  %v6159_v42 = vld [vmem:[#allocation3 + $0xa98] sm:$0xf0] }
  0x60   :  { %2576 = vmatpush.bf16.msra.mxu2 %v5235_v8  ;;  %v4392_v8 = vld [vmem:[#allocation3 + $0x44] sm:$0xf0]  ;;  %v5415_v15 = vor.u32 %v6076_v0, %v5412_v3  ;;  %v5912_v43 = vld [vmem:[#allocation3 + $0x2e4] sm:$0xf]  ;;  %v4759_v45 = vor.u32 %v5919_v38, %v4758_v37  ;;  %v5118_v50 = vld [vmem:[#allocation3 + $0x5b0] sm:$0xf] }
  0x61   :  { %2594 = vmatpush.bf16.msra.mxu3 %v5715_v10  ;;  %v5411_v10 = vor.u32 %v6083_v60, %v5410_v57  ;;  %v4698_v47 = vld [vmem:[#allocation3 + $0x268] sm:$0xf]  ;;  %v5904_v48 = vld [vmem:[#allocation3 + $0x2a0] sm:$0xf0]  ;;  %v5897_v55 = vld [vmem:[#allocation3 + $0x26c] sm:$0xf] }
  0x62   :  { %2541 = vmatpush.bf16.msra.mxu0 %v5651_v17  ;;  %v4872_v17 = vld [vmem:[#allocation3 + $0x404] sm:$0xf0]  ;;  %v6144_v54 = vld [vmem:[#allocation3 + $0xa20] sm:$0xf0]  ;;  %v4699_v57 = vor.u32 %v5904_v48, %v4698_v47  ;;  %v4638_v60 = vld [vmem:[#allocation3 + $0x1f0] sm:$0xf] }
  0x63   :  { %2559 = vmatpush.bf16.msra.mxu1 %v4695_v16  ;;  %v5941_v16 = vld [vmem:[#allocation3 + $0x3cc] sm:$0xf]  ;;  %v5058_v0 = vld [vmem:[#allocation3 + $0x538] sm:$0xf]  ;;  %v5882_v9 = vld [vmem:[#allocation3 + $0x1f4] sm:$0xf] }
  0x64   :  { %2577 = vmatpush.bf16.msra.mxu2 %v5175_v20  ;;  %v4818_v20 = vld [vmem:[#allocation3 + $0x358] sm:$0xf]  ;;  %v5889_v62 = vld [vmem:[#allocation3 + $0x228] sm:$0xf0]  ;;  %v5874_v14 = vld [vmem:[#allocation3 + $0x1b0] sm:$0xf0] }
  0x65   :  { %2595 = vmatpush.bf16.msra.mxu3 %v5655_v22  ;;  %v4395_v22 = vor.u32 %v5821_v7, %v4392_v8  ;;  %v4819_v33 = vor.u32 %v5934_v21, %v4818_v20  ;;  %v5598_v7 = vld [vmem:[#allocation3 + $0x970] sm:$0xf]  ;;  %v6129_v8 = vld [vmem:[#allocation3 + $0x9a8] sm:$0xf0]  ;;  %v4578_v13 = vld [vmem:[#allocation3 + $0x178] sm:$0xf] }
  0x66   :  { %2542 = vmatpush.bf16.msra.mxu0 %v5591_v29  ;;  %v4875_v29 = vor.u32 %v5941_v16, %v4872_v17  ;;  %v4998_v16 = vld [vmem:[#allocation3 + $0x4c0] sm:$0xf]  ;;  %v5979_v18 = vld [vmem:[#allocation3 + $0x4f8] sm:$0xf0]  ;;  %v5538_v19 = vld [vmem:[#allocation3 + $0x8f8] sm:$0xf] }
  0x67   :  { %2560 = vmatpush.bf16.msra.mxu1 %v4635_v28  ;;  %v4820_v28 = vld [vmem:[#allocation3 + $0x394] sm:$0xf0]  ;;  %v6114_v20 = vld [vmem:[#allocation3 + $0x930] sm:$0xf0]  ;;  %v5867_v21 = vld [vmem:[#allocation3 + $0x17c] sm:$0xf] }
  0x68   :  { %2578 = vmatpush.bf16.msra.mxu2 %v5115_v32  ;;  %v6039_v32 = vld [vmem:[#allocation3 + $0x6d8] sm:$0xf0]  ;;  %v4823_v35 = vor.u32 %v5927_v27, %v4820_v28  ;;  %v5539_v27 = vor.u32 %v6114_v20, %v5538_v19  ;;  %v4938_v28 = vld [vmem:[#allocation3 + $0x448] sm:$0xf]  ;;  %v5844_v38 = vld [vmem:[#allocation3 + $0xc0] sm:$0xf0] }
  0x69   :  { %2596 = vmatpush.bf16.msra.mxu3 %v5595_v34  ;;  %2480 = vmatmul.bf16.gmra.mxu0 %v6646_v4  ;;  %v5779_v34 = vor.u32 %v6174_v24, %v5778_v23  ;;  %v5239_v36 = vor.u32 %v6039_v32, %v5238_v31  ;;  %v4579_v23 = vor.u32 %v5874_v14, %v4578_v13  ;;  %v5478_v31 = vld [vmem:[#allocation3 + $0x880] sm:$0xf]  ;;  %v6099_v32 = vld [vmem:[#allocation3 + $0x8b8] sm:$0xf0]  ;;  %v5837_v47 = vld [vmem:[#allocation3 + $0x8c] sm:$0xf] }
  0x6a   :  { %2543 = vmatpush.bf16.msra.mxu0 %v5531_v41  ;;  %2498 = vmatmul.bf16.gmra.mxu1 %v6648_v5  ;;  %v5718_v41 = vld [vmem:[#allocation3 + $0xa60] sm:$0xf]  ;;  %v4999_v24 = vor.u32 %v5979_v18, %v4998_v16  ;;  %v4460_v48 = vld [vmem:[#allocation3 + $0xc4] sm:$0xf0] }
  0x6b   :  { %2561 = vmatpush.bf16.msra.mxu1 %v4575_v40  ;;  %2516 = vmatmul.bf16.gmra.mxu2 %v6644_v61  ;;  %v6024_v40 = vld [vmem:[#allocation3 + $0x660] sm:$0xf0]  ;;  %v5719_v49 = vor.u32 %v6159_v42, %v5718_v41  ;;  %v5949_v41 = vld [vmem:[#allocation3 + $0x408] sm:$0xf0]  ;;  %v5240_v16 = vld [vmem:[#allocation3 + $0x6dc] sm:$0xf0] }
  0x6c   :  { %2579 = vmatpush.bf16.msra.mxu2 %v5055_v44  ;;  %2534 = vmatmul.bf16.gmra.mxu3 %v6646_v4  ;;  %v4760_v44 = vld [vmem:[#allocation3 + $0x31c] sm:$0xf0]  ;;  %v5660_v18 = vld [vmem:[#allocation3 + $0xa24] sm:$0xf0] }
  0x6d   :  { %2597 = vmatpush.bf16.msra.mxu3 %v5535_v46  ;;  %v5179_v46 = vor.u32 %v6024_v40, %v5178_v39  ;;  %v4763_v51 = vor.u32 %v5912_v43, %v4760_v44  ;;  %v5479_v39 = vor.u32 %v6099_v32, %v5478_v31  ;;  %v4878_v40 = vld [vmem:[#allocation3 + $0x3d0] sm:$0xf]  ;;  %v6167_v43 = vld [vmem:[#allocation3 + $0xadc] sm:$0xf]  ;;  %v5418_v44 = vld [vmem:[#allocation3 + $0x808] sm:$0xf] }
  0x6e   :  { %2544 = vmatpush.bf16.msra.mxu0 %v5471_v53  ;;  %v5658_v53 = vld [vmem:[#allocation3 + $0x9e8] sm:$0xf] }
  0x6f   :  { %2562 = vmatpush.bf16.msra.mxu1 %v4515_v52  ;;  %v6009_v52 = vld [vmem:[#allocation3 + $0x5e8] sm:$0xf0]  ;;  %v5659_v63 = vor.u32 %v6144_v54, %v5658_v53  ;;  %v6047_v54 = vld [vmem:[#allocation3 + $0x71c] sm:$0xf] }
  0x70   :  { %2580 = vmatpush.bf16.msra.mxu2 %v4995_v56  ;;  %v4700_v56 = vld [vmem:[#allocation3 + $0x2a4] sm:$0xf0] }
  0x71   :  { %2598 = vmatpush.bf16.msra.mxu3 %v5475_v58  ;;  %v5119_v58 = vor.u32 %v6009_v52, %v5118_v50  ;;  %v4703_v3 = vor.u32 %v5897_v55, %v4700_v56  ;;  %v4398_v50 = vld [vmem:[#allocation3 + $0x10] sm:$0xf]  ;;  %v4879_v52 = vor.u32 %v5949_v41, %v4878_v40  ;;  %v5300_v55 = vld [vmem:[#allocation3 + $0x754] sm:$0xf0]  ;;  %v6152_v56 = vld [vmem:[#allocation3 + $0xa64] sm:$0xf] }
  0x72   :  { %2545 = vmatpush.bf16.msra.mxu0 %v5411_v10  ;;  %v4640_v10 = vld [vmem:[#allocation3 + $0x22c] sm:$0xf0]  ;;  %v6025_v40 = vld [vmem:[#allocation3 + $0x668] sm:$0xf0]  ;;  %v6107_v41 = vld [vmem:[#allocation3 + $0x8fc] sm:$0xf] }
  0x73   :  { %2563 = vmatpush.bf16.msra.mxu1 %v4455_v6  ;;  %v5994_v6 = vld [vmem:[#allocation3 + $0x570] sm:$0xf0]  ;;  %v4643_v17 = vor.u32 %v5882_v9, %v4640_v10  ;;  %v5306_v9 = vld [vmem:[#allocation3 + $0x720] sm:$0xf]  ;;  %v6055_v10 = vld [vmem:[#allocation3 + $0x758] sm:$0xf0] }
  0x74   :  { %2581 = vmatpush.bf16.msra.mxu2 %v4935_v11  ;;  %v4639_v11 = vor.u32 %v5889_v62, %v4638_v60  ;;  %v5059_v12 = vor.u32 %v5994_v6, %v5058_v0  ;;  %v5720_v60 = vld [vmem:[#allocation3 + $0xa9c] sm:$0xf0]  ;;  %v5358_v62 = vld [vmem:[#allocation3 + $0x790] sm:$0xf]  ;;  %v5822_v0 = vld [vmem:[#allocation3 + $0x14] sm:$0xf]  ;;  %v5307_v20 = vor.u32 %v6055_v10, %v5306_v9 }
  0x75   :  { %2599 = vmatpush.bf16.msra.mxu3 %v5415_v15  ;;  %v5599_v15 = vor.u32 %v6129_v8, %v5598_v7  ;;  %v4826_v6 = vld [vmem:[#allocation3 + $0x360] sm:$0xf]  ;;  %v5935_v8 = vld [vmem:[#allocation3 + $0x398] sm:$0xf0]  ;;  %v5723_v13 = vor.u32 %v6152_v56, %v5720_v60 }
  0x76   :  { %2546 = vmatpush.bf16.msra.mxu0 %v5351_v26  ;;  %v5859_v26 = vld [vmem:[#allocation3 + $0x138] sm:$0xf0]  ;;  %v4827_v19 = vor.u32 %v5935_v8, %v4826_v6  ;;  %v4586_v60 = vld [vmem:[#allocation3 + $0x180] sm:$0xf]  ;;  %v5420_v8 = vld [vmem:[#allocation3 + $0x844] sm:$0xf0] }
  0x77   :  { %2564 = vmatpush.bf16.msra.mxu1 %v4395_v22  ;;  %v4580_v22 = vld [vmem:[#allocation3 + $0x1b4] sm:$0xf0]  ;;  %v5995_v6 = vld [vmem:[#allocation3 + $0x578] sm:$0xf0] }
  0x78   :  { %2582 = vmatpush.bf16.msra.mxu2 %v4875_v29  ;;  %v4583_v29 = vor.u32 %v5867_v21, %v4580_v22  ;;  %v6017_v22 = vld [vmem:[#allocation3 + $0x62c] sm:$0xf] }
  0x79   :  { %2600 = vmatpush.bf16.msra.mxu3 %v5355_v30  ;;  %2547 = vmatmul.bf16.vlgmr.msra.gmra.mxu0 %v6638_v2  ;;  %v5964_v30 = vld [vmem:[#allocation3 + $0x480] sm:$0xf0] }
  0x7a   :  { %2611 = vmatpush.bf16.msrb.mxu0 %v4819_v33  ;;  %2565 = vmatmul.bf16.vlgmr.msra.gmra.mxu1 %v6634_v59  ;;  %v5852_v33 = vld [vmem:[#allocation3 + $0x104] sm:$0xf]  ;;  %v4939_v37 = vor.u32 %v5964_v30, %v4938_v28  ;;  %v5600_v30 = vld [vmem:[#allocation3 + $0x9ac] sm:$0xf0] }
  0x7b   :  { %2629 = vmatpush.bf16.msrb.mxu1 %v5299_v25  ;;  %2583 = vmatmul.bf16.vlgmr.msra.gmra.mxu2 %v6636_v1  ;;  %v4518_v25 = vld [vmem:[#allocation3 + $0x100] sm:$0xf]  ;;  %v6040_v28 = vld [vmem:[#allocation3 + $0x6e0] sm:$0xf0] }
  0x7c   :  { %2647 = vmatpush.bf16.msrb.mxu2 %v5779_v34  ;;  %2601 = vmatmul.bf16.vlgmr.msra.gmra.mxu3 %v6638_v2  ;;  %v4520_v34 = vld [vmem:[#allocation3 + $0x13c] sm:$0xf0] }
  0x7d   :  { %2665 = vmatpush.bf16.msrb.mxu3 %v4823_v35  ;;  %v4519_v35 = vor.u32 %v5859_v26, %v4518_v25  ;;  %v4523_v42 = vor.u32 %v5852_v33, %v4520_v34  ;;  %v5180_v26 = vld [vmem:[#allocation3 + $0x664] sm:$0xf0]  ;;  %v6002_v34 = vld [vmem:[#allocation3 + $0x5b4] sm:$0xf] }
  0x7e   :  { %2612 = vmatpush.bf16.msrb.mxu0 %v4759_v45  ;;  %v6084_v45 = vld [vmem:[#allocation3 + $0x840] sm:$0xf0]  ;;  %v5183_v32 = vor.u32 %v6017_v22, %v5180_v26  ;;  %v4828_v22 = vld [vmem:[#allocation3 + $0x39c] sm:$0xf0]  ;;  %v5942_v26 = vld [vmem:[#allocation3 + $0x3d4] sm:$0xf] }
  0x7f   :  { %2630 = vmatpush.bf16.msrb.mxu1 %v5239_v36  ;;  %v4458_v36 = vld [vmem:[#allocation3 + $0x88] sm:$0xf]  ;;  %v5419_v53 = vor.u32 %v6084_v45, %v5418_v44 }
  0x80   :  { %2648 = vmatpush.bf16.msrb.mxu2 %v5719_v49  ;;  %v4459_v49 = vor.u32 %v5844_v38, %v4458_v36  ;;  %v5905_v36 = vld [vmem:[#allocation3 + $0x2a8] sm:$0xf0]  ;;  %v5120_v38 = vld [vmem:[#allocation3 + $0x5ec] sm:$0xf0] }
  0x81   :  { %2666 = vmatpush.bf16.msrb.mxu3 %v4763_v51  ;;  %v5829_v51 = vld [vmem:[#allocation3 + $0x48] sm:$0xf0]  ;;  %v5123_v44 = vor.u32 %v6002_v34, %v5120_v38  ;;  %v5786_v34 = vld [vmem:[#allocation3 + $0xae0] sm:$0xf] }
  0x82   :  { %2613 = vmatpush.bf16.msrb.mxu0 %v4699_v57  ;;  %v4399_v7 = vor.u32 %v5829_v51, %v4398_v50  ;;  %v5060_v50 = vld [vmem:[#allocation3 + $0x574] sm:$0xf0] }
  0x83   :  { %2631 = vmatpush.bf16.msrb.mxu1 %v5179_v46  ;;  %v5780_v46 = vld [vmem:[#allocation3 + $0xb14] sm:$0xf0] }
  0x84   :  { %2649 = vmatpush.bf16.msrb.mxu2 %v5659_v63  ;;  %v5783_v57 = vor.u32 %v6167_v43, %v5780_v46  ;;  %v6069_v63 = vld [vmem:[#allocation3 + $0x7c8] sm:$0xf0]  ;;  %v5987_v46 = vld [vmem:[#allocation3 + $0x53c] sm:$0xf]  ;;  %v5126_v51 = vld [vmem:[#allocation3 + $0x5b8] sm:$0xf] }
  0x85   :  { %2667 = vmatpush.bf16.msrb.mxu3 %v4703_v3  ;;  %v4400_v3 = vld [vmem:[#allocation3 + $0x4c] sm:$0xf0]  ;;  %v5063_v56 = vor.u32 %v5987_v46, %v5060_v50  ;;  %v5950_v46 = vld [vmem:[#allocation3 + $0x410] sm:$0xf0]  ;;  %v6160_v50 = vld [vmem:[#allocation3 + $0xaa0] sm:$0xf0] }
  0x86   :  { %2614 = vmatpush.bf16.msrb.mxu0 %v4639_v11  ;;  %v5303_v11 = vor.u32 %v6047_v54, %v5300_v55  ;;  %v4403_v14 = vor.u32 %v5822_v0, %v4400_v3  ;;  %v5480_v54 = vld [vmem:[#allocation3 + $0x8bc] sm:$0xf0] }
  0x87   :  { %2632 = vmatpush.bf16.msrb.mxu1 %v5119_v58  ;;  %v4463_v58 = vor.u32 %v5837_v47, %v4460_v48  ;;  %v4646_v47 = vld [vmem:[#allocation3 + $0x1f8] sm:$0xf]  ;;  %v5890_v48 = vld [vmem:[#allocation3 + $0x230] sm:$0xf0]  ;;  %v5000_v0 = vld [vmem:[#allocation3 + $0x4fc] sm:$0xf0] }
  0x88   :  { %2650 = vmatpush.bf16.msrb.mxu2 %v5599_v15  ;;  %v6032_v15 = vld [vmem:[#allocation3 + $0x6a4] sm:$0xf]  ;;  %v4647_v55 = vor.u32 %v5890_v48, %v4646_v47  ;;  %v5066_v3 = vld [vmem:[#allocation3 + $0x540] sm:$0xf] }
  0x89   :  { %2668 = vmatpush.bf16.msrb.mxu3 %v4643_v17  ;;  %2552 = vmatmul.bf16.gmra.mxu0 %v6648_v5  ;;  %v6137_v17 = vld [vmem:[#allocation3 + $0x9ec] sm:$0xf]  ;;  %v5243_v21 = vor.u32 %v6032_v15, %v5240_v16  ;;  %v4940_v16 = vld [vmem:[#allocation3 + $0x484] sm:$0xf0]  ;;  %v6048_v47 = vld [vmem:[#allocation3 + $0x724] sm:$0xf] }
  0x8a   :  { %2615 = vmatpush.bf16.msrb.mxu0 %v4579_v23  ;;  %2570 = vmatmul.bf16.gmra.mxu1 %v6644_v61  ;;  %v4766_v23 = vld [vmem:[#allocation3 + $0x2e8] sm:$0xf]  ;;  %v5663_v25 = vor.u32 %v6137_v17, %v5660_v18  ;;  %v5980_v18 = vld [vmem:[#allocation3 + $0x500] sm:$0xf0]  ;;  %v5308_v48 = vld [vmem:[#allocation3 + $0x75c] sm:$0xf0] }
  0x8b   :  { %2633 = vmatpush.bf16.msrb.mxu1 %v5059_v12  ;;  %2588 = vmatmul.bf16.gmra.mxu2 %v6646_v4  ;;  %v5359_v12 = vor.u32 %v6069_v63, %v5358_v62  ;;  %v5875_v62 = vld [vmem:[#allocation3 + $0x1b8] sm:$0xf0]  ;;  %v5006_v17 = vld [vmem:[#allocation3 + $0x4c8] sm:$0xf] }
  0x8c   :  { %2651 = vmatpush.bf16.msrb.mxu2 %v5539_v27  ;;  %2606 = vmatmul.bf16.gmra.mxu3 %v6648_v5  ;;  %v5246_v27 = vld [vmem:[#allocation3 + $0x6a8] sm:$0xf]  ;;  %v4587_v9 = vor.u32 %v5875_v62, %v4586_v60  ;;  %v5666_v60 = vld [vmem:[#allocation3 + $0x9f0] sm:$0xf] }
  0x8d   :  { %2669 = vmatpush.bf16.msrb.mxu3 %v4583_v29  ;;  %v6122_v29 = vld [vmem:[#allocation3 + $0x974] sm:$0xf]  ;;  %v5247_v33 = vor.u32 %v6040_v28, %v5246_v27  ;;  %v4466_v27 = vld [vmem:[#allocation3 + $0x90] sm:$0xf]  ;;  %v5845_v28 = vld [vmem:[#allocation3 + $0xc8] sm:$0xf0] }
  0x8e   :  { %2616 = vmatpush.bf16.msrb.mxu0 %v4519_v35  ;;  %v4706_v35 = vld [vmem:[#allocation3 + $0x270] sm:$0xf]  ;;  %v4467_v38 = vor.u32 %v5845_v28, %v4466_v27  ;;  %v5546_v28 = vld [vmem:[#allocation3 + $0x900] sm:$0xf] }
  0x8f   :  { %2634 = vmatpush.bf16.msrb.mxu1 %v4999_v24  ;;  %v5920_v24 = vld [vmem:[#allocation3 + $0x320] sm:$0xf0]  ;;  %v4707_v43 = vor.u32 %v5905_v36, %v4706_v35  ;;  %v6175_v35 = vld [vmem:[#allocation3 + $0xb18] sm:$0xf0]  ;;  %v5913_v36 = vld [vmem:[#allocation3 + $0x2ec] sm:$0xf] }
  0x90   :  { %2652 = vmatpush.bf16.msrb.mxu2 %v5479_v39  ;;  %v4767_v31 = vor.u32 %v5920_v24, %v4766_v23  ;;  %v5186_v39 = vld [vmem:[#allocation3 + $0x630] sm:$0xf] }
  0x91   :  { %2670 = vmatpush.bf16.msrb.mxu3 %v4523_v42  ;;  %v5540_v42 = vld [vmem:[#allocation3 + $0x934] sm:$0xf0]  ;;  %v5187_v45 = vor.u32 %v6025_v40, %v5186_v39 }
  0x92   :  { %2617 = vmatpush.bf16.msrb.mxu0 %v4459_v49  ;;  %v5543_v49 = vor.u32 %v6107_v41, %v5540_v42  ;;  %v5726_v41 = vld [vmem:[#allocation3 + $0xa68] sm:$0xf]  ;;  %v4406_v42 = vld [vmem:[#allocation3 + $0x18] sm:$0xf] }
  0x93   :  { %2635 = vmatpush.bf16.msrb.mxu1 %v4939_v37  ;;  %v5603_v37 = vor.u32 %v6122_v29, %v5600_v30  ;;  %v4880_v30 = vld [vmem:[#allocation3 + $0x40c] sm:$0xf0] }
  0x94   :  { %2653 = vmatpush.bf16.msrb.mxu2 %v5419_v53  ;;  %v6092_v53 = vld [vmem:[#allocation3 + $0x884] sm:$0xf]  ;;  %v4883_v39 = vor.u32 %v5942_v26, %v4880_v30  ;;  %v6003_v30 = vld [vmem:[#allocation3 + $0x5bc] sm:$0xf] }
  0x95   :  { %2671 = vmatpush.bf16.msrb.mxu3 %v4463_v58  ;;  %v5972_v58 = vld [vmem:[#allocation3 + $0x4c4] sm:$0xf]  ;;  %v5483_v63 = vor.u32 %v6092_v53, %v5480_v54  ;;  %v5898_v53 = vld [vmem:[#allocation3 + $0x274] sm:$0xf]  ;;  %v4708_v54 = vld [vmem:[#allocation3 + $0x2ac] sm:$0xf0] }
  0x96   :  { %2618 = vmatpush.bf16.msrb.mxu0 %v4399_v7  ;;  %v6077_v7 = vld [vmem:[#allocation3 + $0x80c] sm:$0xf]  ;;  %v5003_v10 = vor.u32 %v5972_v58, %v5000_v0  ;;  %v5727_v58 = vor.u32 %v6160_v50, %v5726_v41  ;;  %v5248_v0 = vld [vmem:[#allocation3 + $0x6e4] sm:$0xf0]  ;;  %v5548_v50 = vld [vmem:[#allocation3 + $0x93c] sm:$0xf0] }
  0x97   :  { %2636 = vmatpush.bf16.msrb.mxu1 %v4879_v52  ;;  %v6010_v52 = vld [vmem:[#allocation3 + $0x5f0] sm:$0xf0]  ;;  %v5423_v15 = vor.u32 %v6077_v7, %v5420_v8  ;;  %v6153_v7 = vld [vmem:[#allocation3 + $0xa6c] sm:$0xf]  ;;  %v5728_v8 = vld [vmem:[#allocation3 + $0xaa4] sm:$0xf0] }
  0x98   :  { %2654 = vmatpush.bf16.msrb.mxu2 %v5359_v12  ;;  %v5957_v12 = vld [vmem:[#allocation3 + $0x44c] sm:$0xf]  ;;  %v5486_v41 = vld [vmem:[#allocation3 + $0x888] sm:$0xf] }
  0x99   :  { %2672 = vmatpush.bf16.msrb.mxu3 %v4403_v14  ;;  %2619 = vmatmul.bf16.vlgmr.msrb.gmra.mxu0 %v6634_v59  ;;  %v5860_v14 = vld [vmem:[#allocation3 + $0x140] sm:$0xf0]  ;;  %v4943_v24 = vor.u32 %v5957_v12, %v4940_v16  ;;  %v5188_v16 = vld [vmem:[#allocation3 + $0x66c] sm:$0xf0] }
  0x9a   :  { %2683 = vmatpush.bf16.msra.mxu0 %v5303_v11  ;;  %2637 = vmatmul.bf16.vlgmr.msrb.gmra.mxu1 %v6636_v1  ;;  %v5067_v11 = vor.u32 %v5995_v6, %v5066_v3  ;;  %v4711_v3 = vor.u32 %v5898_v53, %v4708_v54  ;;  %v6145_v6 = vld [vmem:[#allocation3 + $0xa28] sm:$0xf0] }
  0x9b   :  { %2701 = vmatpush.bf16.msra.mxu1 %v5783_v57  ;;  %2655 = vmatmul.bf16.vlgmr.msrb.gmra.mxu2 %v6638_v2  ;;  %v5127_v57 = vor.u32 %v6010_v52, %v5126_v51  ;;  %v6168_v51 = vld [vmem:[#allocation3 + $0xae4] sm:$0xf]  ;;  %v5788_v52 = vld [vmem:[#allocation3 + $0xb1c] sm:$0xf0]  ;;  %v5667_v12 = vor.u32 %v6145_v6, %v5666_v60  ;;  %v5823_v6 = vld [vmem:[#allocation3 + $0x1c] sm:$0xf] }
  0x9c   :  { %2719 = vmatpush.bf16.msra.mxu2 %v4827_v19  ;;  %2673 = vmatmul.bf16.vlgmr.msrb.gmra.mxu3 %v6634_v59  ;;  %v6062_v19 = vld [vmem:[#allocation3 + $0x794] sm:$0xf]  ;;  %v5791_v62 = vor.u32 %v6168_v51, %v5788_v52 }
  0x9d   :  { %2737 = vmatpush.bf16.msra.mxu3 %v5307_v20  ;;  %v5360_v20 = vld [vmem:[#allocation3 + $0x7cc] sm:$0xf0] }
  0x9e   :  { %2684 = vmatpush.bf16.msra.mxu0 %v5243_v21  ;;  %v5928_v21 = vld [vmem:[#allocation3 + $0x364] sm:$0xf]  ;;  %v5363_v29 = vor.u32 %v6062_v19, %v5360_v20  ;;  %v6138_v19 = vld [vmem:[#allocation3 + $0x9f4] sm:$0xf]  ;;  %v5668_v20 = vld [vmem:[#allocation3 + $0xa2c] sm:$0xf0] }
  0x9f   :  { %2702 = vmatpush.bf16.msra.mxu1 %v5723_v13  ;;  %v4526_v13 = vld [vmem:[#allocation3 + $0x108] sm:$0xf] }
  0xa0   :  { %2720 = vmatpush.bf16.msra.mxu2 %v4767_v31  ;;  %v4527_v23 = vor.u32 %v5860_v14, %v4526_v13  ;;  %v4946_v31 = vld [vmem:[#allocation3 + $0x450] sm:$0xf]  ;;  %v5606_v13 = vld [vmem:[#allocation3 + $0x978] sm:$0xf]  ;;  %v5731_v14 = vor.u32 %v6153_v7, %v5728_v8  ;;  %v5314_v8 = vld [vmem:[#allocation3 + $0x728] sm:$0xf] }
  0xa1   :  { %2738 = vmatpush.bf16.msra.mxu3 %v5247_v33  ;;  %v4831_v33 = vor.u32 %v5928_v21, %v4828_v22  ;;  %v4408_v7 = vld [vmem:[#allocation3 + $0x54] sm:$0xf0] }
  0xa2   :  { %2685 = vmatpush.bf16.msra.mxu0 %v5183_v32  ;;  %v5965_v32 = vld [vmem:[#allocation3 + $0x488] sm:$0xf0] }
  0xa3   :  { %2703 = vmatpush.bf16.msra.mxu1 %v5663_v25  ;;  %v5007_v25 = vor.u32 %v5980_v18, %v5006_v17  ;;  %v4947_v40 = vor.u32 %v5965_v32, %v4946_v31  ;;  %v6130_v18 = vld [vmem:[#allocation3 + $0x9b0] sm:$0xf0]  ;;  %v5128_v31 = vld [vmem:[#allocation3 + $0x5f4] sm:$0xf0]  ;;  %v6115_v32 = vld [vmem:[#allocation3 + $0x938] sm:$0xf0] }
  0xa4   :  { %2721 = vmatpush.bf16.msra.mxu2 %v4707_v43  ;;  %v5830_v43 = vld [vmem:[#allocation3 + $0x50] sm:$0xf0]  ;;  %v5607_v27 = vor.u32 %v6130_v18, %v5606_v13  ;;  %v6093_v13 = vld [vmem:[#allocation3 + $0x88c] sm:$0xf]  ;;  %v5366_v18 = vld [vmem:[#allocation3 + $0x798] sm:$0xf] }
  0xa5   :  { %2739 = vmatpush.bf16.msra.mxu3 %v5187_v45  ;;  %v5787_v45 = vor.u32 %v6175_v35, %v5786_v34  ;;  %v5608_v34 = vld [vmem:[#allocation3 + $0x9b4] sm:$0xf0] }
  0xa6   :  { %2686 = vmatpush.bf16.msra.mxu0 %v5123_v44  ;;  %v4886_v44 = vld [vmem:[#allocation3 + $0x3d8] sm:$0xf] }
  0xa7   :  { %2704 = vmatpush.bf16.msra.mxu1 %v5603_v37  ;;  %v4768_v37 = vld [vmem:[#allocation3 + $0x324] sm:$0xf0] }
  0xa8   :  { %2722 = vmatpush.bf16.msra.mxu2 %v4647_v55  ;;  %v4407_v55 = vor.u32 %v5830_v43, %v4406_v42  ;;  %v5988_v43 = vld [vmem:[#allocation3 + $0x544] sm:$0xf] }
  0xa9   :  { %2740 = vmatpush.bf16.msra.mxu3 %v5127_v57  ;;  %2624 = vmatmul.bf16.gmra.mxu0 %v6644_v61  ;;  %v5311_v57 = vor.u32 %v6048_v47, %v5308_v48  ;;  %v6100_v48 = vld [vmem:[#allocation3 + $0x8c0] sm:$0xf0] }
  0xaa   :  { %2687 = vmatpush.bf16.msra.mxu0 %v5063_v56  ;;  %2642 = vmatmul.bf16.gmra.mxu1 %v6646_v4  ;;  %v4887_v56 = vor.u32 %v5950_v46, %v4886_v44  ;;  %v5068_v44 = vld [vmem:[#allocation3 + $0x57c] sm:$0xf0] }
  0xab   :  { %2705 = vmatpush.bf16.msra.mxu1 %v5543_v49  ;;  %2660 = vmatmul.bf16.gmra.mxu2 %v6648_v5  ;;  %v4771_v49 = vor.u32 %v5913_v36, %v4768_v37  ;;  %v5853_v36 = vld [vmem:[#allocation3 + $0x10c] sm:$0xf]  ;;  %v4528_v37 = vld [vmem:[#allocation3 + $0x144] sm:$0xf0]  ;;  %v5071_v53 = vor.u32 %v5988_v43, %v5068_v44 }
  0xac   :  { %2723 = vmatpush.bf16.msra.mxu2 %v4587_v9  ;;  %2678 = vmatmul.bf16.gmra.mxu3 %v6644_v61  ;;  %v5883_v9 = vld [vmem:[#allocation3 + $0x1fc] sm:$0xf]  ;;  %v4531_v52 = vor.u32 %v5853_v36, %v4528_v37  ;;  %v4774_v36 = vld [vmem:[#allocation3 + $0x2f0] sm:$0xf]  ;;  %v5921_v37 = vld [vmem:[#allocation3 + $0x328] sm:$0xf0] }
  0xad   :  { %2741 = vmatpush.bf16.msra.mxu3 %v5067_v11 }
  0xae   :  { %2688 = vmatpush.bf16.msra.mxu0 %v5003_v10  ;;  %v4648_v10 = vld [vmem:[#allocation3 + $0x234] sm:$0xf0] }
  0xaf   :  { %2706 = vmatpush.bf16.msra.mxu1 %v5483_v63  ;;  %v6033_v63 = vld [vmem:[#allocation3 + $0x6ac] sm:$0xf] }
  0xb0   :  { %2724 = vmatpush.bf16.msra.mxu2 %v4527_v23  ;;  %v5251_v11 = vor.u32 %v6033_v63, %v5248_v0  ;;  %v4651_v23 = vor.u32 %v5883_v9, %v4648_v10  ;;  %v5973_v63 = vld [vmem:[#allocation3 + $0x4cc] sm:$0xf]  ;;  %v5008_v0 = vld [vmem:[#allocation3 + $0x504] sm:$0xf0] }
  0xb1   :  { %2742 = vmatpush.bf16.msra.mxu3 %v5007_v25  ;;  %v4588_v25 = vld [vmem:[#allocation3 + $0x1bc] sm:$0xf0] }
  0xb2   :  { %2689 = vmatpush.bf16.msra.mxu0 %v4943_v24  ;;  %v5868_v24 = vld [vmem:[#allocation3 + $0x184] sm:$0xf] }
  0xb3   :  { %2707 = vmatpush.bf16.msra.mxu1 %v5423_v15  ;;  %v6018_v15 = vld [vmem:[#allocation3 + $0x634] sm:$0xf]  ;;  %v4591_v35 = vor.u32 %v5868_v24, %v4588_v25  ;;  %v4948_v24 = vld [vmem:[#allocation3 + $0x48c] sm:$0xf0] }
  0xb4   :  { %2725 = vmatpush.bf16.msra.mxu2 %v4467_v38  ;;  %v5191_v26 = vor.u32 %v6018_v15, %v5188_v16  ;;  %v5131_v38 = vor.u32 %v6003_v30, %v5128_v31  ;;  %v6078_v30 = vld [vmem:[#allocation3 + $0x814] sm:$0xf]  ;;  %v5428_v31 = vld [vmem:[#allocation3 + $0x84c] sm:$0xf0] }
  0xb5   :  { %2743 = vmatpush.bf16.msra.mxu3 %v4947_v40  ;;  %v5547_v40 = vor.u32 %v6115_v32, %v5546_v28 }
  0xb6   :  { %2690 = vmatpush.bf16.msra.mxu0 %v4883_v39  ;;  %v2404_v17 = vpop.f32.mrf.mxu0 }
  0xb7   :  { %2708 = vmatpush.bf16.msra.mxu1 %v5363_v29  ;;  %v2422_v21 = vpop.f32.mrf.mxu1  ;;  %v5671_v29 = vor.u32 %v6138_v19, %v5668_v20  ;;  %v6070_v19 = vld [vmem:[#allocation3 + $0x7d0] sm:$0xf0]  ;;  %v4834_v20 = vld [vmem:[#allocation3 + $0x368] sm:$0xf] }
  0xb8   :  { %2726 = vmatpush.bf16.msra.mxu2 %v4407_v55  ;;  %v2423_v22 = vadd.f32 %v2422_v21, %v2404_v17  ;;  %v5487_v55 = vor.u32 %v6100_v48, %v5486_v41  ;;  %v5794_v41 = vld [vmem:[#allocation3 + $0xae8] sm:$0xf]  ;;  %v6063_v48 = vld [vmem:[#allocation3 + $0x79c] sm:$0xf] }
  0xb9   :  { %2744 = vmatpush.bf16.msra.mxu3 %v4887_v56  ;;  %2691 = vmatmul.bf16.vlgmr.msra.gmra.mxu0 %v6636_v1  ;;  %v5838_v56 = vld [vmem:[#allocation3 + $0x94] sm:$0xf] }
  0xba   :  { %2755 = vmatpush.bf16.msrb.mxu0 %v5787_v45  ;;  %2709 = vmatmul.bf16.vlgmr.msra.gmra.mxu1 %v6638_v2 }
  0xbb   :  { %2773 = vmatpush.bf16.msrb.mxu1 %v4831_v33  ;;  %v6123_v33 = vld [vmem:[#allocation3 + $0x97c] sm:$0xf]  ;;  %2727 = vmatmul.bf16.vlgmr.msra.gmra.mxu2 %v6634_v59 }
  0xbc   :  { %2791 = vmatpush.bf16.msrb.mxu2 %v5311_v57  ;;  %2745 = vmatmul.bf16.vlgmr.msra.gmra.mxu3 %v6636_v1  ;;  %v5611_v42 = vor.u32 %v6123_v33, %v5608_v34  ;;  %v4468_v57 = vld [vmem:[#allocation3 + $0xcc] sm:$0xf0]  ;;  %v6041_v34 = vld [vmem:[#allocation3 + $0x6e8] sm:$0xf0] }
  0xbd   :  { %2809 = vmatpush.bf16.msrb.mxu3 %v5791_v62  ;;  %v6085_v62 = vld [vmem:[#allocation3 + $0x848] sm:$0xf0]  ;;  %v5254_v33 = vld [vmem:[#allocation3 + $0x6b0] sm:$0xf] }
  0xbe   :  { %2756 = vmatpush.bf16.msrb.mxu0 %v5727_v58  ;;  %v2440_v39 = vpop.f32.mrf.mxu2  ;;  %v2406_v47 = vpop.f32.mrf.mxu0  ;;  %v5426_v58 = vld [vmem:[#allocation3 + $0x810] sm:$0xf]  ;;  %v5255_v44 = vor.u32 %v6041_v34, %v5254_v33  ;;  %v4594_v34 = vld [vmem:[#allocation3 + $0x188] sm:$0xf] }
  0xbf   :  { %2774 = vmatpush.bf16.msrb.mxu1 %v4771_v49  ;;  %v6682_v45 = vadd.f32 %v2440_v39, %v2423_v22  ;;  %v6684_v46 = vpop.f32.mrf.mxu3  ;;  %v6108_v49 = vld [vmem:[#allocation3 + $0x904] sm:$0xf]  ;;  %v2424_v51 = vpop.f32.mrf.mxu1  ;;  %v5427_v10 = vor.u32 %v6085_v62, %v5426_v58  ;;  %v4888_v39 = vld [vmem:[#allocation3 + $0x414] sm:$0xf0] }
  0xc0   :  { %2792 = vmatpush.bf16.msrb.mxu2 %v5251_v11  ;;  %v2425_v54 = vadd.f32 %v2424_v51, %v2406_v47  ;;  %v5551_v60 = vor.u32 %v6108_v49, %v5548_v50  ;;  %v6056_v11 = vld [vmem:[#allocation3 + $0x760] sm:$0xf0]  ;;  %v5194_v47 = vld [vmem:[#allocation3 + $0x638] sm:$0xf] }
  0xc1   :  { %2810 = vmatpush.bf16.msrb.mxu3 %v5731_v14  ;;  %7590 = vst [vmem:[#allocation14_spill] sm:$0xff] %v6682_v45  ;;  %v5488_v14 = vld [vmem:[#allocation3 + $0x8c4] sm:$0xf0]  ;;  %v5936_v22 = vld [vmem:[#allocation3 + $0x3a0] sm:$0xf0]  ;;  %v5315_v28 = vor.u32 %v6056_v11, %v5314_v8 }
  0xc2   :  { %2757 = vmatpush.bf16.msrb.mxu0 %v5667_v12  ;;  %v5011_v12 = vor.u32 %v5973_v63, %v5008_v0  ;;  %v4835_v32 = vor.u32 %v5936_v22, %v4834_v20  ;;  %v5368_v49 = vld [vmem:[#allocation3 + $0x7d4] sm:$0xf0]  ;;  %v5906_v63 = vld [vmem:[#allocation3 + $0x2b0] sm:$0xf0]  ;;  %v5134_v8 = vld [vmem:[#allocation3 + $0x5c0] sm:$0xf] }
  0xc3   :  { %2775 = vmatpush.bf16.msrb.mxu1 %v4711_v3  ;;  %v4471_v3 = vor.u32 %v5838_v56, %v4468_v57  ;;  %v5929_v56 = vld [vmem:[#allocation3 + $0x36c] sm:$0xf]  ;;  %v4836_v57 = vld [vmem:[#allocation3 + $0x3a4] sm:$0xf0]  ;;  %v4714_v62 = vld [vmem:[#allocation3 + $0x278] sm:$0xf]  ;;  %v5371_v0 = vor.u32 %v6063_v48, %v5368_v49 }
  0xc4   :  { %2793 = vmatpush.bf16.msrb.mxu2 %v5191_v26  ;;  %v4411_v26 = vor.u32 %v5823_v6, %v4408_v7  ;;  %v6161_v6 = vld [vmem:[#allocation3 + $0xaa8] sm:$0xf0]  ;;  %v6011_v11 = vld [vmem:[#allocation3 + $0x5f8] sm:$0xf0]  ;;  %v5674_v22 = vld [vmem:[#allocation3 + $0x9f8] sm:$0xf] }
  0xc5   :  { %2811 = vmatpush.bf16.msrb.mxu3 %v5671_v29  ;;  %v5367_v29 = vor.u32 %v6070_v19, %v5366_v18  ;;  %v5891_v18 = vld [vmem:[#allocation3 + $0x238] sm:$0xf0]  ;;  %v5135_v20 = vor.u32 %v6011_v11, %v5134_v8  ;;  %v4534_v48 = vld [vmem:[#allocation3 + $0x110] sm:$0xf]  ;;  %v5861_v49 = vld [vmem:[#allocation3 + $0x148] sm:$0xf0] }
  0xc6   :  { %2758 = vmatpush.bf16.msrb.mxu0 %v5607_v27  ;;  %v2442_v9 = vpop.f32.mrf.mxu2  ;;  %v2409_v17 = vpop.f32.mrf.mxu0  ;;  %v5491_v27 = vor.u32 %v6093_v13, %v5488_v14  ;;  %v4776_v13 = vld [vmem:[#allocation3 + $0x32c] sm:$0xf0]  ;;  %v4535_v8 = vor.u32 %v5861_v49, %v4534_v48  ;;  %v5846_v11 = vld [vmem:[#allocation3 + $0xd0] sm:$0xf0] }
  0xc7   :  { %2776 = vmatpush.bf16.msrb.mxu1 %v4651_v23  ;;  %v6686_v15 = vadd.f32 %v2442_v9, %v2425_v54  ;;  %v6688_v16 = vpop.f32.mrf.mxu3  ;;  %v2427_v21 = vpop.f32.mrf.mxu1  ;;  %v5958_v23 = vld [vmem:[#allocation3 + $0x454] sm:$0xf]  ;;  %v4839_v9 = vor.u32 %v5929_v56, %v4836_v57  ;;  %v6116_v56 = vld [vmem:[#allocation3 + $0x940] sm:$0xf0] }
  0xc8   :  { %2794 = vmatpush.bf16.msrb.mxu2 %v5131_v38  ;;  %v2428_v25 = vadd.f32 %v2427_v21, %v2409_v17  ;;  %v5943_v38 = vld [vmem:[#allocation3 + $0x3dc] sm:$0xf]  ;;  %v6026_v54 = vld [vmem:[#allocation3 + $0x670] sm:$0xf0]  ;;  %v4654_v17 = vld [vmem:[#allocation3 + $0x200] sm:$0xf] }
  0xc9   :  { %2812 = vmatpush.bf16.msrb.mxu3 %v5611_v42  ;;  %7591 = vst [vmem:[#allocation15_spill] sm:$0xff] %v6686_v15  ;;  %2696 = vmatmul.bf16.gmra.mxu0 %v6646_v4  ;;  %v6176_v42 = vld [vmem:[#allocation3 + $0xb20] sm:$0xf0]  ;;  %v5195_v7 = vor.u32 %v6026_v54, %v5194_v47  ;;  %v5074_v21 = vld [vmem:[#allocation3 + $0x548] sm:$0xf] }
  0xca   :  { %2759 = vmatpush.bf16.msrb.mxu0 %v5547_v40  ;;  %2714 = vmatmul.bf16.gmra.mxu1 %v6648_v5  ;;  %v5431_v40 = vor.u32 %v6078_v30, %v5428_v31  ;;  %v4954_v54 = vld [vmem:[#allocation3 + $0x458] sm:$0xf] }
  0xcb   :  { %2777 = vmatpush.bf16.msrb.mxu1 %v4591_v35  ;;  %v4951_v35 = vor.u32 %v5958_v23, %v4948_v24  ;;  %2732 = vmatmul.bf16.gmra.mxu2 %v6644_v61  ;;  %v6146_v23 = vld [vmem:[#allocation3 + $0xa30] sm:$0xf0] }
  0xcc   :  { %2795 = vmatpush.bf16.msrb.mxu2 %v5071_v53  ;;  %2750 = vmatmul.bf16.gmra.mxu3 %v6646_v4  ;;  %v4775_v53 = vor.u32 %v5921_v37, %v4774_v36  ;;  %v5675_v33 = vor.u32 %v6146_v23, %v5674_v22  ;;  %v4536_v22 = vld [vmem:[#allocation3 + $0x14c] sm:$0xf0]  ;;  %v5796_v23 = vld [vmem:[#allocation3 + $0xb24] sm:$0xf0] }
  0xcd   :  { %2813 = vmatpush.bf16.msrb.mxu3 %v5551_v60  ;;  %v5795_v60 = vor.u32 %v6176_v42, %v5794_v41  ;;  %v5884_v42 = vld [vmem:[#allocation3 + $0x204] sm:$0xf] }
  0xce   :  { %2760 = vmatpush.bf16.msrb.mxu0 %v5487_v55  ;;  %v2445_v43 = vpop.f32.mrf.mxu2  ;;  %v4891_v55 = vor.u32 %v5943_v38, %v4888_v39  ;;  %v5014_v38 = vld [vmem:[#allocation3 + $0x4d0] sm:$0xf]  ;;  %v5614_v39 = vld [vmem:[#allocation3 + $0x980] sm:$0xf] }
  0xcf   :  { %2778 = vmatpush.bf16.msrb.mxu1 %v4531_v52  ;;  %v6694_v50 = vadd.f32 %v2445_v43, %v2428_v25  ;;  %v6696_v51 = vpop.f32.mrf.mxu3  ;;  %v2411_v52 = vpop.f32.mrf.mxu0  ;;  %v4656_v43 = vld [vmem:[#allocation3 + $0x23c] sm:$0xf0] }
  0xd0   :  { %2796 = vmatpush.bf16.msrb.mxu2 %v5011_v12  ;;  %v2429_v58 = vpop.f32.mrf.mxu1  ;;  %v5914_v12 = vld [vmem:[#allocation3 + $0x2f4] sm:$0xf]  ;;  %v4659_v57 = vor.u32 %v5884_v42, %v4656_v43  ;;  %v5736_v42 = vld [vmem:[#allocation3 + $0xaac] sm:$0xf0]  ;;  %v5839_v43 = vld [vmem:[#allocation3 + $0x9c] sm:$0xf] }
  0xd1   :  { %2814 = vmatpush.bf16.msrb.mxu3 %v5491_v27  ;;  %7592 = vst [vmem:[#allocation16_spill] sm:$0xff] %v6694_v50  ;;  %v4779_v24 = vor.u32 %v5914_v12, %v4776_v13  ;;  %v5996_v27 = vld [vmem:[#allocation3 + $0x580] sm:$0xf0] }
  0xd2   :  { %2761 = vmatpush.bf16.msrb.mxu0 %v5427_v10  ;;  %v4715_v10 = vor.u32 %v5906_v63, %v4714_v62  ;;  %v5075_v37 = vor.u32 %v5996_v27, %v5074_v21  ;;  %v5966_v62 = vld [vmem:[#allocation3 + $0x490] sm:$0xf0]  ;;  %v5869_v63 = vld [vmem:[#allocation3 + $0x18c] sm:$0xf] }
  0xd3   :  { %2779 = vmatpush.bf16.msrb.mxu1 %v4471_v3  ;;  %v5734_v3 = vld [vmem:[#allocation3 + $0xa70] sm:$0xf]  ;;  %v4955_v13 = vor.u32 %v5966_v62, %v4954_v54  ;;  %v5854_v21 = vld [vmem:[#allocation3 + $0x114] sm:$0xf] }
  0xd4   :  { %2797 = vmatpush.bf16.msrb.mxu2 %v4951_v35  ;;  %v5735_v14 = vor.u32 %v6161_v6, %v5734_v3  ;;  %v5876_v35 = vld [vmem:[#allocation3 + $0x1c0] sm:$0xf0]  ;;  %v5256_v54 = vld [vmem:[#allocation3 + $0x6ec] sm:$0xf0] }
  0xd5   :  { %2815 = vmatpush.bf16.msrb.mxu3 %v5431_v40  ;;  %v6131_v40 = vld [vmem:[#allocation3 + $0x9b8] sm:$0xf0]  ;;  %v4842_v62 = vld [vmem:[#allocation3 + $0x370] sm:$0xf] }
  0xd6   :  { %2762 = vmatpush.bf16.msrb.mxu0 %v5367_v29  ;;  %v2447_v19 = vpop.f32.mrf.mxu2  ;;  %v4716_v29 = vld [vmem:[#allocation3 + $0x2b4] sm:$0xf0]  ;;  %v5615_v47 = vor.u32 %v6131_v40, %v5614_v39  ;;  %v6086_v39 = vld [vmem:[#allocation3 + $0x850] sm:$0xf0] }
  0xd7   :  { %2780 = vmatpush.bf16.msrb.mxu1 %v4411_v26  ;;  %v2465_v25 = vpop.f32.mrf.mxu3  ;;  %v2476_v26 = vpop.f32.mrf.mxu0 }
  0xd8   :  { %2798 = vmatpush.bf16.msrb.mxu2 %v4891_v55  ;;  %v2477_v30 = vadd.f32 %v2476_v26, %v6684_v46  ;;  %v2494_v31 = vpop.f32.mrf.mxu1  ;;  %v5981_v46 = vld [vmem:[#allocation3 + $0x508] sm:$0xf0]  ;;  %v5554_v55 = vld [vmem:[#allocation3 + $0x908] sm:$0xf]  ;;  %v4414_v26 = vld [vmem:[#allocation3 + $0x20] sm:$0xf] }
  0xd9   :  { %2816 = vmatpush.bf16.msrb.mxu3 %v5371_v0  ;;  %2763 = vmatmul.bf16.vlgmr.msrb.gmra.mxu0 %v6638_v2  ;;  %v4596_v0 = vld [vmem:[#allocation3 + $0x1c4] sm:$0xf0] }
  0xda   :  { %2827 = vmatpush.bf16.msra.mxu0 %v4835_v32  ;;  %v4655_v32 = vor.u32 %v5891_v18, %v4654_v17  ;;  %v6699_v36 = vadd.f32 %v2494_v31, %v2477_v30  ;;  %2781 = vmatmul.bf16.vlgmr.msrb.gmra.mxu1 %v6634_v59  ;;  %v5494_v17 = vld [vmem:[#allocation3 + $0x890] sm:$0xf]  ;;  %v6101_v18 = vld [vmem:[#allocation3 + $0x8c8] sm:$0xf0]  ;;  %v4599_v19 = vor.u32 %v5869_v63, %v4596_v0  ;;  %v5316_v31 = vld [vmem:[#allocation3 + $0x764] sm:$0xf0] }
  0xdb   :  { %2845 = vmatpush.bf16.msra.mxu1 %v5315_v28  ;;  %v5899_v28 = vld [vmem:[#allocation3 + $0x27c] sm:$0xf]  ;;  %2799 = vmatmul.bf16.vlgmr.msrb.gmra.mxu2 %v6636_v1  ;;  %v5495_v25 = vor.u32 %v6101_v18, %v5494_v17  ;;  %v6049_v30 = vld [vmem:[#allocation3 + $0x72c] sm:$0xf]  ;;  %v5824_v0 = vld [vmem:[#allocation3 + $0x24] sm:$0xf] }
  0xdc   :  { %2863 = vmatpush.bf16.msra.mxu2 %v5795_v60  ;;  %7593 = vst [vmem:[#allocation17_spill] sm:$0xff] %v6699_v36  ;;  %v4719_v41 = vor.u32 %v5899_v28, %v4716_v29  ;;  %2817 = vmatmul.bf16.vlgmr.msrb.gmra.mxu3 %v6638_v2  ;;  %v5831_v29 = vld [vmem:[#allocation3 + $0x58] sm:$0xf0]  ;;  %v5319_v49 = vor.u32 %v6049_v30, %v5316_v31  ;;  %v5937_v63 = vld [vmem:[#allocation3 + $0x3a8] sm:$0xf0] }
  0xdd   :  { %2881 = vmatpush.bf16.msra.mxu3 %v4839_v9  ;;  %v5555_v9 = vor.u32 %v6116_v56, %v5554_v55  ;;  %v5374_v56 = vld [vmem:[#allocation3 + $0x7a0] sm:$0xf]  ;;  %v4843_v18 = vor.u32 %v5937_v63, %v4842_v62  ;;  %v6042_v30 = vld [vmem:[#allocation3 + $0x6f0] sm:$0xf0]  ;;  %v4662_v62 = vld [vmem:[#allocation3 + $0x208] sm:$0xf] }
  0xde   :  { %2828 = vmatpush.bf16.msra.mxu0 %v4775_v53  ;;  %v2512_v52 = vpop.f32.mrf.mxu2  ;;  %v5015_v53 = vor.u32 %v5981_v46, %v5014_v38  ;;  %v5434_v38 = vld [vmem:[#allocation3 + $0x818] sm:$0xf]  ;;  %v5892_v63 = vld [vmem:[#allocation3 + $0x240] sm:$0xf0] }
  0xdf   :  { %2846 = vmatpush.bf16.msra.mxu1 %v5255_v44  ;;  %v4595_v44 = vor.u32 %v5876_v35, %v4594_v34  ;;  %v2530_v58 = vpop.f32.mrf.mxu3  ;;  %v2478_v60 = vpop.f32.mrf.mxu0 }
  0xe0   :  { %2864 = vmatpush.bf16.msra.mxu2 %v5735_v14  ;;  %v6705_v3 = vadd.f32 %v2530_v58, %v2512_v52  ;;  %v2479_v6 = vadd.f32 %v2478_v60, %v6688_v16  ;;  %v4894_v14 = vld [vmem:[#allocation3 + $0x3e0] sm:$0xf]  ;;  %v6169_v16 = vld [vmem:[#allocation3 + $0xaec] sm:$0xf]  ;;  %v5435_v52 = vor.u32 %v6086_v39, %v5434_v38  ;;  %v5676_v60 = vld [vmem:[#allocation3 + $0xa34] sm:$0xf0] }
  0xe1   :  { %2882 = vmatpush.bf16.msra.mxu3 %v4779_v24  ;;  %v5799_v35 = vor.u32 %v6169_v16, %v5796_v23  ;;  %v5616_v23 = vld [vmem:[#allocation3 + $0x9bc] sm:$0xf0] }
  0xe2   :  { %2829 = vmatpush.bf16.msra.mxu0 %v4715_v10  ;;  %v4474_v10 = vld [vmem:[#allocation3 + $0x98] sm:$0xf] }
  0xe3   :  { %2847 = vmatpush.bf16.msra.mxu1 %v5195_v7  ;;  %v2496_v7 = vpop.f32.mrf.mxu1  ;;  %v4475_v24 = vor.u32 %v5846_v11, %v4474_v10  ;;  %v5322_v10 = vld [vmem:[#allocation3 + $0x730] sm:$0xf]  ;;  %v6057_v11 = vld [vmem:[#allocation3 + $0x768] sm:$0xf0] }
  0xe4   :  { %2865 = vmatpush.bf16.msra.mxu2 %v5675_v33  ;;  %v6708_v12 = vadd.f32 %v2496_v7, %v2479_v6  ;;  %v4416_v6 = vld [vmem:[#allocation3 + $0x5c] sm:$0xf0] }
  0xe5   :  { %2883 = vmatpush.bf16.msra.mxu3 %v4719_v41 }
  0xe6   :  { %2830 = vmatpush.bf16.msra.mxu0 %v4655_v32  ;;  %7594 = vst [vmem:[#allocation18_spill] sm:$0xff] %v6708_v12  ;;  %v2514_v27 = vpop.f32.mrf.mxu2  ;;  %v4539_v32 = vor.u32 %v5854_v21, %v4536_v22  ;;  %v6124_v21 = vld [vmem:[#allocation3 + $0x984] sm:$0xf] }
  0xe7   :  { %2848 = vmatpush.bf16.msra.mxu1 %v5135_v20  ;;  %v5951_v20 = vld [vmem:[#allocation3 + $0x418] sm:$0xf0]  ;;  %v2532_v33 = vpop.f32.mrf.mxu3  ;;  %v2481_v34 = vpop.f32.mrf.mxu0  ;;  %v5619_v31 = vor.u32 %v6124_v21, %v5616_v23 }
  0xe8   :  { %2866 = vmatpush.bf16.msra.mxu2 %v5615_v47  ;;  %v4895_v28 = vor.u32 %v5951_v20, %v4894_v14  ;;  %v6710_v40 = vadd.f32 %v2532_v33, %v2514_v27  ;;  %v2482_v41 = vadd.f32 %v2481_v34, %v6696_v51  ;;  %v4415_v47 = vor.u32 %v5831_v29, %v4414_v26  ;;  %v6139_v51 = vld [vmem:[#allocation3 + $0x9fc] sm:$0xf]  ;;  %v5196_v20 = vld [vmem:[#allocation3 + $0x674] sm:$0xf0]  ;;  %v6004_v33 = vld [vmem:[#allocation3 + $0x5c4] sm:$0xf] }
  0xe9   :  { %2884 = vmatpush.bf16.msra.mxu3 %v4659_v57  ;;  %2768 = vmatmul.bf16.gmra.mxu0 %v6648_v5  ;;  %v6071_v57 = vld [vmem:[#allocation3 + $0x7d8] sm:$0xf0]  ;;  %v5679_v17 = vor.u32 %v6139_v51, %v5676_v60  ;;  %v4419_v26 = vor.u32 %v5824_v0, %v4416_v6  ;;  %v5323_v27 = vor.u32 %v6057_v11, %v5322_v10  ;;  %v5262_v29 = vld [vmem:[#allocation3 + $0x6b8] sm:$0xf]  ;;  %v5136_v34 = vld [vmem:[#allocation3 + $0x5fc] sm:$0xf0] }
  0xea   :  { %2831 = vmatpush.bf16.msra.mxu0 %v4595_v44  ;;  %v4476_v44 = vld [vmem:[#allocation3 + $0xd4] sm:$0xf0]  ;;  %2786 = vmatmul.bf16.gmra.mxu1 %v6644_v61  ;;  %v5263_v38 = vor.u32 %v6042_v30, %v5262_v29  ;;  %v5974_v0 = vld [vmem:[#allocation3 + $0x4d4] sm:$0xf]  ;;  %v6012_v10 = vld [vmem:[#allocation3 + $0x600] sm:$0xf0] }
  0xeb   :  { %2849 = vmatpush.bf16.msra.mxu1 %v5075_v37  ;;  %v6154_v37 = vld [vmem:[#allocation3 + $0xa74] sm:$0xf]  ;;  %v2499_v46 = vpop.f32.mrf.mxu1  ;;  %v4479_v58 = vor.u32 %v5839_v43, %v4476_v44  ;;  %2804 = vmatmul.bf16.gmra.mxu2 %v6646_v4  ;;  %v5989_v43 = vld [vmem:[#allocation3 + $0x54c] sm:$0xf]  ;;  %v5436_v11 = vld [vmem:[#allocation3 + $0x854] sm:$0xf0] }
  0xec   :  { %2867 = vmatpush.bf16.msra.mxu2 %v5555_v9  ;;  %v6713_v48 = vadd.f32 %v2499_v46, %v2482_v41  ;;  %v5739_v55 = vor.u32 %v6154_v37, %v5736_v42  ;;  %2822 = vmatmul.bf16.gmra.mxu3 %v6648_v5  ;;  %v5375_v9 = vor.u32 %v6071_v57, %v5374_v56  ;;  %v5556_v37 = vld [vmem:[#allocation3 + $0x944] sm:$0xf0]  ;;  %v4722_v46 = vld [vmem:[#allocation3 + $0x280] sm:$0xf]  ;;  %v5907_v42 = vld [vmem:[#allocation3 + $0x2b8] sm:$0xf0] }
  0xed   :  { %2885 = vmatpush.bf16.msra.mxu3 %v4599_v19  ;;  %v6019_v19 = vld [vmem:[#allocation3 + $0x63c] sm:$0xf]  ;;  %v5139_v41 = vor.u32 %v6004_v33, %v5136_v34  ;;  %v6094_v56 = vld [vmem:[#allocation3 + $0x894] sm:$0xf]  ;;  %v5496_v57 = vld [vmem:[#allocation3 + $0x8cc] sm:$0xf0] }
  0xee   :  { %2832 = vmatpush.bf16.msra.mxu0 %v4535_v8  ;;  %v2517_v7 = vpop.f32.mrf.mxu2 }
  0xef   :  { %2850 = vmatpush.bf16.msra.mxu1 %v5015_v53  ;;  %v6034_v53 = vld [vmem:[#allocation3 + $0x6b4] sm:$0xf]  ;;  %v2483_v14 = vpop.f32.mrf.mxu0 }
  0xf0   :  { %2868 = vmatpush.bf16.msra.mxu2 %v5495_v25  ;;  %v5259_v8 = vor.u32 %v6034_v53, %v5256_v54  ;;  %v5922_v25 = vld [vmem:[#allocation3 + $0x330] sm:$0xf0]  ;;  %v5202_v53 = vld [vmem:[#allocation3 + $0x640] sm:$0xf]  ;;  %v6027_v54 = vld [vmem:[#allocation3 + $0x678] sm:$0xf0] }
  0xf1   :  { %2886 = vmatpush.bf16.msra.mxu3 %v4539_v32  ;;  %v5203_v6 = vor.u32 %v6027_v54, %v5202_v53  ;;  %v6177_v53 = vld [vmem:[#allocation3 + $0xb28] sm:$0xf0] }
  0xf2   :  { %2833 = vmatpush.bf16.msra.mxu0 %v4475_v24  ;;  %v4782_v24 = vld [vmem:[#allocation3 + $0x2f8] sm:$0xf] }
  0xf3   :  { %2851 = vmatpush.bf16.msra.mxu1 %v4955_v13  ;;  %v2535_v13 = vpop.f32.mrf.mxu3  ;;  %v2501_v16 = vpop.f32.mrf.mxu1  ;;  %v4783_v32 = vor.u32 %v5922_v25, %v4782_v24 }
  0xf4   :  { %2869 = vmatpush.bf16.msra.mxu2 %v5435_v52  ;;  %v6719_v22 = vadd.f32 %v2535_v13, %v2517_v7  ;;  %v5076_v52 = vld [vmem:[#allocation3 + $0x584] sm:$0xf0]  ;;  %v5499_v7 = vor.u32 %v6094_v56, %v5496_v57  ;;  %v4663_v13 = vor.u32 %v5892_v63, %v4662_v62  ;;  %v4784_v56 = vld [vmem:[#allocation3 + $0x334] sm:$0xf0] }
  0xf5   :  { %2887 = vmatpush.bf16.msra.mxu3 %v4479_v58  ;;  %v4723_v58 = vor.u32 %v5907_v42, %v4722_v46  ;;  %v5079_v60 = vor.u32 %v5989_v43, %v5076_v52  ;;  %v5944_v46 = vld [vmem:[#allocation3 + $0x3e4] sm:$0xf]  ;;  %v5802_v52 = vld [vmem:[#allocation3 + $0xaf0] sm:$0xf] }
  0xf6   :  { %2834 = vmatpush.bf16.msra.mxu0 %v4415_v47  ;;  %v2519_v39 = vpop.f32.mrf.mxu2 }
  0xf7   :  { %2852 = vmatpush.bf16.msra.mxu1 %v4895_v28  ;;  %v5199_v28 = vor.u32 %v6019_v19, %v5196_v20  ;;  %v2548_v47 = vpop.f32.mrf.mxu0  ;;  %v5877_v19 = vld [vmem:[#allocation3 + $0x1c8] sm:$0xf0]  ;;  %v5959_v20 = vld [vmem:[#allocation3 + $0x45c] sm:$0xf]  ;;  %v4542_v39 = vld [vmem:[#allocation3 + $0x118] sm:$0xf] }
  0xf8   :  { %2870 = vmatpush.bf16.msra.mxu2 %v5375_v9  ;;  %v5142_v9 = vld [vmem:[#allocation3 + $0x5c8] sm:$0xf] }
  0xf9   :  { %2888 = vmatpush.bf16.msra.mxu3 %v4419_v26  ;;  %2835 = vmatmul.bf16.vlgmr.msra.gmra.mxu0 %v6634_v59  ;;  %v5143_v21 = vor.u32 %v6012_v10, %v5142_v9  ;;  %v4956_v26 = vld [vmem:[#allocation3 + $0x494] sm:$0xf0] }
  0xfa   :  { %2899 = vmatpush.bf16.msrb.mxu0 %v5319_v49  ;;  %2853 = vmatmul.bf16.vlgmr.msra.gmra.mxu1 %v6636_v1  ;;  %v5742_v9 = vld [vmem:[#allocation3 + $0xa78] sm:$0xf] }
  0xfb   :  { %2917 = vmatpush.bf16.msrb.mxu1 %v5799_v35  ;;  %v6109_v35 = vld [vmem:[#allocation3 + $0x90c] sm:$0xf]  ;;  %v2537_v44 = vpop.f32.mrf.mxu3  ;;  %v2566_v51 = vpop.f32.mrf.mxu1  ;;  %2871 = vmatmul.bf16.vlgmr.msra.gmra.mxu2 %v6638_v2 }
  0xfc   :  { %2935 = vmatpush.bf16.msrb.mxu2 %v4843_v18  ;;  %v5559_v49 = vor.u32 %v6109_v35, %v5556_v37  ;;  %2889 = vmatmul.bf16.vlgmr.msra.gmra.mxu3 %v6634_v59  ;;  %v4602_v18 = vld [vmem:[#allocation3 + $0x190] sm:$0xf]  ;;  %v5930_v35 = vld [vmem:[#allocation3 + $0x374] sm:$0xf]  ;;  %v5022_v44 = vld [vmem:[#allocation3 + $0x4d8] sm:$0xf] }
  0xfd   :  { %2953 = vmatpush.bf16.msrb.mxu3 %v5323_v27  ;;  %v5082_v27 = vld [vmem:[#allocation3 + $0x550] sm:$0xf]  ;;  %v4603_v34 = vor.u32 %v5877_v19, %v4602_v18  ;;  %v5900_v19 = vld [vmem:[#allocation3 + $0x284] sm:$0xf] }
  0xfe   :  { %2900 = vmatpush.bf16.msrb.mxu0 %v5259_v8  ;;  %v5016_v8 = vld [vmem:[#allocation3 + $0x50c] sm:$0xf0]  ;;  %v2584_v14 = vpop.f32.mrf.mxu2 }
  0xff   :  { %2918 = vmatpush.bf16.msrb.mxu1 %v5739_v55  ;;  %v6722_v55 = vadd.f32 %v2548_v47, %v6705_v3  ;;  %v6079_v3 = vld [vmem:[#allocation3 + $0x81c] sm:$0xf]  ;;  %v2585_v16 = vadd.f32 %v2584_v14, %v2566_v51  ;;  %v2550_v24 = vpop.f32.mrf.mxu0  ;;  %v4844_v37 = vld [vmem:[#allocation3 + $0x3ac] sm:$0xf0]  ;;  %v5982_v47 = vld [vmem:[#allocation3 + $0x510] sm:$0xf0] }
 0x100   :  { %2936 = vmatpush.bf16.msrb.mxu2 %v4783_v32  ;;  %v5439_v25 = vor.u32 %v6079_v3, %v5436_v11  ;;  %v6729_v29 = vadd.f32 %v2550_v24, %v6710_v40  ;;  %v5376_v32 = vld [vmem:[#allocation3 + $0x7dc] sm:$0xf0]  ;;  %v5915_v51 = vld [vmem:[#allocation3 + $0x2fc] sm:$0xf]  ;;  %v5832_v24 = vld [vmem:[#allocation3 + $0x60] sm:$0xf0] }
 0x101   :  { %7595 = vst [vmem:[#allocation19_spill] sm:$0xff] %v6722_v55  ;;  %2954 = vmatpush.bf16.msrb.mxu3 %v5263_v38  ;;  %v4959_v38 = vor.u32 %v5959_v20, %v4956_v26  ;;  %v4896_v40 = vld [vmem:[#allocation3 + $0x41c] sm:$0xf0]  ;;  %v4787_v11 = vor.u32 %v5915_v51, %v4784_v56  ;;  %v6132_v51 = vld [vmem:[#allocation3 + $0x9c0] sm:$0xf0] }
 0x102   :  { %2901 = vmatpush.bf16.msrb.mxu0 %v5199_v28  ;;  %v5997_v28 = vld [vmem:[#allocation3 + $0x588] sm:$0xf0]  ;;  %7596 = vst [vmem:[#allocation20_spill] sm:$0xff] %v6729_v29  ;;  %v4962_v14 = vld [vmem:[#allocation3 + $0x460] sm:$0xf] }
 0x103   :  { %2919 = vmatpush.bf16.msrb.mxu1 %v5679_v17  ;;  %v5019_v17 = vor.u32 %v5974_v0, %v5016_v8  ;;  %v2602_v23 = vpop.f32.mrf.mxu3  ;;  %v2568_v30 = vpop.f32.mrf.mxu1  ;;  %v5083_v42 = vor.u32 %v5997_v28, %v5082_v27  ;;  %v5847_v8 = vld [vmem:[#allocation3 + $0xd8] sm:$0xf0]  ;;  %v4724_v20 = vld [vmem:[#allocation3 + $0x2bc] sm:$0xf0] }
 0x104   :  { %2937 = vmatpush.bf16.msrb.mxu2 %v4723_v58  ;;  %v6731_v33 = vadd.f32 %v2602_v23, %v2585_v16  ;;  %v4899_v58 = vor.u32 %v5944_v46, %v4896_v40  ;;  %v4422_v16 = vld [vmem:[#allocation3 + $0x28] sm:$0xf]  ;;  %v4727_v27 = vor.u32 %v5900_v19, %v4724_v20  ;;  %v5682_v28 = vld [vmem:[#allocation3 + $0xa00] sm:$0xf] }
 0x105   :  { %2955 = vmatpush.bf16.msrb.mxu3 %v5203_v6  ;;  %v5803_v6 = vor.u32 %v6177_v53, %v5802_v52  ;;  %v5264_v53 = vld [vmem:[#allocation3 + $0x6f4] sm:$0xf0] }
 0x106   :  { %2902 = vmatpush.bf16.msrb.mxu0 %v5139_v41  ;;  %7597 = vst [vmem:[#allocation21_spill] sm:$0xff] %v6731_v33  ;;  %v5862_v41 = vld [vmem:[#allocation3 + $0x150] sm:$0xf0]  ;;  %v2586_v57 = vpop.f32.mrf.mxu2 }
 0x107   :  { %2920 = vmatpush.bf16.msrb.mxu1 %v5619_v31  ;;  %v6064_v31 = vld [vmem:[#allocation3 + $0x7a4] sm:$0xf]  ;;  %v4543_v54 = vor.u32 %v5862_v41, %v4542_v39  ;;  %v2587_v62 = vadd.f32 %v2586_v57, %v2568_v30  ;;  %v2553_v0 = vpop.f32.mrf.mxu0  ;;  %v6147_v30 = vld [vmem:[#allocation3 + $0xa38] sm:$0xf0]  ;;  %v6170_v39 = vld [vmem:[#allocation3 + $0xaf4] sm:$0xf] }
 0x108   :  { %2938 = vmatpush.bf16.msrb.mxu2 %v4663_v13  ;;  %v5379_v43 = vor.u32 %v6064_v31, %v5376_v32  ;;  %v6734_v10 = vadd.f32 %v2553_v0, %v6719_v22  ;;  %v6162_v13 = vld [vmem:[#allocation3 + $0xab0] sm:$0xf0]  ;;  %v5324_v22 = vld [vmem:[#allocation3 + $0x76c] sm:$0xf0]  ;;  %v5885_v31 = vld [vmem:[#allocation3 + $0x20c] sm:$0xf] }
 0x109   :  { %2956 = vmatpush.bf16.msrb.mxu3 %v5143_v21  ;;  %v5743_v23 = vor.u32 %v6162_v13, %v5742_v9  ;;  %2840 = vmatmul.bf16.gmra.mxu0 %v6644_v61  ;;  %v4664_v32 = vld [vmem:[#allocation3 + $0x244] sm:$0xf0]  ;;  %v5804_v41 = vld [vmem:[#allocation3 + $0xb2c] sm:$0xf0]  ;;  %v5744_v0 = vld [vmem:[#allocation3 + $0xab4] sm:$0xf0] }
 0x10a   :  { %2903 = vmatpush.bf16.msrb.mxu0 %v5079_v60  ;;  %v5023_v60 = vor.u32 %v5982_v47, %v5022_v44  ;;  %7598 = vst [vmem:[#allocation22_spill] sm:$0xff] %v6734_v10  ;;  %2858 = vmatmul.bf16.gmra.mxu1 %v6646_v4  ;;  %v5683_v44 = vor.u32 %v6147_v30, %v5682_v28  ;;  %v6035_v47 = vld [vmem:[#allocation3 + $0x6bc] sm:$0xf]  ;;  %v6117_v13 = vld [vmem:[#allocation3 + $0x948] sm:$0xf0] }
 0x10b   :  { %2921 = vmatpush.bf16.msrb.mxu1 %v5559_v49  ;;  %v4847_v49 = vor.u32 %v5930_v35, %v4844_v37  ;;  %v2604_v63 = vpop.f32.mrf.mxu3  ;;  %v2571_v3 = vpop.f32.mrf.mxu1  ;;  %2876 = vmatmul.bf16.gmra.mxu2 %v6648_v5  ;;  %v5952_v35 = vld [vmem:[#allocation3 + $0x420] sm:$0xf0]  ;;  %v4667_v52 = vor.u32 %v5885_v31, %v4664_v32  ;;  %v5502_v28 = vld [vmem:[#allocation3 + $0x898] sm:$0xf]  ;;  %v6102_v30 = vld [vmem:[#allocation3 + $0x8d0] sm:$0xf0] }
 0x10c   :  { %2939 = vmatpush.bf16.msrb.mxu2 %v4603_v34  ;;  %v6736_v18 = vadd.f32 %v2604_v63, %v2587_v62  ;;  %v4902_v34 = vld [vmem:[#allocation3 + $0x3e8] sm:$0xf]  ;;  %2894 = vmatmul.bf16.gmra.mxu3 %v6644_v61  ;;  %v5807_v62 = vor.u32 %v6170_v39, %v5804_v41  ;;  %v6155_v63 = vld [vmem:[#allocation3 + $0xa7c] sm:$0xf]  ;;  %v5840_v31 = vld [vmem:[#allocation3 + $0xa4] sm:$0xf]  ;;  %v5503_v39 = vor.u32 %v6102_v30, %v5502_v28 }
 0x10d   :  { %2957 = vmatpush.bf16.msrb.mxu3 %v5083_v42  ;;  %v4903_v56 = vor.u32 %v5952_v35, %v4902_v34  ;;  %v5747_v19 = vor.u32 %v6155_v63, %v5744_v0  ;;  %v4484_v34 = vld [vmem:[#allocation3 + $0xdc] sm:$0xf0]  ;;  %v6140_v35 = vld [vmem:[#allocation3 + $0xa04] sm:$0xf]  ;;  %v5990_v41 = vld [vmem:[#allocation3 + $0x554] sm:$0xf] }
 0x10e   :  { %2904 = vmatpush.bf16.msrb.mxu0 %v5019_v17  ;;  %v5967_v17 = vld [vmem:[#allocation3 + $0x498] sm:$0xf0]  ;;  %7599 = vst [vmem:[#allocation23_spill] sm:$0xff] %v6736_v18  ;;  %v2589_v37 = vpop.f32.mrf.mxu2  ;;  %v5960_v28 = vld [vmem:[#allocation3 + $0x464] sm:$0xf] }
 0x10f   :  { %2922 = vmatpush.bf16.msrb.mxu1 %v5499_v7  ;;  %v4482_v7 = vld [vmem:[#allocation3 + $0xa0] sm:$0xf]  ;;  %v4963_v26 = vor.u32 %v5967_v17, %v4962_v14  ;;  %v2590_v46 = vadd.f32 %v2589_v37, %v2571_v3  ;;  %v5855_v14 = vld [vmem:[#allocation3 + $0x11c] sm:$0xf]  ;;  %v4544_v17 = vld [vmem:[#allocation3 + $0x154] sm:$0xf0] }
 0x110   :  { %2940 = vmatpush.bf16.msrb.mxu2 %v4543_v54  ;;  %v4483_v21 = vor.u32 %v5847_v8, %v4482_v7  ;;  %v5622_v54 = vld [vmem:[#allocation3 + $0x988] sm:$0xf]  ;;  %v6020_v8 = vld [vmem:[#allocation3 + $0x644] sm:$0xf]  ;;  %v5204_v3 = vld [vmem:[#allocation3 + $0x67c] sm:$0xf0] }
 0x111   :  { %2958 = vmatpush.bf16.msrb.mxu3 %v5023_v60  ;;  %v4604_v60 = vld [vmem:[#allocation3 + $0x1cc] sm:$0xf0]  ;;  %v5623_v7 = vor.u32 %v6132_v51, %v5622_v54  ;;  %v5684_v37 = vld [vmem:[#allocation3 + $0xa3c] sm:$0xf0]  ;;  %v5330_v51 = vld [vmem:[#allocation3 + $0x738] sm:$0xf] }
 0x112   :  { %2905 = vmatpush.bf16.msrb.mxu0 %v4959_v38  ;;  %v4423_v38 = vor.u32 %v5832_v24, %v4422_v16  ;;  %v4964_v30 = vld [vmem:[#allocation3 + $0x49c] sm:$0xf0] }
 0x113   :  { %2923 = vmatpush.bf16.msrb.mxu1 %v5439_v25  ;;  %v6050_v25 = vld [vmem:[#allocation3 + $0x734] sm:$0xf]  ;;  %v2607_v42 = vpop.f32.mrf.mxu3 }
 0x114   :  { %2941 = vmatpush.bf16.msrb.mxu2 %v4483_v21  ;;  %v5327_v40 = vor.u32 %v6050_v25, %v5324_v22  ;;  %v6742_v57 = vadd.f32 %v2607_v42, %v2590_v46  ;;  %v6005_v25 = vld [vmem:[#allocation3 + $0x5cc] sm:$0xf]  ;;  %v5144_v22 = vld [vmem:[#allocation3 + $0x604] sm:$0xf0]  ;;  %v5084_v46 = vld [vmem:[#allocation3 + $0x58c] sm:$0xf0]  ;;  %v4487_v42 = vor.u32 %v5840_v31, %v4484_v34 }
 0x115   :  { %2959 = vmatpush.bf16.msrb.mxu3 %v4963_v26  ;;  %v5087_v63 = vor.u32 %v5990_v41, %v5084_v46  ;;  %v4790_v31 = vld [vmem:[#allocation3 + $0x300] sm:$0xf]  ;;  %v5923_v34 = vld [vmem:[#allocation3 + $0x338] sm:$0xf0] }
 0x116   :  { %2906 = vmatpush.bf16.msrb.mxu0 %v4899_v58  ;;  %v5870_v58 = vld [vmem:[#allocation3 + $0x194] sm:$0xf]  ;;  %v2591_v20 = vpop.f32.mrf.mxu2 }
 0x117   :  { %2924 = vmatpush.bf16.msrb.mxu1 %v5379_v43  ;;  %v2555_v43 = vpop.f32.mrf.mxu0  ;;  %v4607_v9 = vor.u32 %v5870_v58, %v4604_v60  ;;  %v5938_v20 = vld [vmem:[#allocation3 + $0x3b0] sm:$0xf0] }
 0x118   :  { %2942 = vmatpush.bf16.msrb.mxu2 %v4423_v38  ;;  %v5147_v38 = vor.u32 %v6005_v25, %v5144_v22  ;;  %v5687_v43 = vor.u32 %v6140_v35, %v5684_v37  ;;  %v6095_v35 = vld [vmem:[#allocation3 + $0x89c] sm:$0xf]  ;;  %v5504_v37 = vld [vmem:[#allocation3 + $0x8d4] sm:$0xf0] }
 0x119   :  { %2960 = vmatpush.bf16.msrb.mxu3 %v4903_v56  ;;  %2907 = vmatmul.bf16.vlgmr.msrb.gmra.mxu0 %v6636_v1  ;;  %v6058_v56 = vld [vmem:[#allocation3 + $0x770] sm:$0xf0] }
 0x11a   :  { %2971 = vmatpush.bf16.msra.mxu0 %v5803_v6  ;;  %v5267_v6 = vor.u32 %v6035_v47, %v5264_v53  ;;  %v5825_v47 = vld [vmem:[#allocation3 + $0x2c] sm:$0xf]  ;;  %2925 = vmatmul.bf16.vlgmr.msrb.gmra.mxu1 %v6638_v2  ;;  %v5624_v53 = vld [vmem:[#allocation3 + $0x9c4] sm:$0xf0] }
 0x11b   :  { %2989 = vmatpush.bf16.msra.mxu1 %v4847_v49  ;;  %v2573_v49 = vpop.f32.mrf.mxu1  ;;  %v2609_v21 = vpop.f32.mrf.mxu3  ;;  %2943 = vmatmul.bf16.vlgmr.msrb.gmra.mxu2 %v6634_v59 }
 0x11c   :  { %3007 = vmatpush.bf16.msra.mxu2 %v5327_v40  ;;  %v5442_v40 = vld [vmem:[#allocation3 + $0x820] sm:$0xf]  ;;  %v4424_v49 = vld [vmem:[#allocation3 + $0x64] sm:$0xf0]  ;;  %2961 = vmatmul.bf16.vlgmr.msrb.gmra.mxu3 %v6636_v1  ;;  %v6110_v21 = vld [vmem:[#allocation3 + $0x914] sm:$0xf] }
 0x11d   :  { %3025 = vmatpush.bf16.msra.mxu3 %v5807_v62 }
 0x11e   :  { %2972 = vmatpush.bf16.msra.mxu0 %v5743_v23  ;;  %v5207_v23 = vor.u32 %v6020_v8, %v5204_v3  ;;  %v2656_v54 = vpop.f32.mrf.mxu2 }
 0x11f   :  { %2990 = vmatpush.bf16.msra.mxu1 %v4787_v11  ;;  %v5562_v11 = vld [vmem:[#allocation3 + $0x910] sm:$0xf]  ;;  %v2620_v16 = vpop.f32.mrf.mxu0 }
 0x120   :  { %3008 = vmatpush.bf16.msra.mxu2 %v5267_v6  ;;  %v5563_v24 = vor.u32 %v6117_v13, %v5562_v11  ;;  %v5975_v6 = vld [vmem:[#allocation3 + $0x4dc] sm:$0xf]  ;;  %v5382_v11 = vld [vmem:[#allocation3 + $0x7a8] sm:$0xf]  ;;  %v6072_v13 = vld [vmem:[#allocation3 + $0x7e0] sm:$0xf0] }
 0x121   :  { %3026 = vmatpush.bf16.msra.mxu3 %v5747_v19  ;;  %v5331_v19 = vor.u32 %v6058_v56, %v5330_v51  ;;  %v5383_v22 = vor.u32 %v6072_v13, %v5382_v11  ;;  %v6178_v56 = vld [vmem:[#allocation3 + $0xb30] sm:$0xf0]  ;;  %v5150_v11 = vld [vmem:[#allocation3 + $0x5d0] sm:$0xf]  ;;  %v6013_v13 = vld [vmem:[#allocation3 + $0x608] sm:$0xf0] }
 0x122   :  { %2973 = vmatpush.bf16.msra.mxu0 %v5683_v44  ;;  %v6087_v44 = vld [vmem:[#allocation3 + $0x858] sm:$0xf0] }
 0x123   :  { %2991 = vmatpush.bf16.msra.mxu1 %v4727_v27  ;;  %v2638_v26 = vpop.f32.mrf.mxu1  ;;  %v4547_v27 = vor.u32 %v5855_v14, %v4544_v17  ;;  %v6750_v60 = vpop.f32.mrf.mxu3  ;;  %v5443_v0 = vor.u32 %v6087_v44, %v5442_v40  ;;  %v4850_v14 = vld [vmem:[#allocation3 + $0x378] sm:$0xf]  ;;  %v6028_v40 = vld [vmem:[#allocation3 + $0x680] sm:$0xf0] }
 0x124   :  { %v2639_v32 = vadd.f32 %v2638_v26, %v2620_v16  ;;  %3009 = vmatpush.bf16.msra.mxu2 %v5207_v23  ;;  %v5564_v16 = vld [vmem:[#allocation3 + $0x94c] sm:$0xf0]  ;;  %v5270_v23 = vld [vmem:[#allocation3 + $0x6c0] sm:$0xf]  ;;  %v4851_v26 = vor.u32 %v5938_v20, %v4850_v14 }
 0x125   :  { %3027 = vmatpush.bf16.msra.mxu3 %v5687_v43  ;;  %v5210_v43 = vld [vmem:[#allocation3 + $0x648] sm:$0xf]  ;;  %v5750_v14 = vld [vmem:[#allocation3 + $0xa80] sm:$0xf]  ;;  %v4670_v20 = vld [vmem:[#allocation3 + $0x210] sm:$0xf] }
 0x126   :  { %2974 = vmatpush.bf16.msra.mxu0 %v5623_v7  ;;  %v6748_v58 = vadd.f32 %v2656_v54, %v2639_v32  ;;  %v5024_v7 = vld [vmem:[#allocation3 + $0x514] sm:$0xf0] }
 0x127   :  { %2992 = vmatpush.bf16.msra.mxu1 %v4667_v52  ;;  %v6125_v52 = vld [vmem:[#allocation3 + $0x98c] sm:$0xf]  ;;  %v2622_v62 = vpop.f32.mrf.mxu0  ;;  %v5027_v25 = vor.u32 %v5975_v6, %v5024_v7  ;;  %v5810_v54 = vld [vmem:[#allocation3 + $0xaf8] sm:$0xf]  ;;  %v5444_v6 = vld [vmem:[#allocation3 + $0x85c] sm:$0xf0]  ;;  %v5211_v7 = vor.u32 %v6028_v40, %v5210_v43 }
 0x128   :  { %3010 = vmatpush.bf16.msra.mxu2 %v5147_v38  ;;  %7600 = vst [vmem:[#allocation24_spill] sm:$0xff] %v6748_v58  ;;  %v5627_v3 = vor.u32 %v6125_v52, %v5624_v53  ;;  %v2658_v38 = vpop.f32.mrf.mxu2  ;;  %v5945_v52 = vld [vmem:[#allocation3 + $0x3ec] sm:$0xf]  ;;  %v4904_v53 = vld [vmem:[#allocation3 + $0x424] sm:$0xf0] }
 0x129   :  { %2912 = vmatmul.bf16.gmra.mxu0 %v6646_v4  ;;  %v4610_v43 = vld [vmem:[#allocation3 + $0x198] sm:$0xf]  ;;  %v5878_v40 = vld [vmem:[#allocation3 + $0x1d0] sm:$0xf0] }
 0x12a   :  { %2975 = vmatpush.bf16.msra.mxu0 %v5563_v24  ;;  %v6043_v24 = vld [vmem:[#allocation3 + $0x6f8] sm:$0xf0]  ;;  %3028 = vmatpush.bf16.msra.mxu3 %v5627_v3 }
 0x12b   :  { %2993 = vmatpush.bf16.msra.mxu1 %v4607_v9  ;;  %v2640_v8 = vpop.f32.mrf.mxu1  ;;  %v4427_v9 = vor.u32 %v5825_v47, %v4424_v49  ;;  %v5271_v32 = vor.u32 %v6043_v24, %v5270_v23  ;;  %v6754_v41 = vpop.f32.mrf.mxu3  ;;  %v4791_v47 = vor.u32 %v5923_v34, %v4790_v31  ;;  %v5507_v49 = vor.u32 %v6095_v35, %v5504_v37  ;;  %v6065_v23 = vld [vmem:[#allocation3 + $0x7ac] sm:$0xf]  ;;  %v5384_v24 = vld [vmem:[#allocation3 + $0x7e4] sm:$0xf0]  ;;  %v5090_v35 = vld [vmem:[#allocation3 + $0x558] sm:$0xf] }
 0x12c   :  { %v2641_v17 = vadd.f32 %v2640_v8, %v2622_v62  ;;  %3011 = vmatpush.bf16.msra.mxu2 %v5087_v63  ;;  %v4730_v62 = vld [vmem:[#allocation3 + $0x288] sm:$0xf]  ;;  %v5908_v63 = vld [vmem:[#allocation3 + $0x2c0] sm:$0xf0]  ;;  %v4907_v8 = vor.u32 %v5945_v52, %v4904_v53  ;;  %2930 = vmatmul.bf16.gmra.mxu1 %v6648_v5  ;;  %v5998_v37 = vld [vmem:[#allocation3 + $0x590] sm:$0xf0] }
 0x12d   :  { %v4731_v3 = vor.u32 %v5908_v63, %v4730_v62  ;;  %2948 = vmatmul.bf16.gmra.mxu2 %v6644_v61  ;;  %2966 = vmatmul.bf16.gmra.mxu3 %v6646_v4  ;;  %v4792_v52 = vld [vmem:[#allocation3 + $0x33c] sm:$0xf0]  ;;  %v5630_v62 = vld [vmem:[#allocation3 + $0x990] sm:$0xf]  ;;  %v6133_v63 = vld [vmem:[#allocation3 + $0x9c8] sm:$0xf0] }
 0x12e   :  { %2976 = vmatpush.bf16.msra.mxu0 %v5503_v39  ;;  %v6752_v39 = vadd.f32 %v2658_v38, %v2641_v17  ;;  %v5690_v38 = vld [vmem:[#allocation3 + $0xa08] sm:$0xf] }
 0x12f   :  { %2994 = vmatpush.bf16.msra.mxu1 %v4547_v27  ;;  %v5567_v27 = vor.u32 %v6110_v21, %v5564_v16  ;;  %v2625_v46 = vpop.f32.mrf.mxu0  ;;  %v5893_v21 = vld [vmem:[#allocation3 + $0x248] sm:$0xf0] }
 0x130   :  { %3012 = vmatpush.bf16.msra.mxu2 %v5027_v25  ;;  %7601 = vst [vmem:[#allocation25_spill] sm:$0xff] %v6752_v39  ;;  %v2661_v16 = vpop.f32.mrf.mxu2  ;;  %v4671_v34 = vor.u32 %v5893_v21, %v4670_v20  ;;  %v5901_v21 = vld [vmem:[#allocation3 + $0x28c] sm:$0xf] }
 0x131   :  { %3029 = vmatpush.bf16.msra.mxu3 %v5567_v27 }
 0x132   :  { %2977 = vmatpush.bf16.msra.mxu0 %v5443_v0  ;;  %v6080_v0 = vld [vmem:[#allocation3 + $0x824] sm:$0xf] }
 0x133   :  { %2995 = vmatpush.bf16.msra.mxu1 %v4487_v42  ;;  %v4967_v42 = vor.u32 %v5960_v28, %v4964_v30  ;;  %v2643_v44 = vpop.f32.mrf.mxu1  ;;  %v5447_v17 = vor.u32 %v6080_v0, %v5444_v6  ;;  %v5931_v28 = vld [vmem:[#allocation3 + $0x37c] sm:$0xf]  ;;  %v4852_v30 = vld [vmem:[#allocation3 + $0x3b4] sm:$0xf0]  ;;  %v4550_v0 = vld [vmem:[#allocation3 + $0x120] sm:$0xf] }
 0x134   :  { %v2644_v51 = vadd.f32 %v2643_v44, %v2625_v46  ;;  %v5387_v46 = vor.u32 %v6065_v23, %v5384_v24  ;;  %v4855_v44 = vor.u32 %v5931_v28, %v4852_v30  ;;  %v5863_v6 = vld [vmem:[#allocation3 + $0x158] sm:$0xf0]  ;;  %v5570_v23 = vld [vmem:[#allocation3 + $0x918] sm:$0xf]  ;;  %v5848_v28 = vld [vmem:[#allocation3 + $0xe0] sm:$0xf0] }
 0x135   :  { %3013 = vmatpush.bf16.msra.mxu2 %v4967_v42  ;;  %3030 = vmatpush.bf16.msra.mxu3 %v5507_v49  ;;  %v6148_v42 = vld [vmem:[#allocation3 + $0xa40] sm:$0xf0]  ;;  %v4551_v20 = vor.u32 %v5863_v6, %v4550_v0 }
 0x136   :  { %2978 = vmatpush.bf16.msra.mxu0 %v5383_v22  ;;  %v6760_v25 = vadd.f32 %v2661_v16, %v2644_v51  ;;  %v6762_v22 = vpop.f32.mrf.mxu3  ;;  %v5916_v49 = vld [vmem:[#allocation3 + $0x304] sm:$0xf]  ;;  %v5691_v53 = vor.u32 %v6148_v42, %v5690_v38  ;;  %v5030_v51 = vld [vmem:[#allocation3 + $0x4e0] sm:$0xf]  ;;  %v4732_v16 = vld [vmem:[#allocation3 + $0x2c4] sm:$0xf0] }
 0x137   :  { %2996 = vmatpush.bf16.msra.mxu1 %v4427_v9  ;;  %v5811_v9 = vor.u32 %v6178_v56, %v5810_v54  ;;  %v2627_v27 = vpop.f32.mrf.mxu0  ;;  %v4611_v54 = vor.u32 %v5878_v40, %v4610_v43  ;;  %v5983_v56 = vld [vmem:[#allocation3 + $0x518] sm:$0xf0]  ;;  %v4672_v42 = vld [vmem:[#allocation3 + $0x24c] sm:$0xf0]  ;;  %v5510_v40 = vld [vmem:[#allocation3 + $0x8a0] sm:$0xf] }
 0x138   :  { %v4490_v27 = vld [vmem:[#allocation3 + $0xa8] sm:$0xf]  ;;  %v6171_v43 = vld [vmem:[#allocation3 + $0xafc] sm:$0xf] }
 0x139   :  { %3014 = vmatpush.bf16.msra.mxu2 %v4907_v8  ;;  %3031 = vmatpush.bf16.msra.mxu3 %v5447_v17  ;;  %v4795_v8 = vor.u32 %v5916_v49, %v4792_v52  ;;  %v4491_v38 = vor.u32 %v5848_v28, %v4490_v27  ;;  %v5833_v49 = vld [vmem:[#allocation3 + $0x68] sm:$0xf0] }
 0x13a   :  { %3043 = vmatpush.bf16.msrb.mxu0 %v4851_v26  ;;  %v5151_v26 = vor.u32 %v6013_v13, %v5150_v11  ;;  %v4970_v11 = vld [vmem:[#allocation3 + $0x468] sm:$0xf]  ;;  %v5968_v13 = vld [vmem:[#allocation3 + $0x4a0] sm:$0xf0] }
 0x13b   :  { %3061 = vmatpush.bf16.msrb.mxu1 %v5331_v19  ;;  %v6163_v19 = vld [vmem:[#allocation3 + $0xab8] sm:$0xf0]  ;;  %v2645_v31 = vpop.f32.mrf.mxu1  ;;  %2979 = vmatmul.bf16.vlgmr.msra.gmra.mxu0 %v6638_v2 }
 0x13c   :  { %v4971_v31 = vor.u32 %v5968_v13, %v4970_v11  ;;  %2997 = vmatmul.bf16.vlgmr.msra.gmra.mxu1 %v6634_v59  ;;  %v6156_v11 = vld [vmem:[#allocation3 + $0xa84] sm:$0xf] }
 0x13d   :  { %3079 = vmatpush.bf16.msrb.mxu2 %v5811_v9  ;;  %3032 = vmatpush.bf16.msra.mxu3 %v5387_v46  ;;  %v5886_v46 = vld [vmem:[#allocation3 + $0x214] sm:$0xf] }
 0x13e   :  { %3044 = vmatpush.bf16.msrb.mxu0 %v4791_v47  ;;  %v5091_v47 = vor.u32 %v5998_v37, %v5090_v35  ;;  %v2681_v9 = vpop.f32.mrf.mxu3  ;;  %v5953_v35 = vld [vmem:[#allocation3 + $0x428] sm:$0xf0]  ;;  %3015 = vmatmul.bf16.vlgmr.msra.gmra.mxu2 %v6636_v1 }
 0x13f   :  { %3062 = vmatpush.bf16.msrb.mxu1 %v5271_v32  ;;  %v5751_v32 = vor.u32 %v6163_v19, %v5750_v14  ;;  %v2692_v14 = vpop.f32.mrf.mxu0  ;;  %v5631_v19 = vor.u32 %v6133_v63, %v5630_v62  ;;  %v5332_v62 = vld [vmem:[#allocation3 + $0x774] sm:$0xf0]  ;;  %v5871_v9 = vld [vmem:[#allocation3 + $0x19c] sm:$0xf] }
 0x140   :  { %v2693_v24 = vadd.f32 %v2692_v14, %v6750_v60  ;;  %v5812_v60 = vld [vmem:[#allocation3 + $0xb34] sm:$0xf0]  ;;  %3033 = vmatmul.bf16.vlgmr.msra.gmra.mxu3 %v6638_v2 }
 0x141   :  { %3080 = vmatpush.bf16.msrb.mxu2 %v5751_v32  ;;  %3097 = vmatpush.bf16.msrb.mxu3 %v4855_v44  ;;  %v4735_v32 = vor.u32 %v5901_v21, %v4732_v16  ;;  %v6103_v44 = vld [vmem:[#allocation3 + $0x8d8] sm:$0xf0] }
 0x142   :  { %3045 = vmatpush.bf16.msrb.mxu0 %v4731_v3  ;;  %v5031_v3 = vor.u32 %v5983_v56, %v5030_v51  ;;  %v4675_v51 = vor.u32 %v5886_v46, %v4672_v42  ;;  %v6051_v56 = vld [vmem:[#allocation3 + $0x73c] sm:$0xf]  ;;  %v4858_v46 = vld [vmem:[#allocation3 + $0x380] sm:$0xf] }
 0x143   :  { %3063 = vmatpush.bf16.msrb.mxu1 %v5211_v7  ;;  %v2663_v7 = vpop.f32.mrf.mxu2  ;;  %v2710_v17 = vpop.f32.mrf.mxu1  ;;  %v5335_v21 = vor.u32 %v6051_v56, %v5332_v62  ;;  %v5939_v42 = vld [vmem:[#allocation3 + $0x3b8] sm:$0xf0]  ;;  %v5841_v56 = vld [vmem:[#allocation3 + $0xac] sm:$0xf] }
 0x144   :  { %v6765_v30 = vadd.f32 %v2710_v17, %v2693_v24  ;;  %v5815_v7 = vor.u32 %v6171_v43, %v5812_v60  ;;  %v5752_v17 = vld [vmem:[#allocation3 + $0xabc] sm:$0xf0]  ;;  %v6036_v24 = vld [vmem:[#allocation3 + $0x6c4] sm:$0xf] }
 0x145   :  { %3081 = vmatpush.bf16.msrb.mxu2 %v5691_v53  ;;  %3098 = vmatpush.bf16.msrb.mxu3 %v4795_v8  ;;  %v5511_v8 = vor.u32 %v6103_v44, %v5510_v40  ;;  %v5755_v27 = vor.u32 %v6156_v11, %v5752_v17 }
 0x146   :  { %3046 = vmatpush.bf16.msrb.mxu0 %v4671_v34  ;;  %7602 = vst [vmem:[#allocation26_spill] sm:$0xff] %v6765_v30  ;;  %v4910_v34 = vld [vmem:[#allocation3 + $0x3f0] sm:$0xf]  ;;  %v2746_v53 = vpop.f32.mrf.mxu3 }
 0x147   :  { %3064 = vmatpush.bf16.msrb.mxu1 %v5151_v26  ;;  %v6118_v26 = vld [vmem:[#allocation3 + $0x950] sm:$0xf0]  ;;  %v2694_v0 = vpop.f32.mrf.mxu0 }
 0x148   :  { %v5571_v37 = vor.u32 %v6118_v26, %v5570_v23  ;;  %v2695_v13 = vadd.f32 %v2694_v0, %v6754_v41  ;;  %v5272_v26 = vld [vmem:[#allocation3 + $0x6fc] sm:$0xf0]  ;;  %v5692_v41 = vld [vmem:[#allocation3 + $0xa44] sm:$0xf0]  ;;  %v4859_v0 = vor.u32 %v5939_v42, %v4858_v46 }
 0x149   :  { %3082 = vmatpush.bf16.msrb.mxu2 %v5631_v19  ;;  %3099 = vmatpush.bf16.msrb.mxu3 %v4735_v32  ;;  %v5450_v19 = vld [vmem:[#allocation3 + $0x828] sm:$0xf]  ;;  %v4552_v32 = vld [vmem:[#allocation3 + $0x15c] sm:$0xf0] }
 0x14a   :  { %3047 = vmatpush.bf16.msrb.mxu0 %v4611_v54  ;;  %v4911_v54 = vor.u32 %v5953_v35, %v4910_v34  ;;  %v6141_v34 = vld [vmem:[#allocation3 + $0xa0c] sm:$0xf]  ;;  %v5390_v35 = vld [vmem:[#allocation3 + $0x7b0] sm:$0xf] }
 0x14b   :  { %3065 = vmatpush.bf16.msrb.mxu1 %v5091_v47  ;;  %v4430_v47 = vld [vmem:[#allocation3 + $0x30] sm:$0xf]  ;;  %v2728_v52 = vpop.f32.mrf.mxu2  ;;  %v2712_v6 = vpop.f32.mrf.mxu1  ;;  %2984 = vmatmul.bf16.gmra.mxu0 %v6648_v5 }
 0x14c   :  { %v6771_v63 = vadd.f32 %v2746_v53, %v2728_v52  ;;  %v4431_v14 = vor.u32 %v5833_v49, %v4430_v47  ;;  %v6774_v16 = vadd.f32 %v2712_v6, %v2695_v13  ;;  %v5695_v52 = vor.u32 %v6141_v34, %v5692_v41  ;;  %v4492_v6 = vld [vmem:[#allocation3 + $0xe4] sm:$0xf0]  ;;  %3002 = vmatmul.bf16.gmra.mxu1 %v6644_v61 }
 0x14d   :  { %3083 = vmatpush.bf16.msrb.mxu2 %v5571_v37  ;;  %3100 = vmatpush.bf16.msrb.mxu3 %v4675_v51  ;;  %v6073_v37 = vld [vmem:[#allocation3 + $0x7e8] sm:$0xf0]  ;;  %v5212_v51 = vld [vmem:[#allocation3 + $0x684] sm:$0xf0]  ;;  %v4495_v17 = vor.u32 %v5841_v56, %v4492_v6  ;;  %v4678_v56 = vld [vmem:[#allocation3 + $0x218] sm:$0xf] }
 0x14e   :  { %3048 = vmatpush.bf16.msrb.mxu0 %v4551_v20  ;;  %v6088_v20 = vld [vmem:[#allocation3 + $0x860] sm:$0xf0]  ;;  %v2748_v60 = vpop.f32.mrf.mxu3  ;;  %v5391_v53 = vor.u32 %v6073_v37, %v5390_v35  ;;  %3020 = vmatmul.bf16.gmra.mxu2 %v6646_v4 }
 0x14f   :  { %3066 = vmatpush.bf16.msrb.mxu1 %v5031_v3  ;;  %v4612_v3 = vld [vmem:[#allocation3 + $0x1d4] sm:$0xf0]  ;;  %v5451_v28 = vor.u32 %v6088_v20, %v5450_v19  ;;  %v2697_v47 = vpop.f32.mrf.mxu0  ;;  %v5152_v20 = vld [vmem:[#allocation3 + $0x60c] sm:$0xf0] }
 0x150   :  { %v4615_v23 = vor.u32 %v5871_v9, %v4612_v3  ;;  %v2698_v62 = vadd.f32 %v2697_v47, %v6762_v22  ;;  %v4798_v9 = vld [vmem:[#allocation3 + $0x308] sm:$0xf]  ;;  %v5924_v3 = vld [vmem:[#allocation3 + $0x340] sm:$0xf0]  ;;  %3038 = vmatmul.bf16.gmra.mxu3 %v6648_v5 }
 0x151   :  { %3084 = vmatpush.bf16.msrb.mxu2 %v5511_v8  ;;  %v5632_v8 = vld [vmem:[#allocation3 + $0x9cc] sm:$0xf0]  ;;  %v4799_v22 = vor.u32 %v5924_v3, %v4798_v9 }
 0x152   :  { %3049 = vmatpush.bf16.msrb.mxu0 %v4491_v38  ;;  %v5275_v38 = vor.u32 %v6036_v24, %v5272_v26  ;;  %3101 = vmatpush.bf16.msrb.mxu3 %v4615_v23  ;;  %v4432_v23 = vld [vmem:[#allocation3 + $0x6c] sm:$0xf0]  ;;  %v6111_v24 = vld [vmem:[#allocation3 + $0x91c] sm:$0xf]  ;;  %v5572_v26 = vld [vmem:[#allocation3 + $0x954] sm:$0xf0] }
 0x153   :  { %3067 = vmatpush.bf16.msrb.mxu1 %v4971_v31  ;;  %v5856_v31 = vld [vmem:[#allocation3 + $0x124] sm:$0xf]  ;;  %v2730_v43 = vpop.f32.mrf.mxu2  ;;  %v2715_v49 = vpop.f32.mrf.mxu1 }
 0x154   :  { %v4555_v40 = vor.u32 %v5856_v31, %v4552_v32  ;;  %v6776_v44 = vadd.f32 %v2748_v60, %v2730_v43  ;;  %v6779_v11 = vadd.f32 %v2715_v49, %v2698_v62  ;;  %v4738_v31 = vld [vmem:[#allocation3 + $0x290] sm:$0xf]  ;;  %v5909_v32 = vld [vmem:[#allocation3 + $0x2c8] sm:$0xf0]  ;;  %v5575_v43 = vor.u32 %v6111_v24, %v5572_v26  ;;  %v5991_v60 = vld [vmem:[#allocation3 + $0x55c] sm:$0xf] }
 0x155   :  { %3085 = vmatpush.bf16.msrb.mxu2 %v5451_v28  ;;  %v6059_v28 = vld [vmem:[#allocation3 + $0x778] sm:$0xf0]  ;;  %v4739_v49 = vor.u32 %v5909_v32, %v4738_v31  ;;  %v5894_v62 = vld [vmem:[#allocation3 + $0x250] sm:$0xf0]  ;;  %v5961_v31 = vld [vmem:[#allocation3 + $0x46c] sm:$0xf] }
 0x156   :  { %3050 = vmatpush.bf16.msrb.mxu0 %v4431_v14  ;;  %3102 = vmatpush.bf16.msrb.mxu3 %v4555_v40  ;;  %v6006_v14 = vld [vmem:[#allocation3 + $0x5d4] sm:$0xf]  ;;  %v2751_v41 = vpop.f32.mrf.mxu3  ;;  %v5092_v40 = vld [vmem:[#allocation3 + $0x594] sm:$0xf0]  ;;  %v4679_v3 = vor.u32 %v5894_v62, %v4678_v56  ;;  %v6179_v62 = vld [vmem:[#allocation3 + $0xb38] sm:$0xf0] }
 0x157   :  { %3068 = vmatpush.bf16.msrb.mxu1 %v4911_v54  ;;  %v6021_v54 = vld [vmem:[#allocation3 + $0x64c] sm:$0xf]  ;;  %v5155_v35 = vor.u32 %v6006_v14, %v5152_v20  ;;  %v5452_v14 = vld [vmem:[#allocation3 + $0x864] sm:$0xf0]  ;;  %v4618_v20 = vld [vmem:[#allocation3 + $0x1a0] sm:$0xf] }
 0x158   :  { %v5215_v13 = vor.u32 %v6021_v54, %v5212_v51  ;;  %v5278_v54 = vld [vmem:[#allocation3 + $0x6c8] sm:$0xf]  ;;  %v6044_v51 = vld [vmem:[#allocation3 + $0x700] sm:$0xf0] }
 0x159   :  { %3086 = vmatpush.bf16.msrb.mxu2 %v5391_v53  ;;  %v5512_v53 = vld [vmem:[#allocation3 + $0x8dc] sm:$0xf0]  ;;  %v5279_v9 = vor.u32 %v6044_v51, %v5278_v54  ;;  %v5946_v54 = vld [vmem:[#allocation3 + $0x3f4] sm:$0xf] }
 0x15a   :  { %3115 = vmatpush.bf16.msra.mxu0 %v5335_v21  ;;  %v5826_v21 = vld [vmem:[#allocation3 + $0x34] sm:$0xf]  ;;  %3103 = vmatpush.bf16.msrb.mxu3 %v4495_v17  ;;  %v5218_v17 = vld [vmem:[#allocation3 + $0x650] sm:$0xf]  ;;  %v5818_v51 = vld [vmem:[#allocation3 + $0xb00] sm:$0xf] }
 0x15b   :  { %3133 = vmatpush.bf16.msra.mxu1 %v5815_v7  ;;  %v6126_v7 = vld [vmem:[#allocation3 + $0x994] sm:$0xf]  ;;  %v2733_v34 = vpop.f32.mrf.mxu2  ;;  %v2717_v46 = vpop.f32.mrf.mxu1  ;;  %v4435_v42 = vor.u32 %v5826_v21, %v4432_v23  ;;  %v5879_v21 = vld [vmem:[#allocation3 + $0x1d8] sm:$0xf0]  ;;  %3051 = vmatmul.bf16.vlgmr.msrb.gmra.mxu0 %v6634_v59 }
 0x15c   :  { %v5635_v19 = vor.u32 %v6126_v7, %v5632_v8  ;;  %v6785_v37 = vadd.f32 %v2751_v41, %v2733_v34  ;;  %v5976_v7 = vld [vmem:[#allocation3 + $0x4e4] sm:$0xf]  ;;  %v5032_v8 = vld [vmem:[#allocation3 + $0x51c] sm:$0xf0]  ;;  %v4619_v41 = vor.u32 %v5879_v21, %v4618_v20  ;;  %v5392_v46 = vld [vmem:[#allocation3 + $0x7ec] sm:$0xf0]  ;;  %3069 = vmatmul.bf16.vlgmr.msrb.gmra.mxu1 %v6636_v1  ;;  %v5819_v20 = vor.u32 %v6179_v62, %v5818_v51 }
 0x15d   :  { %3151 = vmatpush.bf16.msra.mxu2 %v4859_v0  ;;  %v5095_v0 = vor.u32 %v5991_v60, %v5092_v40  ;;  %v5035_v24 = vor.u32 %v5976_v7, %v5032_v8  ;;  %v4558_v60 = vld [vmem:[#allocation3 + $0x128] sm:$0xf]  ;;  %v5864_v40 = vld [vmem:[#allocation3 + $0x160] sm:$0xf0]  ;;  %v3215_v51 = vld [vmem:[#allocation5 + $0x50] sm:$0xff] }
 0x15e   :  { %3116 = vmatpush.bf16.msra.mxu0 %v5275_v38  ;;  %v2699_v38 = vpop.f32.mrf.mxu0  ;;  %3104 = vmatpush.bf16.msrb.mxu3 %v4435_v42  ;;  %v5158_v42 = vld [vmem:[#allocation3 + $0x5d8] sm:$0xf]  ;;  %v4559_v56 = vor.u32 %v5864_v40, %v4558_v60  ;;  %v6149_v60 = vld [vmem:[#allocation3 + $0xa48] sm:$0xf0]  ;;  %v4978_v40 = vld [vmem:[#allocation3 + $0x470] sm:$0xf] }
 0x15f   :  { %3134 = vmatpush.bf16.msra.mxu1 %v5755_v27  ;;  %v5338_v27 = vld [vmem:[#allocation3 + $0x740] sm:$0xf]  ;;  %v6066_v38 = vld [vmem:[#allocation3 + $0x7b4] sm:$0xf]  ;;  %3087 = vmatmul.bf16.vlgmr.msrb.gmra.mxu2 %v6638_v2 }
 0x160   :  { %v5339_v47 = vor.u32 %v6059_v28, %v5338_v27 }
 0x161   :  { %3152 = vmatpush.bf16.msra.mxu2 %v4799_v22  ;;  %v2753_v22 = vpop.f32.mrf.mxu3  ;;  %3105 = vmatmul.bf16.vlgmr.msrb.gmra.mxu3 %v6634_v59 }
 0x162   :  { %3117 = vmatpush.bf16.msra.mxu0 %v5215_v13  ;;  %3169 = vmatpush.bf16.msra.mxu3 %v5339_v47  ;;  %v6081_v13 = vld [vmem:[#allocation3 + $0x82c] sm:$0xf] }
 0x163   :  { %3135 = vmatpush.bf16.msra.mxu1 %v5695_v52  ;;  %v6096_v52 = vld [vmem:[#allocation3 + $0x8a4] sm:$0xf]  ;;  %v2735_v23 = vpop.f32.mrf.mxu2  ;;  %v6787_v27 = vpop.f32.mrf.mxu1  ;;  %v5455_v28 = vor.u32 %v6081_v13, %v5452_v14  ;;  %v3219_v14 = vld [vmem:[#allocation5 + $0x70] sm:$0xff] }
 0x164   :  { %v5515_v6 = vor.u32 %v6096_v52, %v5512_v53  ;;  %v3220_v52 = vld [vmem:[#allocation5 + $0x78] sm:$0xff]  ;;  %v5758_v23 = vld [vmem:[#allocation3 + $0xa88] sm:$0xf] }
 0x165   :  { %3153 = vmatpush.bf16.msra.mxu2 %v4739_v49  ;;  %v5395_v49 = vor.u32 %v6066_v38, %v5392_v46 }
 0x166   :  { %3118 = vmatpush.bf16.msra.mxu0 %v5155_v35  ;;  %v2764_v26 = vpop.f32.mrf.mxu0  ;;  %3170 = vmatpush.bf16.msra.mxu3 %v5279_v9  ;;  %v4972_v35 = vld [vmem:[#allocation3 + $0x4a4] sm:$0xf0]  ;;  %v4498_v9 = vld [vmem:[#allocation3 + $0xb0] sm:$0xf] }
 0x167   :  { %3136 = vmatpush.bf16.msra.mxu1 %v5635_v19  ;;  %v6029_v19 = vld [vmem:[#allocation3 + $0x688] sm:$0xf0]  ;;  %v6790_v32 = vadd.f32 %v2764_v26, %v6771_v63  ;;  %v4975_v47 = vor.u32 %v5961_v31, %v4972_v35  ;;  %v4912_v63 = vld [vmem:[#allocation3 + $0x42c] sm:$0xf0]  ;;  %v5038_v26 = vld [vmem:[#allocation3 + $0x4e8] sm:$0xf] }
 0x168   :  { %v5219_v34 = vor.u32 %v6029_v19, %v5218_v17  ;;  %v4915_v13 = vor.u32 %v5946_v54, %v4912_v63  ;;  %v3218_v31 = vld [vmem:[#allocation5 + $0x68] sm:$0xff]  ;;  %v3217_v35 = vld [vmem:[#allocation5 + $0x60] sm:$0xff]  ;;  %v3236_v54 = vld [vmem:[#allocation5 + $0xf8] sm:$0xff] }
 0x169   :  { %3154 = vmatpush.bf16.msra.mxu2 %v4679_v3  ;;  %7603 = vst [vmem:[#allocation27_spill] sm:$0xff] %v6790_v32  ;;  %v6798_v8 = vpop.f32.mrf.mxu3  ;;  %v5849_v3 = vld [vmem:[#allocation3 + $0xe8] sm:$0xf0] }
 0x16a   :  { %3119 = vmatpush.bf16.msra.mxu0 %v5095_v0  ;;  %3171 = vmatpush.bf16.msra.mxu3 %v5219_v34  ;;  %v5098_v0 = vld [vmem:[#allocation3 + $0x560] sm:$0xf]  ;;  %v4499_v22 = vor.u32 %v5849_v3, %v4498_v9  ;;  %v4438_v34 = vld [vmem:[#allocation3 + $0x38] sm:$0xf]  ;;  %v3214_v9 = vld [vmem:[#allocation5 + $0x48] sm:$0xff] }
 0x16b   :  { %3137 = vmatpush.bf16.msra.mxu1 %v5575_v43  ;;  %v6014_v43 = vld [vmem:[#allocation3 + $0x610] sm:$0xf0]  ;;  %v6796_v7 = vpop.f32.mrf.mxu2  ;;  %v6802_v19 = vpop.f32.mrf.mxu1  ;;  %3056 = vmatmul.bf16.gmra.mxu0 %v6644_v61 }
 0x16c   :  { %v5159_v53 = vor.u32 %v6014_v43, %v5158_v42  ;;  %v5698_v42 = vld [vmem:[#allocation3 + $0xa10] sm:$0xf]  ;;  %3074 = vmatmul.bf16.gmra.mxu1 %v6646_v4 }
 0x16d   :  { %3155 = vmatpush.bf16.msra.mxu2 %v4619_v41  ;;  %v5834_v41 = vld [vmem:[#allocation3 + $0x70] sm:$0xf0] }
 0x16e   :  { %3120 = vmatpush.bf16.msra.mxu0 %v5035_v24  ;;  %v6800_v17 = vpop.f32.mrf.mxu0  ;;  %3172 = vmatpush.bf16.msra.mxu3 %v5159_v53  ;;  %v6164_v24 = vld [vmem:[#allocation3 + $0xac0] sm:$0xf0]  ;;  %v4439_v43 = vor.u32 %v5834_v41, %v4438_v34  ;;  %v3235_v3 = vld [vmem:[#allocation5 + $0xf0] sm:$0xff]  ;;  %v3212_v34 = vld [vmem:[#allocation5 + $0x38] sm:$0xff] }
 0x16f   :  { %3138 = vmatpush.bf16.msra.mxu1 %v5515_v6  ;;  %v5999_v6 = vld [vmem:[#allocation3 + $0x598] sm:$0xf0]  ;;  %v5759_v38 = vor.u32 %v6164_v24, %v5758_v23  ;;  %v3234_v23 = vld [vmem:[#allocation5 + $0xe8] sm:$0xff]  ;;  %3092 = vmatmul.bf16.gmra.mxu2 %v6648_v5  ;;  %v3233_v41 = vld [vmem:[#allocation5 + $0xe0] sm:$0xff] }
 0x170   :  { %v5099_v21 = vor.u32 %v5999_v6, %v5098_v0  ;;  %v5699_v0 = vor.u32 %v6149_v60, %v5698_v42  ;;  %v3232_v60 = vld [vmem:[#allocation5 + $0xd8] sm:$0xff] }
 0x171   :  { %3156 = vmatpush.bf16.msra.mxu2 %v4559_v56  ;;  %v6806_v53 = vpop.f32.mrf.mxu3  ;;  %3110 = vmatmul.bf16.gmra.mxu3 %v6644_v61 }
 0x172   :  { %3121 = vmatpush.bf16.msra.mxu0 %v4975_v47  ;;  %3173 = vmatpush.bf16.msra.mxu3 %v5099_v21  ;;  %v5969_v47 = vld [vmem:[#allocation3 + $0x4a8] sm:$0xf0]  ;;  %v5954_v21 = vld [vmem:[#allocation3 + $0x430] sm:$0xf0] }
 0x173   :  { %3139 = vmatpush.bf16.msra.mxu1 %v5455_v28  ;;  %v5984_v28 = vld [vmem:[#allocation3 + $0x520] sm:$0xf0]  ;;  %v6811_v62 = vpop.f32.mrf.mxu1  ;;  %v4979_v6 = vor.u32 %v5969_v47, %v4978_v40  ;;  %v3251_v47 = vld [vmem:[#allocation5 + $0x170] sm:$0xff] }
 0x174   :  { %v5039_v46 = vor.u32 %v5984_v28, %v5038_v26  ;;  %v5578_v28 = vld [vmem:[#allocation3 + $0x920] sm:$0xf] }
 0x175   :  { %3157 = vmatpush.bf16.msra.mxu2 %v4499_v22 }
 0x176   :  { %3122 = vmatpush.bf16.msra.mxu0 %v4915_v13  ;;  %v2769_v63 = vpop.f32.mrf.mxu0  ;;  %3174 = vmatpush.bf16.msra.mxu3 %v5039_v46  ;;  %v5638_v13 = vld [vmem:[#allocation3 + $0x998] sm:$0xf] }
 0x177   :  { %3140 = vmatpush.bf16.msra.mxu1 %v5395_v49  ;;  %v3216_v49 = vld [vmem:[#allocation5 + $0x58] sm:$0xff]  ;;  %v6809_v56 = vadd.f32 %v2769_v63, %v6785_v37  ;;  %v3213_v37 = vld [vmem:[#allocation5 + $0x40] sm:$0xff]  ;;  %v3210_v63 = vld [vmem:[#allocation5 + $0x28] sm:$0xff] }
 0x178   :  { %v3252_v46 = vld [vmem:[#allocation5 + $0x178] sm:$0xff] }
 0x179   :  { %7604 = vst [vmem:[#allocation28_spill] sm:$0xff] %v6809_v56  ;;  %3158 = vmatpush.bf16.msra.mxu2 %v4439_v43  ;;  %v3211_v43 = vld [vmem:[#allocation5 + $0x30] sm:$0xff] }
 0x17a   :  { %3187 = vmatpush.bf16.msrb.mxu0 %v5819_v20  ;;  %v4918_v20 = vld [vmem:[#allocation3 + $0x3f8] sm:$0xf]  ;;  %3175 = vmatpush.bf16.msra.mxu3 %v4979_v6  ;;  %v3209_v6 = vld [vmem:[#allocation5 + $0x20] sm:$0xff] }
 0x17b   :  { %3490 = vmatpush.msrb.mxu1 %v3220_v52  ;;  %v6804_v52 = vpop.f32.mrf.mxu2  ;;  %v4919_v24 = vor.u32 %v5954_v21, %v4918_v20  ;;  %v2789_v42 = vpop.f32.mrf.mxu1  ;;  %v5458_v20 = vld [vmem:[#allocation3 + $0x830] sm:$0xf]  ;;  %v6089_v21 = vld [vmem:[#allocation3 + $0x868] sm:$0xf0]  ;;  %3123 = vmatmul.bf16.vlgmr.msra.gmra.mxu0 %v6636_v1 }
 0x17c   :  { %v3206_v42 = vld [vmem:[#allocation5 + $0x8] sm:$0xff]  ;;  %3141 = vmatmul.bf16.vlgmr.msra.gmra.mxu1 %v6638_v2 }
 0x17d   :  { %3491 = vmatpush.msrb.mxu1 %v3219_v14  ;;  %3516 = vmatpush.msrb.mxu2 %v3236_v54  ;;  %v6134_v14 = vld [vmem:[#allocation3 + $0x9d0] sm:$0xf0]  ;;  %v6104_v54 = vld [vmem:[#allocation3 + $0x8e0] sm:$0xf0] }
 0x17e   :  { %3188 = vmatpush.bf16.msrb.mxu0 %v5759_v38  ;;  %v5639_v22 = vor.u32 %v6134_v14, %v5638_v13  ;;  %v2771_v38 = vpop.f32.mrf.mxu0  ;;  %3176 = vmatpush.bf16.msra.mxu3 %v4919_v24  ;;  %v3249_v13 = vld [vmem:[#allocation5 + $0x160] sm:$0xff] }
 0x17f   :  { %3492 = vmatpush.msrb.mxu1 %v3218_v31  ;;  %3517 = vmatpush.msrb.mxu2 %v3235_v3  ;;  %v6119_v31 = vld [vmem:[#allocation3 + $0x958] sm:$0xf0]  ;;  %v5459_v38 = vor.u32 %v6089_v21, %v5458_v20 }
 0x180   :  { %v5579_v40 = vor.u32 %v6119_v31, %v5578_v28  ;;  %v3248_v28 = vld [vmem:[#allocation5 + $0x158] sm:$0xff]  ;;  %3159 = vmatmul.bf16.vlgmr.msra.gmra.mxu2 %v6634_v59  ;;  %v3243_v59 = vld [vmem:[#allocation5 + $0x130] sm:$0xff] }
 0x181   :  { %3493 = vmatpush.msrb.mxu1 %v3217_v35  ;;  %v6819_v35 = vpop.f32.mrf.mxu3  ;;  %3518 = vmatpush.msrb.mxu2 %v3234_v23  ;;  %v3229_v23 = vld [vmem:[#allocation5 + $0xc0] sm:$0xff]  ;;  %v3268_v20 = vld [vmem:[#allocation5 + $0x1f8] sm:$0xff] }
 0x182   :  { %3189 = vmatpush.bf16.msrb.mxu0 %v5699_v0  ;;  %7606 = vst [vmem:[#allocation30_spill] sm:$0xff] %v6819_v35  ;;  %3542 = vmatpush.msrb.mxu3 %v3252_v46  ;;  %v3250_v0 = vld [vmem:[#allocation5 + $0x168] sm:$0xff]  ;;  %v3247_v46 = vld [vmem:[#allocation5 + $0x150] sm:$0xff]  ;;  %v3244_v21 = vld [vmem:[#allocation5 + $0x138] sm:$0xff] }
 0x183   :  { %3494 = vmatpush.msrb.mxu1 %v3216_v49  ;;  %v6815_v26 = vpop.f32.mrf.mxu2  ;;  %3519 = vmatpush.msrb.mxu2 %v3233_v41  ;;  %v5518_v49 = vld [vmem:[#allocation3 + $0x8a8] sm:$0xf]  ;;  %v6823_v31 = vpop.f32.mrf.mxu1  ;;  %v3228_v41 = vld [vmem:[#allocation5 + $0xb8] sm:$0xff] }
 0x184   :  { %7605 = vst [vmem:[#allocation29_spill] sm:$0xff] %v6815_v26  ;;  %3543 = vmatpush.msrb.mxu3 %v3251_v47  ;;  %v5519_v3 = vor.u32 %v6104_v54, %v5518_v49  ;;  %v3246_v47 = vld [vmem:[#allocation5 + $0x148] sm:$0xff]  ;;  %v3205_v49 = vld [vmem:[#allocation5] sm:$0xff] }
 0x185   :  { %3495 = vmatpush.msrb.mxu1 %v3215_v51  ;;  %v3231_v51 = vld [vmem:[#allocation5 + $0xd0] sm:$0xff]  ;;  %3520 = vmatpush.msrb.mxu2 %v3232_v60  ;;  %v5398_v60 = vld [vmem:[#allocation3 + $0x7b8] sm:$0xf]  ;;  %v3362_v26 = vld [vmem:[#allocation5 + $0x4e8] sm:$0xff] }
 0x186   :  { %3190 = vmatpush.bf16.msrb.mxu0 %v5639_v22  ;;  %3544 = vmatpush.msrb.mxu3 %v3250_v0  ;;  %v6821_v24 = vpop.f32.mrf.mxu0 }
 0x187   :  { %3496 = vmatpush.msrb.mxu1 %v3214_v9  ;;  %v3230_v9 = vld [vmem:[#allocation5 + $0xc8] sm:$0xff]  ;;  %3521 = vmatpush.msrb.mxu2 %v3231_v51 }
 0x188   :  { %3545 = vmatpush.msrb.mxu3 %v3249_v13  ;;  %v3226_v51 = vld [vmem:[#allocation5 + $0xa8] sm:$0xff] }
 0x189   :  { %3497 = vmatpush.msrb.mxu1 %v3213_v37  ;;  %v3208_v37 = vld [vmem:[#allocation5 + $0x18] sm:$0xff]  ;;  %v2825_v22 = vpop.f32.mrf.mxu3  ;;  %3522 = vmatpush.msrb.mxu2 %v3230_v9  ;;  %v3245_v9 = vld [vmem:[#allocation5 + $0x140] sm:$0xff] }
 0x18a   :  { %3191 = vmatpush.bf16.msrb.mxu0 %v5579_v40  ;;  %3546 = vmatpush.msrb.mxu3 %v3248_v28  ;;  %v6074_v40 = vld [vmem:[#allocation3 + $0x7f0] sm:$0xf0]  ;;  %v3282_v28 = vld [vmem:[#allocation5 + $0x268] sm:$0xff] }
 0x18b   :  { %3498 = vmatpush.msrb.mxu1 %v3212_v34  ;;  %v2807_v14 = vpop.f32.mrf.mxu2  ;;  %v3207_v34 = vld [vmem:[#allocation5 + $0x10] sm:$0xff]  ;;  %3523 = vmatpush.msrb.mxu2 %v3229_v23  ;;  %v5399_v54 = vor.u32 %v6074_v40, %v5398_v60  ;;  %v6834_v13 = vpop.f32.mrf.mxu1  ;;  %v3224_v23 = vld [vmem:[#allocation5 + $0x98] sm:$0xff]  ;;  %v3241_v40 = vld [vmem:[#allocation5 + $0x120] sm:$0xff] }
 0x18c   :  { %3547 = vmatpush.msrb.mxu3 %v3247_v46  ;;  %v3225_v14 = vld [vmem:[#allocation5 + $0xa0] sm:$0xff]  ;;  %v3267_v22 = vld [vmem:[#allocation5 + $0x1f0] sm:$0xff]  ;;  %3128 = vmatmul.bf16.gmra.mxu0 %v6646_v4 }
 0x18d   :  { %3499 = vmatpush.msrb.mxu1 %v3211_v43  ;;  %v3227_v43 = vld [vmem:[#allocation5 + $0xb0] sm:$0xff]  ;;  %3524 = vmatpush.msrb.mxu2 %v3228_v41  ;;  %v3266_v41 = vld [vmem:[#allocation5 + $0x1e8] sm:$0xff] }
 0x18e   :  { %3192 = vmatpush.bf16.msrb.mxu0 %v5519_v3  ;;  %3548 = vmatpush.msrb.mxu3 %v3246_v47  ;;  %v3284_v3 = vld [vmem:[#allocation5 + $0x278] sm:$0xff] }
 0x18f   :  { %3500 = vmatpush.msrb.mxu1 %v3210_v63  ;;  %3525 = vmatpush.msrb.mxu2 %v3227_v43  ;;  %v3265_v43 = vld [vmem:[#allocation5 + $0x1e0] sm:$0xff]  ;;  %v3280_v47 = vld [vmem:[#allocation5 + $0x258] sm:$0xff] }
 0x190   :  { %3177 = vmatmul.bf16.vlgmr.msra.gmra.mxu3 %v6636_v1  ;;  %v3242_v1 = vld [vmem:[#allocation5 + $0x128] sm:$0xff]  ;;  %3146 = vmatmul.bf16.gmra.mxu1 %v6648_v5 }
 0x191   :  { %3501 = vmatpush.msrb.mxu1 %v3209_v6  ;;  %v6828_v0 = vpop.f32.mrf.mxu3  ;;  %v6830_v6 = vpop.f32.mrf.mxu0  ;;  %3526 = vmatpush.msrb.mxu2 %v3226_v51  ;;  %v3264_v51 = vld [vmem:[#allocation5 + $0x1d8] sm:$0xff] }
 0x192   :  { %3193 = vmatpush.bf16.msrb.mxu0 %v5459_v38  ;;  %3549 = vmatpush.msrb.mxu3 %v3245_v9  ;;  %v3281_v38 = vld [vmem:[#allocation5 + $0x260] sm:$0xff] }
 0x193   :  { %3502 = vmatpush.msrb.mxu1 %v3208_v37  ;;  %v6825_v63 = vpop.f32.mrf.mxu2  ;;  %v3283_v37 = vld [vmem:[#allocation5 + $0x270] sm:$0xff]  ;;  %3527 = vmatpush.msrb.mxu2 %v3225_v14  ;;  %v6843_v9 = vpop.f32.mrf.mxu1 }
 0x194   :  { %3550 = vmatpush.msrb.mxu3 %v3244_v21  ;;  %v3279_v14 = vld [vmem:[#allocation5 + $0x250] sm:$0xff]  ;;  %3164 = vmatmul.bf16.gmra.mxu2 %v6644_v61 }
 0x195   :  { %3503 = vmatpush.msrb.mxu1 %v3207_v34  ;;  %v3223_v34 = vld [vmem:[#allocation5 + $0x90] sm:$0xff]  ;;  %3528 = vmatpush.msrb.mxu2 %v3224_v23  ;;  %v3278_v23 = vld [vmem:[#allocation5 + $0x248] sm:$0xff] }
 0x196   :  { %3194 = vmatpush.bf16.msrb.mxu0 %v5399_v54  ;;  %3551 = vmatpush.msrb.mxu3 %v3243_v59  ;;  %v3221_v54 = vld [vmem:[#allocation5 + $0x80] sm:$0xff]  ;;  %v3263_v21 = vld [vmem:[#allocation5 + $0x1d0] sm:$0xff]  ;;  %v3262_v59 = vld [vmem:[#allocation5 + $0x1c8] sm:$0xff] }
 0x197   :  { %3504 = vmatpush.msrb.mxu1 %v3206_v42  ;;  %v3222_v42 = vld [vmem:[#allocation5 + $0x88] sm:$0xff]  ;;  %3529 = vmatpush.msrb.mxu2 %v3223_v34  ;;  %v3277_v34 = vld [vmem:[#allocation5 + $0x240] sm:$0xff] }
 0x198   :  { %3552 = vmatpush.msrb.mxu3 %v3242_v1 }
 0x199   :  { %3505 = vmatpush.msrb.mxu1 %v3205_v49  ;;  %v6839_v60 = vpop.f32.mrf.mxu3  ;;  %v6841_v49 = vpop.f32.mrf.mxu0  ;;  %3530 = vmatpush.msrb.mxu2 %v3222_v42 }
 0x19a   :  { %3568 = vmatpush.msra.mxu0 %v3268_v20  ;;  %3553 = vmatpush.msrb.mxu3 %v3241_v40  ;;  %v3300_v20 = vld [vmem:[#allocation5 + $0x2f8] sm:$0xff] }
 0x19b   :  { %3594 = vmatpush.msra.mxu1 %v3284_v3  ;;  %v6837_v46 = vpop.f32.mrf.mxu2  ;;  %v3240_v3 = vld [vmem:[#allocation5 + $0x118] sm:$0xff]  ;;  %3531 = vmatpush.msrb.mxu2 %v3221_v54  ;;  %v2861_v40 = vpop.f32.mrf.mxu1 }
 0x19c   :  { %3569 = vmatpush.msra.mxu0 %v3267_v22  ;;  %3554 = vmatpush.msrb.mxu3 %v3240_v3  ;;  %v3299_v22 = vld [vmem:[#allocation5 + $0x2f0] sm:$0xff]  ;;  %v3276_v54 = vld [vmem:[#allocation5 + $0x238] sm:$0xff]  ;;  %v3257_v40 = vld [vmem:[#allocation5 + $0x1a0] sm:$0xff] }
 0x19d   :  { %3595 = vmatpush.msra.mxu1 %v3283_v37  ;;  %v3239_v37 = vld [vmem:[#allocation5 + $0x110] sm:$0xff]  ;;  %3620 = vmatpush.msra.mxu2 %v3300_v20  ;;  %v3260_v3 = vld [vmem:[#allocation5 + $0x1b8] sm:$0xff] }
 0x19e   :  { %3570 = vmatpush.msra.mxu0 %v3266_v41  ;;  %3555 = vmatpush.msrb.mxu3 %v3239_v37  ;;  %v3298_v41 = vld [vmem:[#allocation5 + $0x2e8] sm:$0xff]  ;;  %v3275_v20 = vld [vmem:[#allocation5 + $0x230] sm:$0xff] }
 0x19f   :  { %3596 = vmatpush.msra.mxu1 %v3282_v28  ;;  %v3238_v28 = vld [vmem:[#allocation5 + $0x108] sm:$0xff]  ;;  %3621 = vmatpush.msra.mxu2 %v3299_v22  ;;  %v3259_v37 = vld [vmem:[#allocation5 + $0x1b0] sm:$0xff] }
 0x1a0   :  { %3571 = vmatpush.msra.mxu0 %v3265_v43  ;;  %3556 = vmatpush.msrb.mxu3 %v3238_v28  ;;  %v3261_v43 = vld [vmem:[#allocation5 + $0x1c0] sm:$0xff]  ;;  %v3274_v22 = vld [vmem:[#allocation5 + $0x228] sm:$0xff] }
 0x1a1   :  { %3597 = vmatpush.msra.mxu1 %v3281_v38  ;;  %v6847_v38 = vpop.f32.mrf.mxu3  ;;  %v2843_v42 = vpop.f32.mrf.mxu0  ;;  %3622 = vmatpush.msra.mxu2 %v3298_v41  ;;  %v3258_v28 = vld [vmem:[#allocation5 + $0x1a8] sm:$0xff] }
 0x1a2   :  { %3572 = vmatpush.msra.mxu0 %v3264_v51  ;;  %v3297_v51 = vld [vmem:[#allocation5 + $0x2e0] sm:$0xff]  ;;  %3182 = vmatmul.bf16.gmra.mxu3 %v6646_v4 }
 0x1a3   :  { %3598 = vmatpush.msra.mxu1 %v3280_v47  ;;  %v6845_v1 = vpop.f32.mrf.mxu2  ;;  %v3237_v47 = vld [vmem:[#allocation5 + $0x100] sm:$0xff]  ;;  %3623 = vmatpush.msra.mxu2 %v3297_v51  ;;  %v3272_v51 = vld [vmem:[#allocation5 + $0x218] sm:$0xff] }
 0x1a4   :  { %3573 = vmatpush.msra.mxu0 %v3263_v21  ;;  %3557 = vmatpush.msrb.mxu3 %v3237_v47  ;;  %v3296_v21 = vld [vmem:[#allocation5 + $0x2d8] sm:$0xff]  ;;  %v3273_v4 = vld [vmem:[#allocation5 + $0x220] sm:$0xff]  ;;  %v6855_v47 = vpop.f32.mrf.mxu1 }
 0x1a5   :  { %3599 = vmatpush.msra.mxu1 %v3279_v14  ;;  %v3316_v14 = vld [vmem:[#allocation5 + $0x378] sm:$0xff]  ;;  %3624 = vmatpush.msra.mxu2 %v3296_v21  ;;  %v3271_v21 = vld [vmem:[#allocation5 + $0x210] sm:$0xff] }
 0x1a6   :  { %3574 = vmatpush.msra.mxu0 %v3262_v59  ;;  %3646 = vmatpush.msra.mxu3 %v3316_v14  ;;  %v3295_v59 = vld [vmem:[#allocation5 + $0x2d0] sm:$0xff]  ;;  %v3256_v14 = vld [vmem:[#allocation5 + $0x198] sm:$0xff] }
 0x1a7   :  { %3600 = vmatpush.msra.mxu1 %v3278_v23  ;;  %v3315_v23 = vld [vmem:[#allocation5 + $0x370] sm:$0xff]  ;;  %3625 = vmatpush.msra.mxu2 %v3295_v59 }
 0x1a8   :  { %3575 = vmatpush.msra.mxu0 %v3261_v43  ;;  %3647 = vmatpush.msra.mxu3 %v3315_v23  ;;  %v3294_v43 = vld [vmem:[#allocation5 + $0x2c8] sm:$0xff]  ;;  %v3255_v23 = vld [vmem:[#allocation5 + $0x190] sm:$0xff] }
 0x1a9   :  { %3601 = vmatpush.msra.mxu1 %v3277_v34  ;;  %v3314_v34 = vld [vmem:[#allocation5 + $0x368] sm:$0xff]  ;;  %v2897_v41 = vpop.f32.mrf.mxu3  ;;  %v6853_v42 = vpop.f32.mrf.mxu0  ;;  %3626 = vmatpush.msra.mxu2 %v3294_v43  ;;  %v3291_v59 = vld [vmem:[#allocation5 + $0x2b0] sm:$0xff] }
 0x1aa   :  { %3576 = vmatpush.msra.mxu0 %v3260_v3  ;;  %3648 = vmatpush.msra.mxu3 %v3314_v34  ;;  %v3293_v3 = vld [vmem:[#allocation5 + $0x2c0] sm:$0xff] }
 0x1ab   :  { %3602 = vmatpush.msra.mxu1 %v3276_v54  ;;  %v2879_v61 = vpop.f32.mrf.mxu2  ;;  %v3313_v54 = vld [vmem:[#allocation5 + $0x360] sm:$0xff]  ;;  %3627 = vmatpush.msra.mxu2 %v3293_v3  ;;  %v3445_v3 = vmul.f32 %v6682_v45, %v6682_v45 }
 0x1ac   :  { %3577 = vmatpush.msra.mxu0 %v3259_v37  ;;  %3649 = vmatpush.msra.mxu3 %v3313_v54  ;;  %v3292_v37 = vld [vmem:[#allocation5 + $0x2b8] sm:$0xff]  ;;  %v3270_v61 = vld [vmem:[#allocation5 + $0x208] sm:$0xff]  ;;  %v3269_v41 = vld [vmem:[#allocation5 + $0x200] sm:$0xff] }
 0x1ad   :  { %3603 = vmatpush.msra.mxu1 %v3275_v20  ;;  %v3312_v20 = vld [vmem:[#allocation5 + $0x358] sm:$0xff]  ;;  %3628 = vmatpush.msra.mxu2 %v3292_v37  ;;  %v3290_v54 = vld [vmem:[#allocation5 + $0x2a8] sm:$0xff]  ;;  %v3309_v37 = vld [vmem:[#allocation5 + $0x340] sm:$0xff] }
 0x1ae   :  { %3578 = vmatpush.msra.mxu0 %v3258_v28  ;;  %3650 = vmatpush.msra.mxu3 %v3312_v20  ;;  %v3254_v28 = vld [vmem:[#allocation5 + $0x188] sm:$0xff]  ;;  %v3253_v20 = vld [vmem:[#allocation5 + $0x180] sm:$0xff] }
 0x1af   :  { %3604 = vmatpush.msra.mxu1 %v3274_v22  ;;  %v3311_v22 = vld [vmem:[#allocation5 + $0x350] sm:$0xff]  ;;  %3629 = vmatpush.msra.mxu2 %v3291_v59  ;;  %v3308_v59 = vld [vmem:[#allocation5 + $0x338] sm:$0xff] }
 0x1b0   :  { %3579 = vmatpush.msra.mxu0 %v3257_v40  ;;  %3651 = vmatpush.msra.mxu3 %v3311_v22  ;;  %v3289_v22 = vld [vmem:[#allocation5 + $0x2a0] sm:$0xff] }
 0x1b1   :  { %3605 = vmatpush.msra.mxu1 %v3273_v4  ;;  %v3310_v4 = vld [vmem:[#allocation5 + $0x348] sm:$0xff]  ;;  %v6859_v43 = vpop.f32.mrf.mxu3  ;;  %v6861_v40 = vpop.f32.mrf.mxu0  ;;  %3630 = vmatpush.msra.mxu2 %v3290_v54  ;;  %v3307_v54 = vld [vmem:[#allocation5 + $0x330] sm:$0xff] }
 0x1b2   :  { %3580 = vmatpush.msra.mxu0 %v3256_v14  ;;  %v3446_v14 = vmul.f32 %v6699_v36, %v6699_v36  ;;  %3652 = vmatpush.msra.mxu3 %v3310_v4  ;;  %v3288_v4 = vld [vmem:[#allocation5 + $0x298] sm:$0xff] }
 0x1b3   :  { %3606 = vmatpush.msra.mxu1 %v3272_v51  ;;  %v6857_v34 = vpop.f32.mrf.mxu2  ;;  %v6863_v51 = vpop.f32.mrf.mxu1  ;;  %3195 = vmatmul.bf16.vlgmr.msrb.gmra.mxu0 %v6638_v2  ;;  %v3346_v2 = vld [vmem:[#allocation5 + $0x468] sm:$0xff]  ;;  %v3344_v36 = vld [vmem:[#allocation5 + $0x458] sm:$0xff] }
 0x1b4   :  { %3581 = vmatpush.msra.mxu0 %v3255_v23  ;;  %v3348_v23 = vld [vmem:[#allocation5 + $0x478] sm:$0xff]  ;;  %3506 = vmatmul.f32.vlgmr.msrb.gmra.mxu1 %v3445_v3  ;;  %v3287_v3 = vld [vmem:[#allocation5 + $0x290] sm:$0xff] }
 0x1b5   :  { %3607 = vmatpush.msra.mxu1 %v3271_v21  ;;  %v3447_v21 = vmul.f32 %v6722_v55, %v6722_v55  ;;  %3532 = vmatmul.f32.vlgmr.msrb.gmra.mxu2 %v3446_v14  ;;  %v3330_v14 = vld [vmem:[#allocation5 + $0x3e8] sm:$0xff] }
 0x1b6   :  { %3582 = vmatpush.msra.mxu0 %v3254_v28  ;;  %v3347_v28 = vld [vmem:[#allocation5 + $0x470] sm:$0xff]  ;;  %3653 = vmatpush.msra.mxu3 %v3309_v37  ;;  %v3306_v37 = vld [vmem:[#allocation5 + $0x328] sm:$0xff] }
 0x1b7   :  { %3608 = vmatpush.msra.mxu1 %v3270_v61  ;;  %v3332_v61 = vld [vmem:[#allocation5 + $0x3f8] sm:$0xff]  ;;  %3558 = vmatmul.f32.vlgmr.msrb.gmra.mxu3 %v3447_v21 }
 0x1b8   :  { %3583 = vmatpush.msra.mxu0 %v3253_v20  ;;  %3631 = vmatpush.msra.mxu2 %v3289_v22  ;;  %v3286_v22 = vld [vmem:[#allocation5 + $0x288] sm:$0xff] }
 0x1b9   :  { %3609 = vmatpush.msra.mxu1 %v3269_v41  ;;  %v3331_v41 = vld [vmem:[#allocation5 + $0x3f0] sm:$0xff]  ;;  %v6874_v55 = vpop.f32.mrf.mxu3  ;;  %3654 = vmatpush.msra.mxu3 %v3308_v59  ;;  %v6876_v21 = vpop.f32.mrf.mxu0  ;;  %v3460_v59 = vmul.f32 %v6686_v15, %v6686_v15  ;;  %v3364_v15 = vld [vmem:[#allocation5 + $0x4f8] sm:$0xff] }
 0x1ba   :  { %3672 = vmatpush.msrb.mxu0 %v3332_v61  ;;  %3632 = vmatpush.msra.mxu2 %v3288_v4  ;;  %v3329_v61 = vld [vmem:[#allocation5 + $0x3e0] sm:$0xff]  ;;  %v3462_v4 = vmul.f32 %v6729_v29, %v6729_v29  ;;  %v3342_v29 = vld [vmem:[#allocation5 + $0x448] sm:$0xff] }
 0x1bb   :  { %3698 = vmatpush.msrb.mxu1 %v3348_v23  ;;  %v6872_v45 = vpop.f32.mrf.mxu2  ;;  %v6878_v20 = vpop.f32.mrf.mxu1  ;;  %v3345_v23 = vld [vmem:[#allocation5 + $0x460] sm:$0xff]  ;;  %3655 = vmatpush.msra.mxu3 %v3307_v54 }
 0x1bc   :  { %3673 = vmatpush.msrb.mxu0 %v3331_v41  ;;  %3633 = vmatpush.msra.mxu2 %v3287_v3  ;;  %v3305_v41 = vld [vmem:[#allocation5 + $0x320] sm:$0xff]  ;;  %v3343_v3 = vld [vmem:[#allocation5 + $0x450] sm:$0xff] }
 0x1bd   :  { %3699 = vmatpush.msrb.mxu1 %v3347_v28  ;;  %v3461_v28 = vmul.f32 %v6708_v12, %v6708_v12  ;;  %3656 = vmatpush.msra.mxu3 %v3306_v37  ;;  %v3285_v54 = vld [vmem:[#allocation5 + $0x280] sm:$0xff]  ;;  %v3302_v12 = vld [vmem:[#allocation5 + $0x308] sm:$0xff] }
 0x1be   :  { %3674 = vmatpush.msrb.mxu0 %v3330_v14  ;;  %3634 = vmatpush.msra.mxu2 %v3286_v22  ;;  %v3304_v14 = vld [vmem:[#allocation5 + $0x318] sm:$0xff] }
 0x1bf   :  { %3700 = vmatpush.msrb.mxu1 %v3346_v2  ;;  %3535 = vmatmul.f32.gmra.mxu2 %v3461_v28  ;;  %v3328_v2 = vld [vmem:[#allocation5 + $0x3d8] sm:$0xff]  ;;  %v3363_v28 = vld [vmem:[#allocation5 + $0x4f0] sm:$0xff] }
 0x1c0   :  { %3675 = vmatpush.msrb.mxu0 %v3329_v61  ;;  %3509 = vmatmul.f32.gmra.mxu1 %v3460_v59  ;;  %v3303_v59 = vld [vmem:[#allocation5 + $0x310] sm:$0xff] }
 0x1c1   :  { %3701 = vmatpush.msrb.mxu1 %v3345_v23  ;;  %3561 = vmatmul.f32.gmra.mxu3 %v3462_v4  ;;  %v6888_v37 = vpop.f32.mrf.mxu3  ;;  %v3327_v23 = vld [vmem:[#allocation5 + $0x3d0] sm:$0xff]  ;;  %v2915_v22 = vpop.f32.mrf.mxu0  ;;  %v3326_v4 = vld [vmem:[#allocation5 + $0x3c8] sm:$0xff] }
 0x1c2   :  { %3657 = vmatpush.msra.mxu3 %v3305_v41  ;;  %3635 = vmatpush.msra.mxu2 %v3285_v54  ;;  %v3325_v41 = vld [vmem:[#allocation5 + $0x3c0] sm:$0xff]  ;;  %v3475_v54 = vmul.f32 %v6694_v50, %v6694_v50  ;;  %v3355_v50 = vld [vmem:[#allocation5 + $0x4b0] sm:$0xff] }
 0x1c3   :  { %3702 = vmatpush.msrb.mxu1 %v3344_v36  ;;  %v6886_v35 = vpop.f32.mrf.mxu2  ;;  %v2933_v61 = vpop.f32.mrf.mxu1  ;;  %3676 = vmatpush.msrb.mxu0 %v3328_v2  ;;  %v3341_v36 = vld [vmem:[#allocation5 + $0x440] sm:$0xff]  ;;  %v3476_v2 = vmul.f32 %v6713_v48, %v6713_v48 }
 0x1c4   :  { %3658 = vmatpush.msra.mxu3 %v3304_v14  ;;  %3724 = vmatpush.msrb.mxu2 %v3364_v15  ;;  %v3340_v15 = vld [vmem:[#allocation5 + $0x438] sm:$0xff]  ;;  %v3361_v14 = vld [vmem:[#allocation5 + $0x4e0] sm:$0xff] }
 0x1c5   :  { %3703 = vmatpush.msrb.mxu1 %v3343_v3  ;;  %3677 = vmatpush.msrb.mxu0 %v3327_v23  ;;  %v3477_v3 = vmul.f32 %v6734_v10, %v6734_v10  ;;  %v3324_v61 = vld [vmem:[#allocation5 + $0x3b8] sm:$0xff]  ;;  %v3358_v10 = vld [vmem:[#allocation5 + $0x4c8] sm:$0xff] }
 0x1c6   :  { %3659 = vmatpush.msra.mxu3 %v3303_v59  ;;  %3725 = vmatpush.msrb.mxu2 %v3363_v28  ;;  %v3380_v59 = vld [vmem:[#allocation5 + $0x578] sm:$0xff] }
 0x1c7   :  { %3704 = vmatpush.msrb.mxu1 %v3342_v29  ;;  %3678 = vmatpush.msrb.mxu0 %v3326_v4  ;;  %v3301_v29 = vld [vmem:[#allocation5 + $0x300] sm:$0xff] }
 0x1c8   :  { %3660 = vmatpush.msra.mxu3 %v3302_v12  ;;  %3726 = vmatpush.msrb.mxu2 %v3362_v26  ;;  %v3339_v12 = vld [vmem:[#allocation5 + $0x430] sm:$0xff]  ;;  %v3360_v26 = vld [vmem:[#allocation5 + $0x4d8] sm:$0xff] }
 0x1c9   :  { %3705 = vmatpush.msrb.mxu1 %v3341_v36  ;;  %3679 = vmatpush.msrb.mxu0 %v3325_v41  ;;  %v2969_v22 = vpop.f32.mrf.mxu3  ;;  %v6897_v28 = vpop.f32.mrf.mxu0  ;;  %v3323_v36 = vld [vmem:[#allocation5 + $0x3b0] sm:$0xff] }
 0x1ca   :  { %3512 = vmatmul.f32.gmra.mxu1 %v3475_v54  ;;  %3200 = vmatmul.bf16.gmra.mxu0 %v6648_v5  ;;  %v3379_v41 = vld [vmem:[#allocation5 + $0x570] sm:$0xff]  ;;  %v3338_v54 = vld [vmem:[#allocation5 + $0x428] sm:$0xff]  ;;  %v3337_v22 = vld [vmem:[#allocation5 + $0x420] sm:$0xff] }
 0x1cb   :  { %v2951_v23 = vpop.f32.mrf.mxu2  ;;  %3538 = vmatmul.f32.gmra.mxu2 %v3476_v2  ;;  %v6899_v4 = vpop.f32.mrf.mxu1  ;;  %3564 = vmatmul.f32.gmra.mxu3 %v3477_v3  ;;  %v3322_v5 = vld [vmem:[#allocation5 + $0x3a8] sm:$0xff]  ;;  %v3377_v3 = vld [vmem:[#allocation5 + $0x560] sm:$0xff] }
 0x1cc   :  { %3706 = vmatpush.msrb.mxu1 %v3340_v15  ;;  %3661 = vmatpush.msra.mxu3 %v3301_v29  ;;  %v3359_v23 = vld [vmem:[#allocation5 + $0x4d0] sm:$0xff]  ;;  %v3378_v2 = vld [vmem:[#allocation5 + $0x568] sm:$0xff]  ;;  %v3321_v15 = vld [vmem:[#allocation5 + $0x3a0] sm:$0xff] }
 0x1cd   :  { %3727 = vmatpush.msrb.mxu2 %v3361_v14  ;;  %3680 = vmatpush.msrb.mxu0 %v3324_v61  ;;  %v3449_v61 = vmul.f32 %v6748_v58, %v6748_v58  ;;  %v3375_v58 = vld [vmem:[#allocation5 + $0x550] sm:$0xff] }
 0x1ce   :  { %3750 = vmatpush.msrb.mxu3 %v3380_v59  ;;  %3707 = vmatpush.msrb.mxu1 %v3339_v12  ;;  %v3450_v59 = vmul.f32 %v6765_v30, %v6765_v30  ;;  %v3336_v12 = vld [vmem:[#allocation5 + $0x418] sm:$0xff]  ;;  %v3334_v30 = vld [vmem:[#allocation5 + $0x408] sm:$0xff] }
 0x1cf   :  { %3728 = vmatpush.msrb.mxu2 %v3360_v26  ;;  %3681 = vmatpush.msrb.mxu0 %v3323_v36 }
 0x1d0   :  { %3751 = vmatpush.msrb.mxu3 %v3379_v41  ;;  %3708 = vmatpush.msrb.mxu1 %v3338_v54  ;;  %v3451_v41 = vmul.f32 %v6790_v32, %v6790_v32  ;;  %v3357_v54 = vld [vmem:[#allocation5 + $0x4c0] sm:$0xff]  ;;  %v3318_v32 = vld [vmem:[#allocation5 + $0x388] sm:$0xff] }
 0x1d1   :  { %3729 = vmatpush.msrb.mxu2 %v3359_v23  ;;  %3682 = vmatpush.msrb.mxu0 %v3322_v5  ;;  %v6903_v14 = vpop.f32.mrf.mxu3  ;;  %v6909_v26 = vpop.f32.mrf.mxu0  ;;  %v3320_v23 = vld [vmem:[#allocation5 + $0x398] sm:$0xff] }
 0x1d2   :  { %3752 = vmatpush.msrb.mxu3 %v3378_v2  ;;  %3709 = vmatpush.msrb.mxu1 %v3337_v22  ;;  %v3376_v5 = vld [vmem:[#allocation5 + $0x558] sm:$0xff]  ;;  %v3335_v2 = vld [vmem:[#allocation5 + $0x410] sm:$0xff] }
 0x1d3   :  { %v6901_v29 = vpop.f32.mrf.mxu2  ;;  %3730 = vmatpush.msrb.mxu2 %v3358_v10  ;;  %v6911_v36 = vpop.f32.mrf.mxu1  ;;  %3683 = vmatpush.msrb.mxu0 %v3321_v15  ;;  %v3356_v22 = vld [vmem:[#allocation5 + $0x4b8] sm:$0xff]  ;;  %v3319_v10 = vld [vmem:[#allocation5 + $0x390] sm:$0xff]  ;;  %v3374_v15 = vld [vmem:[#allocation5 + $0x548] sm:$0xff] }
 0x1d4   :  { %3753 = vmatpush.msrb.mxu3 %v3377_v3  ;;  %3610 = vmatmul.f32.vlgmr.msra.gmra.mxu1 %v3449_v61  ;;  %v3333_v3 = vld [vmem:[#allocation5 + $0x400] sm:$0xff]  ;;  %v6917_v61 = vadd.f32 %v6800_v17, %v6776_v44  ;;  %v3396_v17 = vld [vmem:[#allocation5 + $0x5f8] sm:$0xff] }
 0x1d5   :  { %3636 = vmatmul.f32.vlgmr.msra.gmra.mxu2 %v3450_v59  ;;  %3662 = vmatmul.f32.vlgmr.msra.gmra.mxu3 %v3451_v41  ;;  %v3354_v59 = vld [vmem:[#allocation5 + $0x4a8] sm:$0xff] }
 0x1d6   :  { %3710 = vmatpush.msrb.mxu1 %v3336_v12  ;;  %3731 = vmatpush.msrb.mxu2 %v3357_v54  ;;  %7607 = vst [vmem:[#allocation31_spill] sm:$0xff] %v6917_v61  ;;  %v3317_v12 = vld [vmem:[#allocation5 + $0x380] sm:$0xff]  ;;  %v3466_v44 = vmul.f32 %v6917_v61, %v6917_v61  ;;  %v3394_v61 = vld [vmem:[#allocation5 + $0x5e8] sm:$0xff] }
 0x1d7   :  { %3684 = vmatpush.msrb.mxu0 %v3320_v23  ;;  %3754 = vmatpush.msrb.mxu3 %v3376_v5  ;;  %v3373_v23 = vld [vmem:[#allocation5 + $0x540] sm:$0xff]  ;;  %v3412_v5 = vld [vmem:[#allocation5 + $0x678] sm:$0xff] }
 0x1d8   :  { %3711 = vmatpush.msrb.mxu1 %v3335_v2  ;;  %3732 = vmatpush.msrb.mxu2 %v3356_v22 }
 0x1d9   :  { %3685 = vmatpush.msrb.mxu0 %v3319_v10  ;;  %3755 = vmatpush.msrb.mxu3 %v3375_v58  ;;  %v6921_v54 = vpop.f32.mrf.mxu3  ;;  %v6923_v2 = vpop.f32.mrf.mxu0  ;;  %v3448_v58 = vmul.f32 %v6731_v33, %v6731_v33  ;;  %v3372_v10 = vld [vmem:[#allocation5 + $0x538] sm:$0xff]  ;;  %v3395_v33 = vld [vmem:[#allocation5 + $0x5f0] sm:$0xff] }
 0x1da   :  { %3712 = vmatpush.msrb.mxu1 %v3334_v30  ;;  %3733 = vmatpush.msrb.mxu2 %v3355_v50  ;;  %v3464_v30 = vmul.f32 %v6752_v39, %v6752_v39  ;;  %v3465_v50 = vmul.f32 %v6774_v16, %v6774_v16  ;;  %v3351_v39 = vld [vmem:[#allocation5 + $0x490] sm:$0xff] }
 0x1db   :  { %v6919_v41 = vpop.f32.mrf.mxu2  ;;  %3686 = vmatpush.msrb.mxu0 %v3318_v32  ;;  %3756 = vmatpush.msrb.mxu3 %v3374_v15  ;;  %v6925_v22 = vpop.f32.mrf.mxu1  ;;  %v3353_v32 = vld [vmem:[#allocation5 + $0x4a0] sm:$0xff]  ;;  %v3411_v15 = vld [vmem:[#allocation5 + $0x670] sm:$0xff] }
 0x1dc   :  { %3713 = vmatpush.msrb.mxu1 %v3333_v3  ;;  %3734 = vmatpush.msrb.mxu2 %v3354_v59  ;;  %v3352_v3 = vld [vmem:[#allocation5 + $0x498] sm:$0xff]  ;;  %v3371_v59 = vld [vmem:[#allocation5 + $0x530] sm:$0xff] }
 0x1dd   :  { %3687 = vmatpush.msrb.mxu0 %v3317_v12  ;;  %3757 = vmatpush.msrb.mxu3 %v3373_v23  ;;  %v3410_v12 = vld [vmem:[#allocation5 + $0x668] sm:$0xff] }
 0x1de   :  { %3802 = vmatpush.msra.mxu1 %v3412_v5  ;;  %3584 = vmatmul.f32.vlgmr.msra.gmra.mxu0 %v3448_v58  ;;  %v3370_v5 = vld [vmem:[#allocation5 + $0x528] sm:$0xff]  ;;  %v3409_v58 = vld [vmem:[#allocation5 + $0x660] sm:$0xff] }
 0x1df   :  { %3613 = vmatmul.f32.gmra.mxu1 %v3464_v30  ;;  %3639 = vmatmul.f32.gmra.mxu2 %v3465_v50 }
 0x1e0   :  { %3665 = vmatmul.f32.gmra.mxu3 %v3466_v44  ;;  %3735 = vmatpush.msrb.mxu2 %v3353_v32  ;;  %v3350_v44 = vld [vmem:[#allocation5 + $0x488] sm:$0xff]  ;;  %v3393_v32 = vld [vmem:[#allocation5 + $0x5e0] sm:$0xff] }
 0x1e1   :  { %3776 = vmatpush.msra.mxu0 %v3396_v17  ;;  %3758 = vmatpush.msrb.mxu3 %v3372_v10  ;;  %v6937_v30 = vpop.f32.mrf.mxu3  ;;  %v2987_v50 = vpop.f32.mrf.mxu0  ;;  %v3369_v10 = vld [vmem:[#allocation5 + $0x520] sm:$0xff] }
 0x1e2   :  { %3803 = vmatpush.msra.mxu1 %v3411_v15  ;;  %3736 = vmatpush.msrb.mxu2 %v3352_v3  ;;  %v3408_v15 = vld [vmem:[#allocation5 + $0x658] sm:$0xff]  ;;  %v3463_v3 = vmul.f32 %v6736_v18, %v6736_v18  ;;  %v2909_v50 = vadd.f32 %v6853_v42, %v6828_v0  ;;  %v2963_v18 = vadd.f32 %v6859_v43, %v6857_v34  ;;  %v3390_v0 = vld [vmem:[#allocation5 + $0x5c8] sm:$0xff]  ;;  %v3405_v34 = vld [vmem:[#allocation5 + $0x640] sm:$0xff] }
 0x1e3   :  { %v6935_v23 = vpop.f32.mrf.mxu2  ;;  %3777 = vmatpush.msra.mxu0 %v3395_v33  ;;  %3759 = vmatpush.msrb.mxu3 %v3371_v59  ;;  %v3005_v17 = vpop.f32.mrf.mxu1  ;;  %v3479_v33 = vmul.f32 %v6760_v25, %v6760_v25  ;;  %v3480_v59 = vmul.f32 %v6779_v11, %v6779_v11 }
 0x1e4   :  { %3804 = vmatpush.msra.mxu1 %v3410_v12  ;;  %3737 = vmatpush.msrb.mxu2 %v3351_v39  ;;  %v3481_v12 = vmul.f32 %v6809_v56, %v6809_v56  ;;  %v3349_v39 = vld [vmem:[#allocation5 + $0x480] sm:$0xff] }
 0x1e5   :  { %3778 = vmatpush.msra.mxu0 %v3394_v61  ;;  %3760 = vmatpush.msrb.mxu3 %v3370_v5  ;;  %v3392_v61 = vld [vmem:[#allocation5 + $0x5d8] sm:$0xff] }
 0x1e6   :  { %3805 = vmatpush.msra.mxu1 %v3409_v58  ;;  %3738 = vmatpush.msrb.mxu2 %v3350_v44  ;;  %v3368_v5 = vld [vmem:[#allocation5 + $0x518] sm:$0xff]  ;;  %v3407_v58 = vld [vmem:[#allocation5 + $0x650] sm:$0xff] }
 0x1e7   :  { %3779 = vmatpush.msra.mxu0 %v3393_v32  ;;  %3761 = vmatpush.msrb.mxu3 %v3369_v10  ;;  %v3428_v44 = vld [vmem:[#allocation5 + $0x6f8] sm:$0xff]  ;;  %v3391_v32 = vld [vmem:[#allocation5 + $0x5d0] sm:$0xff] }
 0x1e8   :  { %3806 = vmatpush.msra.mxu1 %v3408_v15  ;;  %3587 = vmatmul.f32.gmra.mxu0 %v3463_v3  ;;  %v3367_v10 = vld [vmem:[#allocation5 + $0x510] sm:$0xff]  ;;  %v3406_v15 = vld [vmem:[#allocation5 + $0x648] sm:$0xff]  ;;  %v2855_v3 = vadd.f32 %v6823_v31, %v6821_v24  ;;  %v3389_v31 = vld [vmem:[#allocation5 + $0x5c0] sm:$0xff] }
 0x1e9   :  { %3616 = vmatmul.f32.gmra.mxu1 %v3479_v33  ;;  %3642 = vmatmul.f32.gmra.mxu2 %v3480_v59  ;;  %v3041_v56 = vpop.f32.mrf.mxu3  ;;  %v3427_v33 = vld [vmem:[#allocation5 + $0x6f0] sm:$0xff]  ;;  %v6953_v42 = vpop.f32.mrf.mxu0  ;;  %v3426_v24 = vld [vmem:[#allocation5 + $0x6e8] sm:$0xff] }
 0x1ea   :  { %3668 = vmatmul.f32.gmra.mxu3 %v3481_v12  ;;  %3739 = vmatpush.msrb.mxu2 %v3349_v39  ;;  %v3366_v12 = vld [vmem:[#allocation5 + $0x508] sm:$0xff]  ;;  %v6958_v43 = vadd.f32 %v6825_v63, %v2855_v3  ;;  %v6961_v56 = vadd.f32 %v6855_v47, %v2909_v50  ;;  %v6964_v39 = vadd.f32 %v6897_v28, %v2963_v18  ;;  %v3388_v18 = vld [vmem:[#allocation5 + $0x5b8] sm:$0xff] }
 0x1eb   :  { %v3023_v17 = vpop.f32.mrf.mxu2  ;;  %3780 = vmatpush.msra.mxu0 %v3392_v61  ;;  %3762 = vmatpush.msrb.mxu3 %v3368_v5  ;;  %v6955_v59 = vpop.f32.mrf.mxu1  ;;  %v3365_v61 = vld [vmem:[#allocation5 + $0x500] sm:$0xff]  ;;  %v3404_v5 = vld [vmem:[#allocation5 + $0x638] sm:$0xff]  ;;  %v3478_v63 = vmul.f32 %v6742_v57, %v6742_v57  ;;  %v2801_v28 = vadd.f32 %v6796_v7, %v6787_v27  ;;  %v2911_v3 = vadd.f32 %v6861_v40, %v6839_v60  ;;  %v3386_v60 = vld [vmem:[#allocation5 + $0x5a8] sm:$0xff] }
 0x1ec   :  { %3807 = vmatpush.msra.mxu1 %v3407_v58  ;;  %3828 = vmatpush.msra.mxu2 %v3428_v44  ;;  %v3425_v58 = vld [vmem:[#allocation5 + $0x6e0] sm:$0xff]  ;;  %v3453_v47 = vmul.f32 %v6958_v43, %v6958_v43  ;;  %v3454_v50 = vmul.f32 %v6961_v56, %v6961_v56  ;;  %v3455_v44 = vmul.f32 %v6964_v39, %v6964_v39  ;;  %v3424_v17 = vld [vmem:[#allocation5 + $0x6d8] sm:$0xff]  ;;  %v3443_v40 = vld [vmem:[#allocation5 + $0x770] sm:$0xff] }
 0x1ed   :  { %3781 = vmatpush.msra.mxu0 %v3391_v32  ;;  %3763 = vmatpush.msrb.mxu3 %v3367_v10  ;;  %v3403_v32 = vld [vmem:[#allocation5 + $0x630] sm:$0xff]  ;;  %v3444_v7 = vld [vmem:[#allocation5 + $0x778] sm:$0xff] }
 0x1ee   :  { %3808 = vmatpush.msra.mxu1 %v3406_v15  ;;  %3829 = vmatpush.msra.mxu2 %v3427_v33  ;;  %v3387_v33 = vld [vmem:[#allocation5 + $0x5b0] sm:$0xff] }
 0x1ef   :  { %3782 = vmatpush.msra.mxu0 %v3390_v0  ;;  %3764 = vmatpush.msrb.mxu3 %v3366_v12  ;;  %v2857_v12 = vadd.f32 %v6834_v13, %v6830_v6  ;;  %v3422_v6 = vld [vmem:[#allocation5 + $0x6c8] sm:$0xff]  ;;  %v6997_v13 = vadd.f32 %v6863_v51, %v2911_v3  ;;  %v2860_v3 = vadd.f32 %v6843_v9, %v6841_v49 }
 0x1f0   :  { %3809 = vmatpush.msra.mxu1 %v3405_v34  ;;  %3830 = vmatpush.msra.mxu2 %v3426_v24  ;;  %v3402_v34 = vld [vmem:[#allocation5 + $0x628] sm:$0xff]  ;;  %v3423_v24 = vld [vmem:[#allocation5 + $0x6d0] sm:$0xff] }
 0x1f1   :  { %3783 = vmatpush.msra.mxu0 %v3389_v31  ;;  %3765 = vmatpush.msrb.mxu3 %v3365_v61  ;;  %v6978_v15 = vpop.f32.mrf.mxu3  ;;  %v6982_v0 = vpop.f32.mrf.mxu0  ;;  %v2965_v31 = vadd.f32 %v6874_v55, %v6872_v45  ;;  %v6991_v61 = vadd.f32 %v6798_v8, %v2801_v28  ;;  %v3385_v45 = vld [vmem:[#allocation5 + $0x5a0] sm:$0xff]  ;;  %v3442_v55 = vld [vmem:[#allocation5 + $0x768] sm:$0xff]  ;;  %v3400_v8 = vld [vmem:[#allocation5 + $0x618] sm:$0xff]  ;;  %v7034_v9 = vadd.f32 %v6845_v1, %v2860_v3 }
 0x1f2   :  { %3810 = vmatpush.msra.mxu1 %v3404_v5  ;;  %3831 = vmatpush.msra.mxu2 %v3425_v58  ;;  %v6994_v5 = vadd.f32 %v6837_v46, %v2857_v12  ;;  %v3401_v58 = vld [vmem:[#allocation5 + $0x620] sm:$0xff]  ;;  %v3398_v49 = vld [vmem:[#allocation5 + $0x608] sm:$0xff]  ;;  %v3071_v3 = vadd.f32 %v6955_v59, %v6953_v42  ;;  %v6223_v42 = vld [vmem:[#allocation5 + $0x70] sm:$0xff] }
 0x1f3   :  { %3590 = vmatmul.f32.gmra.mxu0 %v3478_v63  ;;  %v6976_v10 = vpop.f32.mrf.mxu2  ;;  %3714 = vmatmul.f32.vlgmr.msrb.gmra.mxu1 %v3453_v47  ;;  %v6984_v27 = vpop.f32.mrf.mxu1  ;;  %v7000_v63 = vadd.f32 %v6909_v26, %v2965_v31  ;;  %v7002_v47 = vld [vmem:[#allocation5 + $0x6c0] sm:$0xff]  ;;  %v3452_v46 = vmul.f32 %v6991_v61, %v6991_v61  ;;  %v7048_v1 = vld [vmem:[#allocation5 + $0x6a8] sm:$0xff] }
 0x1f4   :  { %3740 = vmatmul.f32.vlgmr.msrb.gmra.mxu2 %v3454_v50  ;;  %3766 = vmatmul.f32.vlgmr.msrb.gmra.mxu3 %v3455_v44  ;;  %v3468_v51 = vmul.f32 %v6994_v5, %v6994_v5  ;;  %v3384_v44 = vld [vmem:[#allocation5 + $0x598] sm:$0xff]  ;;  %v121_v31 = vpop.xlane.xlu0 %120  ;;  %v7088_v59 = vld [vmem:[#allocation5 + $0x748] sm:$0xff] }
 0x1f5   :  { %3784 = vmatpush.msra.mxu0 %v3388_v18  ;;  %3811 = vmatpush.msra.mxu1 %v3403_v32  ;;  %v3469_v18 = vmul.f32 %v6997_v13, %v6997_v13  ;;  %v3470_v28 = vmul.f32 %v7000_v63, %v7000_v63  ;;  %v3399_v32 = vld [vmem:[#allocation5 + $0x610] sm:$0xff] }
 0x1f6   :  { %3832 = vmatpush.msra.mxu2 %v3424_v17  ;;  %3854 = vmatpush.msra.mxu3 %v3444_v7  ;;  %v2803_v17 = vadd.f32 %v6804_v52, %v6802_v19  ;;  %v7023_v7 = vld [vmem:[#allocation5 + $0x6b8] sm:$0xff]  ;;  %v2968_v19 = vadd.f32 %v6888_v37, %v6886_v35  ;;  %v3383_v52 = vld [vmem:[#allocation5 + $0x590] sm:$0xff] }
 0x1f7   :  { %3785 = vmatpush.msra.mxu0 %v3387_v33  ;;  %3812 = vmatpush.msra.mxu1 %v3402_v34  ;;  %v2914_v33 = vadd.f32 %v6876_v21, %v6847_v38  ;;  %v7036_v38 = vld [vmem:[#allocation5 + $0x6b0] sm:$0xff]  ;;  %v7038_v21 = vld [vmem:[#allocation5 + $0x758] sm:$0xff] }
 0x1f8   :  { %3833 = vmatpush.msra.mxu2 %v3423_v24  ;;  %3855 = vmatpush.msra.mxu3 %v3443_v40  ;;  %v7029_v24 = vld [vmem:[#allocation5 + $0x760] sm:$0xff]  ;;  %v7043_v35 = vadd.f32 %v6806_v53, %v2803_v17  ;;  %v3483_v53 = vmul.f32 %v7034_v9, %v7034_v9 }
 0x1f9   :  { %3786 = vmatpush.msra.mxu0 %v3386_v60  ;;  %3813 = vmatpush.msra.mxu1 %v3401_v58  ;;  %v7010_v50 = vpop.f32.mrf.mxu3  ;;  %v7025_v12 = vpop.f32.mrf.mxu0  ;;  %v3382_v60 = vld [vmem:[#allocation5 + $0x588] sm:$0xff]  ;;  %v3397_v40 = vld [vmem:[#allocation5 + $0x600] sm:$0xff]  ;;  %v7046_v37 = vadd.f32 %v6878_v20, %v2914_v33  ;;  %v7050_v58 = vmax.f32 %v121_v31, 1e-16  ;;  %v6221_v33 = vld [vmem:[#allocation5 + $0x78] sm:$0xff] }
 0x1fa   :  { %3834 = vmatpush.msra.mxu2 %v3422_v6  ;;  %3856 = vmatpush.msra.mxu3 %v3442_v55  ;;  %v7053_v6 = vadd.f32 %v6923_v2, %v2968_v19  ;;  %v7059_v20 = vld [vmem:[#allocation5 + $0x6a0] sm:$0xff]  ;;  %v6220_v55 = vld [vmem:[#allocation5 + $0xf8] sm:$0xff]  ;;  %v7080_v19 = vld [vmem:[#allocation5 + $0x750] sm:$0xff] }
 0x1fb   :  { %3787 = vmatpush.msra.mxu0 %v3385_v45  ;;  %v7008_v26 = vpop.f32.mrf.mxu2  ;;  %3814 = vmatpush.msra.mxu1 %v3400_v8  ;;  %v7027_v34 = vpop.f32.mrf.mxu1  ;;  %v3381_v45 = vld [vmem:[#allocation5 + $0x580] sm:$0xff]  ;;  %6208 = vrsqrt.f32 %v7050_v58  ;;  %v7078_v31 = vld [vmem:[#allocation5 + $0x698] sm:$0xff]  ;;  %vm139_vm0 = vweird.f32 %v7050_v58 }
 0x1fc   :  { %3835 = vmatpush.msra.mxu2 %v7002_v47  ;;  %3688 = vmatmul.f32.vlgmr.msrb.gmra.mxu0 %v3452_v46  ;;  %7608 = vst [vmem:[#allocation32_spill] sm:$0xff] %v7053_v6  ;;  %v3467_v46 = vmul.f32 %v7043_v35, %v7043_v35  ;;  %v3485_v17 = vmul.f32 %v7053_v6, %v7053_v6  ;;  %v6239_v6 = vld [vmem:[#allocation5 + $0xb8] sm:$0xff] }
 0x1fd   :  { %3717 = vmatmul.f32.gmra.mxu1 %v3468_v51  ;;  %3743 = vmatmul.f32.gmra.mxu2 %v3469_v18  ;;  %v3484_v51 = vmul.f32 %v7046_v37, %v7046_v37 }
 0x1fe   :  { %3769 = vmatmul.f32.gmra.mxu3 %v3470_v28  ;;  %3788 = vmatpush.msra.mxu0 %v3384_v44  ;;  %v7609_v44 = vld [vmem:[#allocation29_spill] sm:$0xff] }
 0x1ff   :  { %3815 = vmatpush.msra.mxu1 %v3399_v32  ;;  %3836 = vmatpush.msra.mxu2 %v7023_v7  ;;  %v2806_v32 = vadd.f32 %v7609_v44, %v6811_v62  ;;  %v7083_v62 = vadd.f32 %v6976_v10, %v3071_v3  ;;  %v6225_v10 = vld [vmem:[#allocation5 + $0x68] sm:$0xff]  ;;  %v6226_v44 = vld [vmem:[#allocation5 + $0xe0] sm:$0xff] }
 0x200   :  { %3857 = vmatpush.msra.mxu3 %v7029_v24  ;;  %3789 = vmatpush.msra.mxu0 %v3383_v52  ;;  %v125_v52 = vpop.xlane.xlu0 %124 }
 0x201   :  { %3816 = vmatpush.msra.mxu1 %v3398_v49  ;;  %3837 = vmatpush.msra.mxu2 %v7036_v38  ;;  %v7064_v2 = vpop.f32.mrf.mxu3  ;;  %v3059_v18 = vpop.f32.mrf.mxu0  ;;  %v6222_v49 = vld [vmem:[#allocation5 + $0xf0] sm:$0xff]  ;;  %7610 = vst [vmem:[#allocation29_spill] sm:$0xff] %v7083_v62 }
 0x202   :  { %3858 = vmatpush.msra.mxu3 %v7038_v21  ;;  %3790 = vmatpush.msra.mxu0 %v3382_v60  ;;  %v7085_v60 = vld [vmem:[#allocation5 + $0x690] sm:$0xff]  ;;  %v7101_v18 = vpop.eup %6208 }
 0x203   :  { %3817 = vmatpush.msra.mxu1 %v3397_v40  ;;  %3838 = vmatpush.msra.mxu2 %v7048_v1  ;;  %v7062_v8 = vpop.f32.mrf.mxu2  ;;  %v3077_v28 = vpop.f32.mrf.mxu1  ;;  %v7611_v40 = vld [vmem:[#allocation30_spill] sm:$0xff]  ;;  %vm140_vm1 = vweird.f32 %v7101_v18 }
 0x204   :  { %3791 = vmatpush.msra.mxu0 %v3381_v45  ;;  %v7091_v45 = vadd.f32 %v7611_v40, %v2806_v32  ;;  %3859 = vmatpush.msra.mxu3 %v7080_v19  ;;  %v3457_v28 = vmul.f32 %v7083_v62, %v7083_v62  ;;  %v7105_v32 = vld [vmem:[#allocation5 + $0x680] sm:$0xff]  ;;  %vm7203_vm2 = vmor %vm139_vm0, %vm140_vm1 }
 0x205   :  { %3951 = vmatpush.msrb.mxu1 %v6220_v55  ;;  %3839 = vmatpush.msra.mxu2 %v7059_v20  ;;  %v7093_v55 = vld [vmem:[#allocation5 + $0x688] sm:$0xff]  ;;  %7613 = vst [vmem:[#allocation33_spill] sm:$0xff] %v7105_v32 }
 0x206   :  { %3720 = vmatmul.f32.gmra.mxu1 %v3483_v53  ;;  %3925 = vmatpush.msrb.mxu0 %v6221_v33  ;;  %7612 = vst [vmem:[#allocation30_spill] sm:$0xff] %v7091_v45  ;;  %v6224_v53 = vld [vmem:[#allocation5 + $0xe8] sm:$0xff]  ;;  %v6227_v33 = vld [vmem:[#allocation5 + $0x60] sm:$0xff] }
 0x207   :  { %3691 = vmatmul.f32.gmra.mxu0 %v3467_v46  ;;  %3746 = vmatmul.f32.gmra.mxu2 %v3484_v51  ;;  %v7096_v46 = vmax.f32 %v125_v52, 1e-16  ;;  %v7099_v51 = vld [vmem:[#allocation5 + $0x740] sm:$0xff]  ;;  %v3482_v52 = vmul.f32 %v7091_v45, %v7091_v45  ;;  %v7129_v45 = vld [vmem:[#allocation5 + $0x730] sm:$0xff] }
 0x208   :  { %3772 = vmatmul.f32.gmra.mxu3 %v3485_v17  ;;  %3952 = vmatpush.msrb.mxu1 %v6222_v49  ;;  %v3073_v49 = vadd.f32 %v6984_v27, %v6982_v0 }
 0x209   :  { %3840 = vmatpush.msra.mxu2 %v7078_v31  ;;  %3926 = vmatpush.msrb.mxu0 %v6223_v42  ;;  %v3113_v3 = vpop.f32.mrf.mxu3  ;;  %v6228_v42 = vld [vmem:[#allocation5 + $0xd8] sm:$0xff]  ;;  %v7114_v40 = vpop.f32.mrf.mxu0  ;;  %6210 = vrsqrt.f32 %v7096_v46  ;;  %vm149_vm3 = vweird.f32 %v7096_v46 }
 0x20a   :  { %3953 = vmatpush.msrb.mxu1 %v6224_v53  ;;  %3860 = vmatpush.msra.mxu3 %v7088_v59  ;;  %v134_v53 = vmul.f32 %v7101_v18, %v7050_v58  ;;  %v7127_v27 = vadd.f32 %v7008_v26, %v3073_v49  ;;  %v129_v3 = vpop.xlane.xlu1 %128  ;;  %v6234_v26 = vld [vmem:[#allocation5 + $0x170] sm:$0xff] }
 0x20b   :  { %3841 = vmatpush.msra.mxu2 %v7085_v60  ;;  %3927 = vmatpush.msrb.mxu0 %v6225_v10  ;;  %v3095_v17 = vpop.f32.mrf.mxu2  ;;  %v3017_v10 = vadd.f32 %v6901_v29, %v6899_v4  ;;  %v7124_v0 = vpop.f32.mrf.mxu1  ;;  %v6232_v4 = vld [vmem:[#allocation5 + $0x50] sm:$0xff]  ;;  %v7138_v49 = vmax.f32 %v129_v3, 1e-16 }
 0x20c   :  { %3954 = vmatpush.msrb.mxu1 %v6226_v44  ;;  %3861 = vmatpush.msra.mxu3 %v7099_v51  ;;  %v6229_v44 = vld [vmem:[#allocation5 + $0x58] sm:$0xff]  ;;  %7614 = vst [vmem:[#allocation34_spill] sm:$0xff] %v7127_v27  ;;  %v135_v29 = vmul.f32 %v7101_v18, %v134_v53  ;;  %v6236_v53 = vld [vmem:[#allocation5 + $0xc0] sm:$0xff] }
 0x20d   :  { %3842 = vmatpush.msra.mxu2 %v7093_v55  ;;  %3928 = vmatpush.msrb.mxu0 %v6227_v33  ;;  %v7122_v17 = vld [vmem:[#allocation5 + $0x738] sm:$0xff]  ;;  %v6230_v33 = vld [vmem:[#allocation5 + $0xd0] sm:$0xff]  ;;  %6212 = vrsqrt.f32 %v7138_v49  ;;  %vm159_vm6 = vweird.f32 %v7138_v49 }
 0x20e   :  { %3955 = vmatpush.msrb.mxu1 %v6228_v42  ;;  %v6231_v42 = vld [vmem:[#allocation5 + $0x178] sm:$0xff]  ;;  %3862 = vmatpush.msra.mxu3 %v7122_v17 }
 0x20f   :  { %3843 = vmatpush.msra.mxu2 %v7105_v32  ;;  %3929 = vmatpush.msrb.mxu0 %v6229_v44  ;;  %v7134_v44 = vadd.f32 %v6903_v14, %v3017_v10  ;;  %v6237_v14 = vld [vmem:[#allocation5 + $0x168] sm:$0xff] }
 0x210   :  { %3694 = vmatmul.f32.gmra.mxu0 %v3482_v52  ;;  %3818 = vmatmul.f32.vlgmr.msra.gmra.mxu1 %v3457_v28  ;;  %v6233_v28 = vld [vmem:[#allocation5 + $0xc8] sm:$0xff] }
 0x211   :  { %3956 = vmatpush.msrb.mxu1 %v6230_v33  ;;  %3977 = vmatpush.msrb.mxu2 %v6231_v42  ;;  %7615 = vst [vmem:[#allocation35_spill] sm:$0xff] %v7134_v44  ;;  %v7136_v52 = vld [vmem:[#allocation5 + $0x728] sm:$0xff]  ;;  %v3472_v33 = vmul.f32 %v7127_v27, %v7127_v27  ;;  %v3019_v27 = vadd.f32 %v6919_v41, %v6911_v36  ;;  %v7156_v62 = vpop.f32.mrf.mxu0  ;;  %v6242_v41 = vld [vmem:[#allocation5 + $0xb0] sm:$0xff] }
 0x212   :  { %3930 = vmatpush.msrb.mxu0 %v6232_v4  ;;  %7616 = vst [vmem:[#allocation36_spill] sm:$0xff] %v7136_v52  ;;  %v6235_v42 = vld [vmem:[#allocation5 + $0x48] sm:$0xff]  ;;  %3863 = vmatpush.msra.mxu3 %v7129_v45  ;;  %v7143_v4 = vpop.eup %6210 }
 0x213   :  { %3957 = vmatpush.msrb.mxu1 %v6233_v28  ;;  %3978 = vmatpush.msrb.mxu2 %v6234_v26  ;;  %v7145_v10 = vpop.f32.mrf.mxu2  ;;  %v6238_v28 = vld [vmem:[#allocation5 + $0x40] sm:$0xff]  ;;  %v7148_v3 = vpop.f32.mrf.mxu3  ;;  %v136_v26 = vmul.f32 0.5, %v135_v29  ;;  %v6241_v29 = vld [vmem:[#allocation5 + $0x38] sm:$0xff]  ;;  %v6245_v32 = vld [vmem:[#allocation5 + $0xa8] sm:$0xff]  ;;  %vm150_vm4 = vweird.f32 %v7143_v4 }
 0x214   :  { %3931 = vmatpush.msrb.mxu0 %v6235_v42  ;;  %3864 = vmatpush.msra.mxu3 %v7136_v52  ;;  %v3456_v42 = vmul.f32 %v7134_v44, %v7134_v44  ;;  %v7161_v44 = vld [vmem:[#allocation5 + $0x720] sm:$0xff]  ;;  %v7163_v36 = vpop.f32.mrf.mxu1  ;;  %v7170_v52 = vld [vmem:[#allocation5 + $0x718] sm:$0xff]  ;;  %vm7243_vm5 = vmor %vm149_vm3, %vm150_vm4 }
 0x215   :  { %3958 = vmatpush.msrb.mxu1 %v6236_v53  ;;  %3979 = vmatpush.msrb.mxu2 %v6237_v14  ;;  %v3076_v53 = vadd.f32 %v7027_v34, %v7025_v12  ;;  %v6240_v14 = vld [vmem:[#allocation5 + $0x160] sm:$0xff]  ;;  %v3125_v34 = vadd.f32 %v7114_v40, %v6978_v15  ;;  %7618 = vst [vmem:[#allocation38_spill] sm:$0xff] %v7170_v52  ;;  %v7177_v15 = vld [vmem:[#allocation5 + $0x710] sm:$0xff] }
 0x216   :  { %3932 = vmatpush.msrb.mxu0 %v6238_v28  ;;  %v144_v28 = vmul.f32 %v7143_v4, %v7096_v46  ;;  %3865 = vmatpush.msra.mxu3 %v7161_v44  ;;  %7620 = vst [vmem:[#allocation40_spill] sm:$0xff] %v7177_v15  ;;  %v6248_v40 = vld [vmem:[#allocation5 + $0xa0] sm:$0xff]  ;;  %v6270_v46 = vld [vmem:[#allocation5 + $0x2e8] sm:$0xff] }
 0x217   :  { %3959 = vmatpush.msrb.mxu1 %v6239_v6  ;;  %3980 = vmatpush.msrb.mxu2 %v6240_v14  ;;  %v7166_v12 = vadd.f32 %v7062_v8, %v3076_v53  ;;  %v6243_v6 = vld [vmem:[#allocation5 + $0x158] sm:$0xff]  ;;  %v6244_v14 = vld [vmem:[#allocation5 + $0x30] sm:$0xff]  ;;  %v6247_v53 = vld [vmem:[#allocation5 + $0x28] sm:$0xff] }
 0x218   :  { %3933 = vmatpush.msrb.mxu0 %v6241_v29  ;;  %3821 = vmatmul.f32.gmra.mxu1 %v3472_v33  ;;  %v137_v33 = vsub.f32 1.5, %v136_v26  ;;  %v7173_v29 = vadd.f32 %v6921_v54, %v3019_v27  ;;  %v145_v8 = vmul.f32 %v7143_v4, %v144_v28  ;;  %v7187_v27 = vpop.eup %6212  ;;  %v6249_v26 = vld [vmem:[#allocation5 + $0x148] sm:$0xff]  ;;  %v6250_v28 = vld [vmem:[#allocation5 + $0x20] sm:$0xff] }
 0x219   :  { %3792 = vmatmul.f32.vlgmr.msra.gmra.mxu0 %v3456_v42  ;;  %3960 = vmatpush.msrb.mxu1 %v6242_v41  ;;  %7617 = vst [vmem:[#allocation37_spill] sm:$0xff] %v7166_v12  ;;  %v6246_v42 = vld [vmem:[#allocation5 + $0x150] sm:$0xff]  ;;  %v3487_v54 = vmul.f32 %v7166_v12, %v7166_v12  ;;  %v7213_v58 = vpop.f32.mrf.mxu0  ;;  %v6255_v12 = vld [vmem:[#allocation5 + $0x138] sm:$0xff]  ;;  %vm160_vm7 = vweird.f32 %v7187_v27 }
 0x21a   :  { %3981 = vmatpush.msrb.mxu2 %v6243_v6  ;;  %3934 = vmatpush.msrb.mxu0 %v6244_v14  ;;  %7619 = vst [vmem:[#allocation39_spill] sm:$0xff] %v7173_v29  ;;  %v138_v6 = vmul.f32 %v7101_v18, %v137_v33  ;;  %v3471_v14 = vmul.f32 %v7173_v29, %v7173_v29  ;;  %v146_v33 = vmul.f32 0.5, %v145_v8  ;;  %vm161_vm8 = vmor %vm159_vm6, %vm160_vm7 }
 0x21b   :  { %3961 = vmatpush.msrb.mxu1 %v6245_v32  ;;  %v7184_v32 = vadd.f32 %v7124_v0, %v3125_v34  ;;  %3866 = vmatpush.msra.mxu3 %v7170_v52  ;;  %v7189_v41 = vpop.f32.mrf.mxu2  ;;  %v6251_v0 = vld [vmem:[#allocation5 + $0x98] sm:$0xff]  ;;  %v7197_v34 = vpop.f32.mrf.mxu3  ;;  %v6325_v52 = vld [vmem:[#allocation5 + $0x208] sm:$0xff] }
 0x21c   :  { %3982 = vmatpush.msrb.mxu2 %v6246_v42  ;;  %3935 = vmatpush.msrb.mxu0 %v6247_v53  ;;  %v3022_v42 = vadd.f32 %v6935_v23, %v6925_v22  ;;  %v7207_v22 = vld [vmem:[#allocation5 + $0x708] sm:$0xff]  ;;  %v154_v23 = vmul.f32 %v7187_v27, %v7138_v49  ;;  %v7215_v8 = vpop.f32.mrf.mxu1 }
 0x21d   :  { %3962 = vmatpush.msrb.mxu1 %v6248_v40  ;;  %3867 = vmatpush.msra.mxu3 %v7177_v15  ;;  %v6252_v40 = vld [vmem:[#allocation5 + $0x140] sm:$0xff]  ;;  %7623 = vst [vmem:[#allocation41_spill] sm:$0xff] %v7207_v22  ;;  %v6259_v15 = vld [vmem:[#allocation5 + $0x130] sm:$0xff] }
 0x21e   :  { %3983 = vmatpush.msrb.mxu2 %v6249_v26  ;;  %3936 = vmatpush.msrb.mxu0 %v6250_v28  ;;  %v6253_v26 = vld [vmem:[#allocation5 + $0x18] sm:$0xff]  ;;  %v3458_v28 = vmul.f32 %v7184_v32, %v7184_v32  ;;  %v155_v53 = vmul.f32 %v7187_v27, %v154_v23  ;;  %v7625_v23 = vld [vmem:[#allocation17_spill] sm:$0xff] }
 0x21f   :  { %3963 = vmatpush.msrb.mxu1 %v6251_v0  ;;  %v6254_v0 = vld [vmem:[#allocation5 + $0x90] sm:$0xff]  ;;  %3868 = vmatpush.msra.mxu3 %v7207_v22  ;;  %v3127_v22 = vadd.f32 %v7156_v62, %v7010_v50  ;;  %v6275_v50 = vld [vmem:[#allocation5 + $0x2e0] sm:$0xff]  ;;  %v6276_v62 = vld [vmem:[#allocation5 + $0x108] sm:$0xff] }
 0x220   :  { %3984 = vmatpush.msrb.mxu2 %v6252_v40  ;;  %3937 = vmatpush.msrb.mxu0 %v6253_v26  ;;  %v7220_v40 = vsel %vm7203_vm2, %v7101_v18, %v138_v6  ;;  %v7223_v26 = vadd.f32 %v6937_v30, %v3022_v42  ;;  %v6260_v18 = vld [vmem:[#allocation5 + $0x8] sm:$0xff]  ;;  %v6261_v30 = vld [vmem:[#allocation5 + $0x80] sm:$0xff]  ;;  %vm4369_vm2 = vcmask 7168  }
 0x221   :  { %3795 = vmatmul.f32.gmra.mxu0 %v3471_v14  ;;  %3824 = vmatmul.f32.gmra.mxu1 %v3487_v54  ;;  %v6256_v54 = vld [vmem:[#allocation5 + $0x10] sm:$0xff]  ;;  %v6262_v6 = vld [vmem:[#allocation5 + $0x128] sm:$0xff] }
 0x222   :  { %3964 = vmatpush.msrb.mxu1 %v6254_v0  ;;  %3985 = vmatpush.msrb.mxu2 %v6255_v12  ;;  %7624 = vst [vmem:[#allocation42_spill] sm:$0xff] %v7223_v26  ;;  %v6257_v14 = vld [vmem:[#allocation10 + $0x8] sm:$0xff]  ;;  %v147_v0 = vsub.f32 1.5, %v146_v33  ;;  %v6258_v12 = vld [vmem:[#allocation5 + $0x88] sm:$0xff]  ;;  %v3486_v42 = vmul.f32 %v7223_v26, %v7223_v26  ;;  %v6263_v33 = vld [vmem:[#allocation5] sm:$0xff] }
 0x223   :  { %3938 = vmatpush.msrb.mxu0 %v6256_v54  ;;  %v7227_v29 = vmul.f32 %v6257_v14, %v7220_v40  ;;  %3844 = vmatmul.f32.vlgmr.msra.gmra.mxu2 %v3458_v28  ;;  %v6264_v54 = vld [vmem:[#allocation5 + $0x2f8] sm:$0xff]  ;;  %v6265_v14 = vld [vmem:[#allocation5 + $0x120] sm:$0xff]  ;;  %v6269_v26 = vld [vmem:[#allocation5 + $0x270] sm:$0xff] }
 0x224   :  { %3965 = vmatpush.msrb.mxu1 %v6258_v12  ;;  %3986 = vmatpush.msrb.mxu2 %v6259_v15  ;;  %v148_v15 = vmul.f32 %v7143_v4, %v147_v0  ;;  %v6266_v12 = vld [vmem:[#allocation5 + $0x278] sm:$0xff]  ;;  %v7247_v0 = vld [vmem:[#allocation5 + $0x700] sm:$0xff] }
 0x225   :  { %3939 = vmatpush.msrb.mxu0 %v6260_v18  ;;  %v3881_v28 = vmul.f32 %v7625_v23, %v7227_v29  ;;  %v7237_v18 = vpop.f32.mrf.mxu2  ;;  %7628 = vst [vmem:[#allocation17_spill] sm:$0xff] %v7247_v0  ;;  %v3131_v23 = vpop.f32.mrf.mxu0  ;;  %3869 = vmatpush.msra.mxu3 %v7247_v0  ;;  %v6282_v0 = vld [vmem:[#allocation5 + $0x258] sm:$0xff] }
 0x226   :  { %3966 = vmatpush.msrb.mxu1 %v6261_v30  ;;  %3987 = vmatpush.msrb.mxu2 %v6262_v6  ;;  %v156_v6 = vmul.f32 0.5, %v155_v53  ;;  %v6271_v53 = vld [vmem:[#allocation10] sm:$0xff]  ;;  %v6279_v30 = vld [vmem:[#allocation5 + $0x2d8] sm:$0xff] }
 0x227   :  { %3940 = vmatpush.msrb.mxu0 %v6263_v33  ;;  %v6267_v33 = vld [vmem:[#allocation5 + $0x2f0] sm:$0xff] }
 0x228   :  { %4055 = vmatpush.msra.mxu1 %v6264_v54  ;;  %3988 = vmatpush.msrb.mxu2 %v6265_v14  ;;  %v7249_v54 = vpop.f32.mrf.mxu3  ;;  %v6268_v14 = vld [vmem:[#allocation5 + $0x118] sm:$0xff]  ;;  %v6273_v23 = vld [vmem:[#allocation10 + $0x20] sm:$0xff] }
 0x229   :  { %4029 = vmatpush.msra.mxu0 %v6266_v12  ;;  %3967 = vmatmul.f32.vlgmr.msrb.gmra.mxu1 %v3881_v28  ;;  %v3149_v12 = vpop.f32.mrf.mxu1  ;;  %v6272_v28 = vld [vmem:[#allocation5 + $0x110] sm:$0xff] }
 0x22a   :  { %4056 = vmatpush.msra.mxu1 %v6267_v33  ;;  %3798 = vmatmul.f32.gmra.mxu0 %v3486_v42  ;;  %v7254_v33 = vmul.f32 %v6271_v53, %v7220_v40  ;;  %v7259_v42 = vsel %vm7243_vm5, %v7143_v4, %v148_v15  ;;  %v6274_v12 = vld [vmem:[#allocation5 + $0x268] sm:$0xff]  ;;  %v6278_v4 = vld [vmem:[#allocation5 + $0x260] sm:$0xff]  ;;  %v7268_v15 = vadd.f32 %v7163_v36, %v3127_v22  ;;  %v6284_v22 = vld [vmem:[#allocation5 + $0x378] sm:$0xff] }
 0x22b   :  { %3989 = vmatpush.msrb.mxu2 %v6268_v14  ;;  %4030 = vmatpush.msra.mxu0 %v6269_v26  ;;  %v7263_v26 = vmul.f32 %v6273_v23, %v7259_v42  ;;  %v157_v14 = vsub.f32 1.5, %v156_v6  ;;  %v7630_v6 = vld [vmem:[#allocation14_spill] sm:$0xff] }
 0x22c   :  { %4057 = vmatpush.msra.mxu1 %v6270_v46  ;;  %v6277_v46 = vld [vmem:[#allocation5 + $0x1f8] sm:$0xff]  ;;  %7629 = vst [vmem:[#allocation43_spill] sm:$0xff] %v7268_v15  ;;  %v3880_v53 = vmul.f32 %v7630_v6, %v7254_v33  ;;  %v6281_v23 = vld [vmem:[#allocation5 + $0x1f0] sm:$0xff]  ;;  %v6286_v6 = vld [vmem:[#allocation5 + $0x2c8] sm:$0xff] }
 0x22d   :  { %3990 = vmatpush.msrb.mxu2 %v6272_v28  ;;  %4031 = vmatpush.msra.mxu0 %v6274_v12  ;;  %v6280_v28 = vld [vmem:[#allocation5 + $0x100] sm:$0xff]  ;;  %v3167_v12 = vpop.f32.mrf.mxu2 }
 0x22e   :  { %4058 = vmatpush.msra.mxu1 %v6275_v50  ;;  %4003 = vmatpush.msrb.mxu3 %v6277_v46  ;;  %v158_v50 = vmul.f32 %v7187_v27, %v157_v14  ;;  %v6285_v14 = vld [vmem:[#allocation5 + $0x250] sm:$0xff] }
 0x22f   :  { %3991 = vmatpush.msrb.mxu2 %v6276_v62  ;;  %4032 = vmatpush.msra.mxu0 %v6278_v4  ;;  %v7631_v62 = vld [vmem:[#allocation18_spill] sm:$0xff] }
 0x230   :  { %4059 = vmatpush.msra.mxu1 %v6279_v30  ;;  %4004 = vmatpush.msrb.mxu3 %v6281_v23  ;;  %v3896_v46 = vmul.f32 %v7631_v62, %v7263_v26  ;;  %v6283_v4 = vld [vmem:[#allocation5 + $0x2d0] sm:$0xff]  ;;  %v3185_v36 = vpop.f32.mrf.mxu3  ;;  %v3473_v30 = vmul.f32 %v7268_v15, %v7268_v15  ;;  %v6288_v23 = vld [vmem:[#allocation10 + $0x18] sm:$0xff]  ;;  %v7287_v49 = vsel %vm161_vm8, %v7187_v27, %v158_v50  ;;  %v6296_v50 = vld [vmem:[#allocation5 + $0x2b8] sm:$0xff] }
 0x231   :  { %3992 = vmatpush.msrb.mxu2 %v6280_v28  ;;  %4033 = vmatpush.msra.mxu0 %v6282_v0  ;;  %v6287_v0 = vld [vmem:[#allocation5 + $0x370] sm:$0xff]  ;;  %v7281_v28 = vpop.f32.mrf.mxu0  ;;  %v7284_v12 = vmul.f32 %v6288_v23, %v7259_v42  ;;  %v6290_v62 = vld [vmem:[#allocation5 + $0x248] sm:$0xff]  ;;  %v6295_v27 = vld [vmem:[#allocation5 + $0x240] sm:$0xff] }
 0x232   :  { %4060 = vmatpush.msra.mxu1 %v6283_v4  ;;  %3941 = vmatmul.f32.vlgmr.msrb.gmra.mxu0 %v3880_v53  ;;  %v6289_v53 = vld [vmem:[#allocation5 + $0x1e8] sm:$0xff] }
 0x233   :  { %4081 = vmatpush.msra.mxu2 %v6284_v22  ;;  %3970 = vmatmul.f32.gmra.mxu1 %v3896_v46  ;;  %v3130_v46 = vadd.f32 %v7213_v58, %v7064_v2  ;;  %v6291_v4 = vld [vmem:[#allocation10 + $0x38] sm:$0xff] }
 0x234   :  { %4034 = vmatpush.msra.mxu0 %v6285_v14  ;;  %4061 = vmatpush.msra.mxu1 %v6286_v6  ;;  %v7292_v36 = vmul.f32 %v6291_v4, %v7287_v49  ;;  %v6292_v22 = vld [vmem:[#allocation5 + $0x2c0] sm:$0xff]  ;;  %v6293_v14 = vld [vmem:[#allocation5 + $0x368] sm:$0xff]  ;;  %v6300_v4 = vld [vmem:[#allocation5 + $0x2b0] sm:$0xff] }
 0x235   :  { %4082 = vmatpush.msra.mxu2 %v6287_v0  ;;  %4005 = vmatpush.msrb.mxu3 %v6289_v53  ;;  %v6294_v6 = vld [vmem:[#allocation5 + $0x1e0] sm:$0xff]  ;;  %v7297_v2 = vadd.f32 %v7215_v8, %v3130_v46  ;;  %v6298_v53 = vld [vmem:[#allocation5 + $0x1d8] sm:$0xff]  ;;  %v6302_v8 = vld [vmem:[#allocation5 + $0x1d0] sm:$0xff] }
 0x236   :  { %4035 = vmatpush.msra.mxu0 %v6290_v62  ;;  %4062 = vmatpush.msra.mxu1 %v6292_v22  ;;  %v7632_v0 = vld [vmem:[#allocation15_spill] sm:$0xff]  ;;  %v3911_v62 = vmul.f32 %v6713_v48, %v7292_v36  ;;  %v3507_v22 = vpop.f32.mrf.mxu1  ;;  %v6304_v48 = vld [vmem:[#allocation5 + $0x2a8] sm:$0xff] }
 0x237   :  { %4083 = vmatpush.msra.mxu2 %v6293_v14  ;;  %4006 = vmatpush.msrb.mxu3 %v6294_v6  ;;  %v3895_v23 = vmul.f32 %v7632_v0, %v7284_v12  ;;  %7633 = vst [vmem:[#allocation14_spill] sm:$0xff] %v7297_v2  ;;  %v6297_v58 = vld [vmem:[#allocation5 + $0x360] sm:$0xff]  ;;  %v6301_v6 = vld [vmem:[#allocation5 + $0x358] sm:$0xff]  ;;  %v6303_v0 = vld [vmem:[#allocation5 + $0x230] sm:$0xff] }
 0x238   :  { %3847 = vmatmul.f32.gmra.mxu2 %v3473_v30  ;;  %4036 = vmatpush.msra.mxu0 %v6295_v27  ;;  %v6299_v30 = vld [vmem:[#allocation5 + $0x238] sm:$0xff]  ;;  %v3533_v14 = vpop.f32.mrf.mxu2 }
 0x239   :  { %4063 = vmatpush.msra.mxu1 %v6296_v50  ;;  %4084 = vmatpush.msra.mxu2 %v6297_v58  ;;  %v3534_v27 = vadd.f32 %v3533_v14, %v3507_v22  ;;  %v3488_v50 = vmul.f32 %v7297_v2, %v7297_v2  ;;  %v6308_v22 = vld [vmem:[#allocation5 + $0x228] sm:$0xff]  ;;  %v6309_v14 = vld [vmem:[#allocation5 + $0x2a0] sm:$0xff] }
 0x23a   :  { %4007 = vmatpush.msrb.mxu3 %v6298_v53  ;;  %4037 = vmatpush.msra.mxu0 %v6299_v30  ;;  %v3559_v46 = vpop.f32.mrf.mxu3  ;;  %v6305_v53 = vld [vmem:[#allocation5 + $0x350] sm:$0xff]  ;;  %v6306_v30 = vld [vmem:[#allocation5 + $0x1c8] sm:$0xff] }
 0x23b   :  { %4064 = vmatpush.msra.mxu1 %v6300_v4  ;;  %4085 = vmatpush.msra.mxu2 %v6301_v6  ;;  %v7303_v58 = vadd.f32 %v3559_v46, %v3534_v27  ;;  %v7305_v4 = vpop.f32.mrf.mxu0  ;;  %v6310_v6 = vld [vmem:[#allocation5 + $0x348] sm:$0xff]  ;;  %v6312_v27 = vld [vmem:[#allocation5 + $0x220] sm:$0xff]  ;;  %v6313_v46 = vld [vmem:[#allocation5 + $0x298] sm:$0xff] }
 0x23c   :  { %3944 = vmatmul.f32.gmra.mxu0 %v3895_v23  ;;  %3973 = vmatmul.f32.gmra.mxu1 %v3911_v62  ;;  %v6307_v23 = vld [vmem:[#allocation10 + $0x30] sm:$0xff] }
 0x23d   :  { %4008 = vmatpush.msrb.mxu3 %v6302_v8  ;;  %4038 = vmatpush.msra.mxu0 %v6303_v0  ;;  %v7308_v62 = vmul.f32 %v6307_v23, %v7287_v49  ;;  %v6311_v8 = vld [vmem:[#allocation5 + $0x1c0] sm:$0xff]  ;;  %v6316_v23 = vld [vmem:[#allocation5 + $0x218] sm:$0xff] }
 0x23e   :  { %4065 = vmatpush.msra.mxu1 %v6304_v48  ;;  %4086 = vmatpush.msra.mxu2 %v6305_v53  ;;  %v6314_v0 = vld [vmem:[#allocation5 + $0x340] sm:$0xff] }
 0x23f   :  { %4009 = vmatpush.msrb.mxu3 %v6306_v30  ;;  %4039 = vmatpush.msra.mxu0 %v6308_v22  ;;  %v7634_v48 = vld [vmem:[#allocation16_spill] sm:$0xff]  ;;  %v6315_v30 = vld [vmem:[#allocation5 + $0x1b8] sm:$0xff] }
 0x240   :  { %4066 = vmatpush.msra.mxu1 %v6309_v14  ;;  %4087 = vmatpush.msra.mxu2 %v6310_v6  ;;  %v3910_v53 = vmul.f32 %v7634_v48, %v7308_v62  ;;  %v6317_v22 = vld [vmem:[#allocation10 + $0x10] sm:$0xff]  ;;  %v6318_v6 = vld [vmem:[#allocation5 + $0x290] sm:$0xff] }
 0x241   :  { %4010 = vmatpush.msrb.mxu3 %v6311_v8  ;;  %3850 = vmatmul.f32.gmra.mxu2 %v3488_v50  ;;  %v7313_v14 = vmul.f32 %v6317_v22, %v7220_v40  ;;  %v6319_v50 = vld [vmem:[#allocation5 + $0x338] sm:$0xff]  ;;  %v3510_v8 = vpop.f32.mrf.mxu1  ;;  %v6323_v40 = vld [vmem:[#allocation5 + $0x330] sm:$0xff]  ;;  %v6324_v22 = vld [vmem:[#allocation5 + $0x1a8] sm:$0xff] }
 0x242   :  { %4040 = vmatpush.msra.mxu0 %v6312_v27  ;;  %4067 = vmatpush.msra.mxu1 %v6313_v46  ;;  %v3536_v27 = vpop.f32.mrf.mxu2  ;;  %v3179_v46 = vadd.f32 %v7148_v3, %v7145_v10  ;;  %v6326_v10 = vld [vmem:[#allocation5 + $0x280] sm:$0xff] }
 0x243   :  { %4088 = vmatpush.msra.mxu2 %v6314_v0  ;;  %4011 = vmatpush.msrb.mxu3 %v6315_v30  ;;  %v6320_v0 = vld [vmem:[#allocation5 + $0x1b0] sm:$0xff]  ;;  %v3537_v48 = vadd.f32 %v3536_v27, %v3510_v8  ;;  %v6327_v27 = vld [vmem:[#allocation5 + $0x328] sm:$0xff] }
 0x244   :  { %4041 = vmatpush.msra.mxu0 %v6316_v23  ;;  %4068 = vmatpush.msra.mxu1 %v6318_v6  ;;  %v6321_v30 = vld [vmem:[#allocation5 + $0x210] sm:$0xff]  ;;  %v6322_v23 = vld [vmem:[#allocation5 + $0x288] sm:$0xff]  ;;  %v3562_v2 = vpop.f32.mrf.mxu3 }
 0x245   :  { %4089 = vmatpush.msra.mxu2 %v6319_v50  ;;  %3947 = vmatmul.f32.gmra.mxu0 %v3910_v53  ;;  %v7317_v6 = vadd.f32 %v3562_v2, %v3537_v48  ;;  %v7635_v50 = vld [vmem:[#allocation19_spill] sm:$0xff]  ;;  %v7636_v53 = vld [vmem:[#allocation26_spill] sm:$0xff] }
 0x246   :  { %4012 = vmatpush.msrb.mxu3 %v6320_v0  ;;  %4042 = vmatpush.msra.mxu0 %v6321_v30  ;;  %v3882_v15 = vmul.f32 %v7635_v50, %v7313_v14  ;;  %v3885_v8 = vmul.f32 %v7636_v53, %v7313_v14  ;;  %v6328_v0 = vld [vmem:[#allocation5 + $0x1a0] sm:$0xff]  ;;  %v7326_v30 = vadd.f32 %v7281_v28, %v3179_v46  ;;  %v6334_v28 = vld [vmem:[#allocation5 + $0x318] sm:$0xff]  ;;  %v6336_v53 = vld [vmem:[#allocation5 + $0x4f0] sm:$0xff] }
 0x247   :  { %4069 = vmatpush.msra.mxu1 %v6322_v23  ;;  %4090 = vmatpush.msra.mxu2 %v6323_v40  ;;  %v7321_v3 = vpop.f32.mrf.mxu0  ;;  %v6329_v2 = vld [vmem:[#allocation5 + $0x200] sm:$0xff]  ;;  %v6332_v23 = vld [vmem:[#allocation5 + $0x478] sm:$0xff] }
 0x248   :  { %4013 = vmatpush.msrb.mxu3 %v6324_v22  ;;  %4043 = vmatpush.msra.mxu0 %v6325_v52  ;;  %v6330_v48 = vld [vmem:[#allocation5 + $0x320] sm:$0xff]  ;;  %v6331_v52 = vld [vmem:[#allocation5 + $0x4f8] sm:$0xff]  ;;  %v3459_v50 = vmul.f32 %v7326_v30, %v7326_v30 }
 0x249   :  { %4070 = vmatpush.msra.mxu1 %v6326_v10  ;;  %4091 = vmatpush.msra.mxu2 %v6327_v27  ;;  %v7637_v40 = vld [vmem:[#allocation24_spill] sm:$0xff]  ;;  %v6333_v10 = vld [vmem:[#allocation5 + $0x198] sm:$0xff]  ;;  %v3513_v27 = vpop.f32.mrf.mxu1 }
 0x24a   :  { %4014 = vmatpush.msrb.mxu3 %v6328_v0  ;;  %3993 = vmatmul.f32.vlgmr.msrb.gmra.mxu2 %v3882_v15  ;;  %v3884_v22 = vmul.f32 %v7637_v40, %v7227_v29  ;;  %v6335_v15 = vld [vmem:[#allocation10 + $0x28] sm:$0xff] }
 0x24b   :  { %4044 = vmatpush.msra.mxu0 %v6329_v2  ;;  %4071 = vmatmul.f32.vlgmr.msra.gmra.mxu1 %v3885_v8  ;;  %v7333_v46 = vmul.f32 %v6335_v15, %v7259_v42  ;;  %v6337_v8 = vld [vmem:[#allocation5 + $0x470] sm:$0xff]  ;;  %v7638_v15 = vld [vmem:[#allocation20_spill] sm:$0xff] }
 0x24c   :  { %4092 = vmatpush.msra.mxu2 %v6330_v48  ;;  %4159 = vmatpush.msrb.mxu1 %v6331_v52  ;;  %v6338_v2 = vld [vmem:[#allocation5 + $0x190] sm:$0xff]  ;;  %v6339_v52 = vld [vmem:[#allocation5 + $0x4e8] sm:$0xff] }
 0x24d   :  { %4133 = vmatpush.msrb.mxu0 %v6332_v23  ;;  %4015 = vmatpush.msrb.mxu3 %v6333_v10  ;;  %v6340_v23 = vld [vmem:[#allocation5 + $0x310] sm:$0xff] }
 0x24e   :  { %4093 = vmatpush.msra.mxu2 %v6334_v28  ;;  %4160 = vmatpush.msrb.mxu1 %v6336_v53  ;;  %v3539_v0 = vpop.f32.mrf.mxu2  ;;  %v3565_v40 = vpop.f32.mrf.mxu3  ;;  %v6341_v28 = vld [vmem:[#allocation5 + $0x468] sm:$0xff]  ;;  %v3897_v53 = vmul.f32 %v7638_v15, %v7333_v46 }
 0x24f   :  { %4134 = vmatpush.msrb.mxu0 %v6337_v8  ;;  %4016 = vmatpush.msrb.mxu3 %v6338_v2  ;;  %v3540_v48 = vadd.f32 %v3539_v0, %v3513_v27  ;;  %v3203_v10 = vpop.f32.mrf.mxu0  ;;  %v3181_v8 = vadd.f32 %v7197_v34, %v7189_v41  ;;  %v6342_v2 = vld [vmem:[#allocation5 + $0x188] sm:$0xff]  ;;  %v3900_v27 = vmul.f32 %v6774_v16, %v7333_v46  ;;  %v6348_v41 = vld [vmem:[#allocation5 + $0x4d8] sm:$0xff] }
 0x250   :  { %4045 = vmatmul.f32.vlgmr.msra.gmra.mxu0 %v3884_v22  ;;  %4161 = vmatpush.msrb.mxu1 %v6339_v52  ;;  %v6343_v22 = vld [vmem:[#allocation5 + $0x4e0] sm:$0xff]  ;;  %v6344_v0 = vld [vmem:[#allocation5 + $0x308] sm:$0xff]  ;;  %v6349_v34 = vld [vmem:[#allocation5 + $0x3f8] sm:$0xff] }
 0x251   :  { %4094 = vmatpush.msra.mxu2 %v6340_v23  ;;  %4135 = vmatpush.msrb.mxu0 %v6341_v28  ;;  %v7335_v42 = vadd.f32 %v3565_v40, %v3540_v48  ;;  %v6345_v52 = vld [vmem:[#allocation5 + $0x460] sm:$0xff]  ;;  %v7344_v48 = vadd.f32 %v7305_v4, %v3181_v8  ;;  %v6350_v40 = vld [vmem:[#allocation5 + $0x458] sm:$0xff]  ;;  %v6352_v10 = vld [vmem:[#allocation10 + $0x40] sm:$0xff] }
 0x252   :  { %3870 = vmatmul.f32.vlgmr.msra.gmra.mxu3 %v3459_v50  ;;  %4162 = vmatpush.msrb.mxu1 %v6343_v22  ;;  %v6346_v50 = vld [vmem:[#allocation5 + $0x180] sm:$0xff]  ;;  %v6351_v16 = vld [vmem:[#allocation5 + $0x578] sm:$0xff]  ;;  %v7347_v28 = vmul.f32 %v6352_v10, %v7287_v49  ;;  %v7639_v15 = vld [vmem:[#allocation25_spill] sm:$0xff]  ;;  %v3611_v22 = vpop.f32.mrf.mxu1 }
 0x253   :  { %4017 = vmatpush.msrb.mxu3 %v6342_v2  ;;  %4095 = vmatpush.msra.mxu2 %v6344_v0  ;;  %v6347_v23 = vld [vmem:[#allocation5 + $0x300] sm:$0xff]  ;;  %v3474_v4 = vmul.f32 %v7344_v48, %v7344_v48  ;;  %v6353_v8 = vld [vmem:[#allocation5 + $0x4d0] sm:$0xff]  ;;  %v6357_v49 = vld [vmem:[#allocation5 + $0x4c8] sm:$0xff] }
 0x254   :  { %4136 = vmatpush.msrb.mxu0 %v6345_v52  ;;  %3996 = vmatmul.f32.gmra.mxu2 %v3897_v53  ;;  %v3899_v53 = vmul.f32 %v7639_v15, %v7263_v26  ;;  %v6354_v2 = vld [vmem:[#allocation5 + $0x3f0] sm:$0xff]  ;;  %v3184_v52 = vadd.f32 %v7249_v54, %v7237_v18  ;;  %v3915_v10 = vmul.f32 %v6779_v11, %v7347_v28  ;;  %v6361_v15 = vld [vmem:[#allocation5 + $0x568] sm:$0xff]  ;;  %v6362_v18 = vld [vmem:[#allocation5 + $0x3e0] sm:$0xff] }
 0x255   :  { %4018 = vmatpush.msrb.mxu3 %v6346_v50  ;;  %4074 = vmatmul.f32.gmra.mxu1 %v3900_v27  ;;  %v6355_v27 = vld [vmem:[#allocation5 + $0x450] sm:$0xff]  ;;  %v6358_v50 = vld [vmem:[#allocation5 + $0x3e8] sm:$0xff]  ;;  %v6366_v11 = vld [vmem:[#allocation5 + $0x3d8] sm:$0xff] }
 0x256   :  { %4096 = vmatpush.msra.mxu2 %v6347_v23  ;;  %4163 = vmatpush.msrb.mxu1 %v6348_v41  ;;  %v6356_v0 = vld [vmem:[#allocation5 + $0x570] sm:$0xff]  ;;  %v6359_v23 = vld [vmem:[#allocation5 + $0x448] sm:$0xff] }
 0x257   :  { %4107 = vmatpush.msra.mxu3 %v6349_v34  ;;  %4137 = vmatpush.msrb.mxu0 %v6350_v40  ;;  %v7640_v41 = vld [vmem:[#allocation22_spill] sm:$0xff]  ;;  %v6360_v40 = vld [vmem:[#allocation5 + $0x4c0] sm:$0xff] }
 0x258   :  { %4185 = vmatpush.msrb.mxu2 %v6351_v16  ;;  %4164 = vmatpush.msrb.mxu1 %v6353_v8  ;;  %v3912_v34 = vmul.f32 %v7640_v41, %v7347_v28  ;;  %v7361_v8 = vadd.f32 %v7321_v3, %v3184_v52  ;;  %v3914_v41 = vmul.f32 %v6760_v25, %v7292_v36  ;;  %v6369_v52 = vld [vmem:[#allocation5 + $0x4b0] sm:$0xff]  ;;  %v6375_v25 = vld [vmem:[#allocation5 + $0x428] sm:$0xff] }
 0x259   :  { %4108 = vmatpush.msra.mxu3 %v6354_v2  ;;  %4138 = vmatpush.msrb.mxu0 %v6355_v27  ;;  %v3637_v2 = vpop.f32.mrf.mxu2 }
 0x25a   :  { %4186 = vmatpush.msrb.mxu2 %v6356_v0  ;;  %4048 = vmatmul.f32.gmra.mxu0 %v3899_v53  ;;  %v6363_v53 = vld [vmem:[#allocation5 + $0x440] sm:$0xff]  ;;  %v6365_v0 = vld [vmem:[#allocation5 + $0x4b8] sm:$0xff]  ;;  %v3489_v3 = vmul.f32 %v7361_v8, %v7361_v8 }
 0x25b   :  { %4165 = vmatpush.msrb.mxu1 %v6357_v49  ;;  %4109 = vmatpush.msra.mxu3 %v6358_v50  ;;  %v3585_v16 = vpop.f32.mrf.mxu0  ;;  %v6367_v49 = vld [vmem:[#allocation5 + $0x438] sm:$0xff] }
 0x25c   :  { %4139 = vmatpush.msrb.mxu0 %v6359_v23  ;;  %3873 = vmatmul.f32.gmra.mxu3 %v3474_v4  ;;  %v3586_v54 = vadd.f32 %v3585_v16, %v7303_v58  ;;  %v6364_v4 = vld [vmem:[#allocation5 + $0x560] sm:$0xff]  ;;  %v6368_v50 = vld [vmem:[#allocation5 + $0x558] sm:$0xff]  ;;  %v3663_v58 = vpop.f32.mrf.mxu3  ;;  %v6372_v16 = vld [vmem:[#allocation5 + $0x550] sm:$0xff] }
 0x25d   :  { %4166 = vmatpush.msrb.mxu1 %v6360_v40  ;;  %4187 = vmatpush.msrb.mxu2 %v6361_v15  ;;  %v6371_v40 = vld [vmem:[#allocation5 + $0x430] sm:$0xff]  ;;  %v6373_v15 = vld [vmem:[#allocation5 + $0x4a8] sm:$0xff] }
 0x25e   :  { %4110 = vmatpush.msra.mxu3 %v6362_v18  ;;  %4140 = vmatpush.msrb.mxu0 %v6363_v53  ;;  %v3612_v27 = vadd.f32 %v3611_v22, %v3586_v54  ;;  %v3614_v22 = vpop.f32.mrf.mxu1  ;;  %v6374_v18 = vld [vmem:[#allocation5 + $0x3c8] sm:$0xff]  ;;  %v7641_v54 = vld [vmem:[#allocation27_spill] sm:$0xff] }
 0x25f   :  { %3999 = vmatmul.f32.gmra.mxu2 %v3912_v34  ;;  %4077 = vmatmul.f32.gmra.mxu1 %v3915_v10  ;;  %v6370_v34 = vld [vmem:[#allocation5 + $0x3d0] sm:$0xff]  ;;  %v3886_v53 = vmul.f32 %v7641_v54, %v7254_v33 }
 0x260   :  { %4188 = vmatpush.msrb.mxu2 %v6364_v4  ;;  %4167 = vmatpush.msrb.mxu1 %v6365_v0  ;;  %v3638_v23 = vadd.f32 %v3637_v2, %v3612_v27  ;;  %v6376_v4 = vld [vmem:[#allocation5 + $0x4a0] sm:$0xff]  ;;  %v6377_v27 = vld [vmem:[#allocation5 + $0x548] sm:$0xff] }
 0x261   :  { %4111 = vmatpush.msra.mxu3 %v6366_v11  ;;  %4141 = vmatpush.msrb.mxu0 %v6367_v49  ;;  %v6378_v0 = vld [vmem:[#allocation5 + $0x3c0] sm:$0xff]  ;;  %v7642_v54 = vld [vmem:[#allocation21_spill] sm:$0xff] }
 0x262   :  { %4189 = vmatpush.msrb.mxu2 %v6368_v50  ;;  %4168 = vmatpush.msrb.mxu1 %v6369_v52  ;;  %v7367_v10 = vadd.f32 %v3663_v58, %v3638_v23  ;;  %v6379_v49 = vld [vmem:[#allocation5 + $0x420] sm:$0xff]  ;;  %v6380_v50 = vld [vmem:[#allocation5 + $0x498] sm:$0xff]  ;;  %v3640_v23 = vpop.f32.mrf.mxu2 }
 0x263   :  { %4112 = vmatpush.msra.mxu3 %v6370_v34  ;;  %4142 = vmatpush.msrb.mxu0 %v6371_v40  ;;  %v6381_v58 = vld [vmem:[#allocation5 + $0x540] sm:$0xff]  ;;  %v6382_v52 = vld [vmem:[#allocation5 + $0x3b8] sm:$0xff]  ;;  %v6384_v34 = vld [vmem:[#allocation5 + $0x490] sm:$0xff] }
 0x264   :  { %4190 = vmatpush.msrb.mxu2 %v6372_v16  ;;  %4051 = vmatmul.f32.gmra.mxu0 %v3914_v41  ;;  %v6385_v40 = vld [vmem:[#allocation5 + $0x538] sm:$0xff]  ;;  %v3666_v16 = vpop.f32.mrf.mxu3 }
 0x265   :  { %4169 = vmatpush.msrb.mxu1 %v6373_v15  ;;  %4113 = vmatpush.msra.mxu3 %v6374_v18  ;;  %v3588_v2 = vpop.f32.mrf.mxu0  ;;  %v6387_v18 = vld [vmem:[#allocation5 + $0x410] sm:$0xff] }
 0x266   :  { %4143 = vmatpush.msrb.mxu0 %v6375_v25  ;;  %3876 = vmatmul.f32.gmra.mxu3 %v3489_v3  ;;  %v3589_v11 = vadd.f32 %v3588_v2, %v7317_v6  ;;  %v6383_v3 = vld [vmem:[#allocation5 + $0x418] sm:$0xff]  ;;  %v6386_v6 = vld [vmem:[#allocation5 + $0x3b0] sm:$0xff]  ;;  %v3617_v25 = vpop.f32.mrf.mxu1 }
 0x267   :  { %4170 = vmatpush.msrb.mxu1 %v6376_v4  ;;  %4191 = vmatpush.msrb.mxu2 %v6377_v27  ;;  %v6388_v4 = vld [vmem:[#allocation5 + $0x488] sm:$0xff] }
 0x268   :  { %4114 = vmatpush.msra.mxu3 %v6378_v0  ;;  %4144 = vmatpush.msrb.mxu0 %v6379_v49  ;;  %v3615_v41 = vadd.f32 %v3614_v22, %v3589_v11  ;;  %v6389_v22 = vld [vmem:[#allocation5 + $0x530] sm:$0xff]  ;;  %v6390_v27 = vld [vmem:[#allocation5 + $0x3a8] sm:$0xff]  ;;  %v3889_v11 = vmul.f32 %v6961_v56, %v7254_v33  ;;  %v6392_v49 = vld [vmem:[#allocation5 + $0x480] sm:$0xff] }
 0x269   :  { %4097 = vmatmul.f32.vlgmr.msra.gmra.mxu2 %v3886_v53  ;;  %4171 = vmatpush.msrb.mxu1 %v6380_v50  ;;  %v3883_v53 = vmul.f32 %v7642_v54, %v7254_v33  ;;  %v6391_v0 = vld [vmem:[#allocation5 + $0x408] sm:$0xff]  ;;  %v7643_v50 = vld [vmem:[#allocation31_spill] sm:$0xff] }
 0x26a   :  { %4192 = vmatpush.msrb.mxu2 %v6381_v58  ;;  %4115 = vmatpush.msra.mxu3 %v6382_v52  ;;  %v3641_v15 = vadd.f32 %v3640_v23, %v3615_v41  ;;  %v3901_v58 = vmul.f32 %v7643_v50, %v7284_v12  ;;  %v6393_v23 = vld [vmem:[#allocation5 + $0x528] sm:$0xff]  ;;  %v6394_v41 = vld [vmem:[#allocation5 + $0x3a0] sm:$0xff]  ;;  %v6396_v56 = vld [vmem:[#allocation5 + $0x6f8] sm:$0xff] }
 0x26b   :  { %4145 = vmatpush.msrb.mxu0 %v6383_v3  ;;  %4172 = vmatpush.msrb.mxu1 %v6384_v34  ;;  %v3888_v3 = vmul.f32 %v6958_v43, %v7313_v14  ;;  %v6395_v34 = vld [vmem:[#allocation5 + $0x400] sm:$0xff]  ;;  %v6399_v54 = vld [vmem:[#allocation5 + $0x398] sm:$0xff]  ;;  %v6400_v43 = vld [vmem:[#allocation5 + $0x6f0] sm:$0xff] }
 0x26c   :  { %4193 = vmatpush.msrb.mxu2 %v6385_v40  ;;  %4116 = vmatpush.msra.mxu3 %v6386_v6  ;;  %v7374_v2 = vadd.f32 %v3666_v16, %v3641_v15  ;;  %v6397_v16 = vld [vmem:[#allocation5 + $0x520] sm:$0xff]  ;;  %v3643_v15 = vpop.f32.mrf.mxu2  ;;  %v6405_v50 = vld [vmem:[#allocation5 + $0x510] sm:$0xff] }
 0x26d   :  { %4146 = vmatpush.msrb.mxu0 %v6387_v18  ;;  %4173 = vmatpush.msrb.mxu1 %v6388_v4  ;;  %v7383_v18 = vld [vmem:[#allocation5 + $0x678] sm:$0xff]  ;;  %v3669_v4 = vpop.f32.mrf.mxu3 }
 0x26e   :  { %4194 = vmatpush.msrb.mxu2 %v6389_v22  ;;  %4117 = vmatpush.msra.mxu3 %v6390_v27  ;;  %v7386_v22 = vld [vmem:[#allocation5 + $0x670] sm:$0xff] }
 0x26f   :  { %4147 = vmatpush.msrb.mxu0 %v6391_v0  ;;  %4019 = vmatmul.f32.vlgmr.msrb.gmra.mxu3 %v3883_v53  ;;  %v6401_v53 = vld [vmem:[#allocation5 + $0x518] sm:$0xff]  ;;  %v6403_v27 = vld [vmem:[#allocation5 + $0x390] sm:$0xff] }
 0x270   :  { %4174 = vmatpush.msrb.mxu1 %v6392_v49  ;;  %4195 = vmatpush.msrb.mxu2 %v6393_v23  ;;  %v3591_v52 = vpop.f32.mrf.mxu0  ;;  %v3715_v0 = vpop.f32.mrf.mxu1  ;;  %v6404_v49 = vld [vmem:[#allocation5 + $0x6e8] sm:$0xff] }
 0x271   :  { %4118 = vmatpush.msra.mxu3 %v6394_v41  ;;  %4148 = vmatpush.msrb.mxu0 %v6395_v34  ;;  %v3592_v40 = vadd.f32 %v3591_v52, %v7335_v42  ;;  %v7393_v23 = vld [vmem:[#allocation5 + $0x668] sm:$0xff]  ;;  %v3904_v52 = vmul.f32 %v6997_v13, %v7284_v12 }
 0x272   :  { %4175 = vmatmul.f32.vlgmr.msrb.gmra.mxu1 %v3889_v11  ;;  %4100 = vmatmul.f32.gmra.mxu2 %v3901_v58  ;;  %v6407_v41 = vld [vmem:[#allocation5 + $0x388] sm:$0xff] }
 0x273   :  { %4263 = vmatpush.msra.mxu1 %v6396_v56  ;;  %4149 = vmatmul.f32.vlgmr.msrb.gmra.mxu0 %v3888_v3  ;;  %v3618_v6 = vadd.f32 %v3617_v25, %v3592_v40  ;;  %v7644_v25 = vld [vmem:[#allocation23_spill] sm:$0xff]  ;;  %v7645_v34 = vld [vmem:[#allocation28_spill] sm:$0xff] }
 0x274   :  { %4196 = vmatpush.msrb.mxu2 %v6397_v16  ;;  %4237 = vmatpush.msra.mxu0 %v7383_v18  ;;  %v3898_v11 = vmul.f32 %v7644_v25, %v7284_v12  ;;  %v6408_v3 = vld [vmem:[#allocation5 + $0x6e0] sm:$0xff]  ;;  %v3916_v40 = vmul.f32 %v7645_v34, %v7308_v62  ;;  %v6409_v56 = vld [vmem:[#allocation5 + $0x508] sm:$0xff]  ;;  %v7406_v25 = vld [vmem:[#allocation5 + $0x658] sm:$0xff] }
 0x275   :  { %4119 = vmatpush.msra.mxu3 %v6399_v54  ;;  %4264 = vmatpush.msra.mxu1 %v6400_v43  ;;  %v3644_v42 = vadd.f32 %v3643_v15, %v3618_v6  ;;  %v7400_v16 = vld [vmem:[#allocation5 + $0x660] sm:$0xff]  ;;  %v3903_v6 = vmul.f32 %v6994_v5, %v7333_v46  ;;  %v6412_v43 = vld [vmem:[#allocation5 + $0x6d8] sm:$0xff]  ;;  %v6416_v5 = vld [vmem:[#allocation5 + $0x6d0] sm:$0xff] }
 0x276   :  { %4197 = vmatpush.msrb.mxu2 %v6401_v53  ;;  %4238 = vmatpush.msra.mxu0 %v7386_v22  ;;  %v6411_v54 = vld [vmem:[#allocation5 + $0x380] sm:$0xff] }
 0x277   :  { %4120 = vmatpush.msra.mxu3 %v6403_v27  ;;  %4265 = vmatpush.msra.mxu1 %v6404_v49  ;;  %v7391_v58 = vadd.f32 %v3669_v4, %v3644_v42  ;;  %v6413_v53 = vld [vmem:[#allocation5 + $0x500] sm:$0xff]  ;;  %v3741_v4 = vpop.f32.mrf.mxu2  ;;  %v6414_v27 = vld [vmem:[#allocation5 + $0x5f8] sm:$0xff]  ;;  %v3767_v49 = vpop.f32.mrf.mxu3 }
 0x278   :  { %4198 = vmatpush.msrb.mxu2 %v6405_v50  ;;  %4239 = vmatpush.msra.mxu0 %v7393_v23  ;;  %v6418_v50 = vld [vmem:[#allocation5 + $0x5f0] sm:$0xff] }
 0x279   :  { %4121 = vmatpush.msra.mxu3 %v6407_v41  ;;  %4266 = vmatpush.msra.mxu1 %v6408_v3  ;;  %v3689_v15 = vpop.f32.mrf.mxu0  ;;  %v7409_v41 = vld [vmem:[#allocation5 + $0x650] sm:$0xff] }
 0x27a   :  { %4022 = vmatmul.f32.gmra.mxu3 %v3898_v11  ;;  %4199 = vmatpush.msrb.mxu2 %v6409_v56  ;;  %v3690_v13 = vadd.f32 %v3689_v15, %v7367_v10  ;;  %v6417_v11 = vld [vmem:[#allocation5 + $0x778] sm:$0xff]  ;;  %v6421_v3 = vld [vmem:[#allocation5 + $0x770] sm:$0xff]  ;;  %v6422_v56 = vld [vmem:[#allocation5 + $0x5e8] sm:$0xff] }
 0x27b   :  { %4240 = vmatpush.msra.mxu0 %v7400_v16  ;;  %4122 = vmatpush.msra.mxu3 %v6411_v54  ;;  %v7416_v15 = vld [vmem:[#allocation5 + $0x648] sm:$0xff] }
 0x27c   :  { %4178 = vmatmul.f32.gmra.mxu1 %v3904_v52  ;;  %4103 = vmatmul.f32.gmra.mxu2 %v3916_v40  ;;  %v3716_v42 = vadd.f32 %v3715_v0, %v3690_v13  ;;  %v3718_v52 = vpop.f32.mrf.mxu1  ;;  %v6420_v0 = vld [vmem:[#allocation5 + $0x6c8] sm:$0xff]  ;;  %v3913_v40 = vmul.f32 %v6742_v57, %v7308_v62  ;;  %v7422_v13 = vld [vmem:[#allocation5 + $0x640] sm:$0xff]  ;;  %v3918_v57 = vmul.f32 %v7034_v9, %v7347_v28 }
 0x27d   :  { %4267 = vmatpush.msra.mxu1 %v6412_v43  ;;  %4152 = vmatmul.f32.gmra.mxu0 %v3903_v6  ;;  %v3919_v6 = vmul.f32 %v7046_v37, %v7308_v62  ;;  %v6424_v54 = vld [vmem:[#allocation5 + $0x768] sm:$0xff] }
 0x27e   :  { %4200 = vmatpush.msrb.mxu2 %v6413_v53  ;;  %4211 = vmatpush.msrb.mxu3 %v6414_v27  ;;  %v3742_v10 = vadd.f32 %v3741_v4, %v3716_v42  ;;  %v3890_v53 = vmul.f32 %v6964_v39, %v7227_v29  ;;  %v6426_v4 = vld [vmem:[#allocation5 + $0x5e0] sm:$0xff]  ;;  %v6427_v27 = vld [vmem:[#allocation5 + $0x5d8] sm:$0xff] }
 0x27f   :  { %4241 = vmatpush.msra.mxu0 %v7406_v25  ;;  %4268 = vmatpush.msra.mxu1 %v6416_v5  ;;  %v7432_v5 = vld [vmem:[#allocation5 + $0x638] sm:$0xff] }
 0x280   :  { %4289 = vmatpush.msra.mxu2 %v6417_v11  ;;  %4212 = vmatpush.msrb.mxu3 %v6418_v50  ;;  %v7412_v34 = vadd.f32 %v3767_v49, %v3742_v10  ;;  %v6431_v49 = vld [vmem:[#allocation5 + $0x5c8] sm:$0xff]  ;;  %v6434_v50 = vld [vmem:[#allocation5 + $0x5c0] sm:$0xff] }
 0x281   :  { %4242 = vmatpush.msra.mxu0 %v7409_v41  ;;  %4269 = vmatpush.msra.mxu1 %v6420_v0  ;;  %v3770_v39 = vpop.f32.mrf.mxu3 }
 0x282   :  { %4290 = vmatpush.msra.mxu2 %v6421_v3  ;;  %4213 = vmatpush.msrb.mxu3 %v6422_v56  ;;  %v7464_v3 = vld [vmem:[#allocation5 + $0x610] sm:$0xff]  ;;  %v3902_v56 = vmul.f32 %v7043_v35, %v7263_v26 }
 0x283   :  { %4243 = vmatpush.msra.mxu0 %v7416_v15  ;;  %4270 = vmatpush.msra.mxu1 %v7002_v47  ;;  %v3744_v47 = vpop.f32.mrf.mxu2 }
 0x284   :  { %4291 = vmatpush.msra.mxu2 %v6424_v54  ;;  %4025 = vmatmul.f32.gmra.mxu3 %v3913_v40  ;;  %v3692_v43 = vpop.f32.mrf.mxu0  ;;  %v7646_v54 = vld [vmem:[#allocation33_spill] sm:$0xff] }
 0x285   :  { %4244 = vmatpush.msra.mxu0 %v7422_v13  ;;  %4214 = vmatpush.msrb.mxu3 %v6426_v4  ;;  %v3693_v37 = vadd.f32 %v3692_v43, %v7374_v2  ;;  %v6429_v2 = vld [vmem:[#allocation5 + $0x5d0] sm:$0xff]  ;;  %v7647_v43 = vld [vmem:[#allocation36_spill] sm:$0xff] }
 0x286   :  { %4181 = vmatmul.f32.gmra.mxu1 %v3919_v6  ;;  %4292 = vmatpush.msra.mxu2 %v7029_v24  ;;  %v3721_v24 = vpop.f32.mrf.mxu1  ;;  %v3893_v6 = vmul.f32 %v7184_v32, %v7227_v29  ;;  %v7649_v4 = vld [vmem:[#allocation32_spill] sm:$0xff]  ;;  %v6443_v32 = vld [vmem:[#allocation5 + $0x598] sm:$0xff] }
 0x287   :  { %4271 = vmatpush.msra.mxu1 %v7023_v7  ;;  %4155 = vmatmul.f32.gmra.mxu0 %v3918_v57  ;;  %v3719_v42 = vadd.f32 %v3718_v52, %v3693_v37  ;;  %v7437_v7 = vld [vmem:[#allocation5 + $0x630] sm:$0xff]  ;;  %v6436_v52 = vld [vmem:[#allocation5 + $0x5b8] sm:$0xff]  ;;  %v3920_v37 = vmul.f32 %v7649_v4, %v7292_v36 }
 0x288   :  { %4201 = vmatmul.f32.vlgmr.msrb.gmra.mxu2 %v3890_v53  ;;  %4215 = vmatpush.msrb.mxu3 %v6427_v27  ;;  %v7480_v53 = vld [vmem:[#allocation5 + $0x600] sm:$0xff]  ;;  %v7651_v27 = vld [vmem:[#allocation30_spill] sm:$0xff] }
 0x289   :  { %4245 = vmatpush.msra.mxu0 %v7432_v5  ;;  %4272 = vmatpush.msra.mxu1 %v7036_v38  ;;  %v3745_v9 = vadd.f32 %v3744_v47, %v3719_v42  ;;  %v3887_v38 = vmul.f32 %v6991_v61, %v7227_v29  ;;  %v3905_v61 = vmul.f32 %v7000_v63, %v7263_v26  ;;  %v6442_v47 = vld [vmem:[#allocation5 + $0x5a0] sm:$0xff]  ;;  %v6444_v42 = vld [vmem:[#allocation5 + $0x590] sm:$0xff] }
 0x28a   :  { %4293 = vmatpush.msra.mxu2 %v7038_v21  ;;  %4216 = vmatpush.msrb.mxu3 %v6429_v2  ;;  %v7446_v21 = vld [vmem:[#allocation5 + $0x628] sm:$0xff] }
 0x28b   :  { %4246 = vmatpush.msra.mxu0 %v7437_v7  ;;  %4273 = vmatpush.msra.mxu1 %v7048_v1  ;;  %v7442_v11 = vadd.f32 %v3770_v39, %v3745_v9  ;;  %v7451_v1 = vld [vmem:[#allocation5 + $0x620] sm:$0xff]  ;;  %v3747_v0 = vpop.f32.mrf.mxu2 }
 0x28c   :  { %4294 = vmatpush.msra.mxu2 %v7080_v19  ;;  %4217 = vmatpush.msrb.mxu3 %v6431_v49  ;;  %v7652_v39 = vld [vmem:[#allocation40_spill] sm:$0xff]  ;;  %v7653_v9 = vld [vmem:[#allocation43_spill] sm:$0xff]  ;;  %v7654_v49 = vld [vmem:[#allocation41_spill] sm:$0xff] }
 0x28d   :  { %4247 = vmatpush.msra.mxu0 %v7446_v21  ;;  %4274 = vmatpush.msra.mxu1 %v7059_v20  ;;  %v3695_v10 = vpop.f32.mrf.mxu0  ;;  %v7459_v20 = vld [vmem:[#allocation5 + $0x618] sm:$0xff]  ;;  %v3908_v2 = vmul.f32 %v7653_v9, %v7263_v26 }
 0x28e   :  { %4295 = vmatpush.msra.mxu2 %v7088_v59  ;;  %4123 = vmatmul.f32.vlgmr.msra.gmra.mxu3 %v3887_v38  ;;  %v3696_v19 = vadd.f32 %v3695_v10, %v7391_v58  ;;  %v6437_v58 = vld [vmem:[#allocation5 + $0x5b0] sm:$0xff] }
 0x28f   :  { %4248 = vmatpush.msra.mxu0 %v7451_v1  ;;  %4218 = vmatpush.msrb.mxu3 %v6434_v50  ;;  %v7655_v50 = vld [vmem:[#allocation17_spill] sm:$0xff] }
 0x290   :  { %4275 = vmatpush.msra.mxu1 %v7078_v31  ;;  %4296 = vmatpush.msra.mxu2 %v7099_v51  ;;  %v3722_v59 = vadd.f32 %v3721_v24, %v3696_v19  ;;  %v3773_v31 = vpop.f32.mrf.mxu3  ;;  %v3819_v51 = vpop.f32.mrf.mxu1  ;;  %v6445_v24 = vld [vmem:[#allocation5 + $0x588] sm:$0xff]  ;;  %v3894_v19 = vmul.f32 %v7326_v30, %v7313_v14 }
 0x291   :  { %4249 = vmatpush.msra.mxu0 %v7459_v20  ;;  %4204 = vmatmul.f32.gmra.mxu2 %v3905_v61  ;;  %v6446_v61 = vld [vmem:[#allocation5 + $0x580] sm:$0xff] }
 0x292   :  { %4219 = vmatpush.msrb.mxu3 %v6436_v52  ;;  %4276 = vmatpush.msra.mxu1 %v7085_v60  ;;  %v3748_v63 = vadd.f32 %v3747_v0, %v3722_v59  ;;  %v6439_v60 = vld [vmem:[#allocation5 + $0x5a8] sm:$0xff]  ;;  %v7656_v59 = vld [vmem:[#allocation35_spill] sm:$0xff] }
 0x293   :  { %4297 = vmatpush.msra.mxu2 %v7122_v17  ;;  %4250 = vmatpush.msra.mxu0 %v7464_v3  ;;  %v7471_v17 = vld [vmem:[#allocation5 + $0x608] sm:$0xff]  ;;  %v3891_v52 = vmul.f32 %v7656_v59, %v7313_v14 }
 0x294   :  { %4220 = vmatpush.msrb.mxu3 %v6437_v58  ;;  %4277 = vmatpush.msra.mxu1 %v7093_v55  ;;  %v3774_v40 = vadd.f32 %v3773_v31, %v3748_v63 }
 0x295   :  { %4298 = vmatpush.msra.mxu2 %v7129_v45  ;;  %4251 = vmatpush.msra.mxu0 %v7471_v17  ;;  %v7648_v45 = vld [vmem:[#allocation29_spill] sm:$0xff] }
 0x296   :  { %4221 = vmatpush.msrb.mxu3 %v6439_v60  ;;  %4278 = vmatpush.msra.mxu1 %v7646_v54  ;;  %v3793_v55 = vpop.f32.mrf.mxu0  ;;  %v3892_v57 = vmul.f32 %v7648_v45, %v7254_v33  ;;  %v7650_v33 = vld [vmem:[#allocation38_spill] sm:$0xff] }
 0x297   :  { %4299 = vmatpush.msra.mxu2 %v7647_v43  ;;  %4126 = vmatmul.f32.gmra.mxu3 %v3902_v56  ;;  %v3794_v35 = vadd.f32 %v3793_v55, %v7412_v34  ;;  %v3917_v34 = vmul.f32 %v7651_v27, %v7292_v36 }
 0x298   :  { %4252 = vmatpush.msra.mxu0 %v7480_v53  ;;  %4222 = vmatpush.msrb.mxu3 %v6442_v47  ;;  %v3822_v38 = vpop.f32.mrf.mxu1 }
 0x299   :  { %4279 = vmatmul.f32.vlgmr.msra.gmra.mxu1 %v3893_v6  ;;  %4253 = vmatmul.f32.vlgmr.msra.gmra.mxu0 %v3892_v57  ;;  %v3820_v29 = vadd.f32 %v3819_v51, %v3794_v35 }
 0x29a   :  { %4300 = vmatpush.msra.mxu2 %v7161_v44  ;;  %4223 = vmatpush.msrb.mxu3 %v6443_v32 }
 0x29b   :  { %4207 = vmatmul.f32.gmra.mxu2 %v3920_v37 }
 0x29c   :  { %4301 = vmatpush.msra.mxu2 %v7650_v33  ;;  %4224 = vmatpush.msrb.mxu3 %v6444_v42 }
 0x29e   :  { %4302 = vmatpush.msra.mxu2 %v7652_v39  ;;  %4225 = vmatpush.msrb.mxu3 %v6445_v24  ;;  %v3796_v44 = vpop.f32.mrf.mxu0 }
 0x29f   :  { %4129 = vmatmul.f32.gmra.mxu3 %v3917_v34  ;;  %v3797_v10 = vadd.f32 %v3796_v44, %v7442_v11  ;;  %v7657_v11 = vld [vmem:[#allocation14_spill] sm:$0xff] }
 0x2a0   :  { %4303 = vmatpush.msra.mxu2 %v7654_v49  ;;  %4226 = vmatpush.msrb.mxu3 %v6446_v61  ;;  %v3923_v0 = vmul.f32 %v7657_v11, %v7292_v36  ;;  %v3825_v58 = vpop.f32.mrf.mxu1  ;;  %v7658_v36 = vld [vmem:[#allocation39_spill] sm:$0xff] }
 0x2a1   :  { %4282 = vmatmul.f32.gmra.mxu1 %v3908_v2  ;;  %v3823_v26 = vadd.f32 %v3822_v38, %v3797_v10  ;;  %v3906_v14 = vmul.f32 %v7658_v36, %v7333_v46 }
 0x2a2   :  { %6180 = vmatpush.msra.mxu3 %v7383_v18  ;;  %4304 = vmatpush.msra.mxu2 %v7655_v50  ;;  %v3909_v18 = vmul.f32 %v7344_v48, %v7333_v46  ;;  %v3924_v48 = vmul.f32 %v7361_v8, %v7347_v28 }
 0x2a3   :  { %4305 = vmatmul.f32.vlgmr.msra.gmra.mxu2 %v3894_v19 }
 0x2a4   :  { %6181 = vmatpush.msra.mxu3 %v7386_v22 }
 0x2a6   :  { %6182 = vmatpush.msra.mxu3 %v7393_v23  ;;  %v3845_v31 = vpop.f32.mrf.mxu2 }
 0x2a7   :  { %v3799_v30 = vpop.f32.mrf.mxu0  ;;  %4227 = vmatmul.f32.vlgmr.msrb.gmra.mxu3 %v3891_v52  ;;  %v3846_v22 = vadd.f32 %v3845_v31, %v3820_v29 }
 0x2a8   :  { %6183 = vmatpush.msra.mxu3 %v7400_v16  ;;  %v3800_v63 = vadd.f32 %v3799_v30, %v3774_v40  ;;  %v7659_v16 = vld [vmem:[#allocation42_spill] sm:$0xff]  ;;  %v3968_v51 = vpop.f32.mrf.mxu1 }
 0x2a9   :  { %4285 = vmatmul.f32.gmra.mxu1 %v3923_v0 }
 0x2aa   :  { %6184 = vmatpush.msra.mxu3 %v7406_v25  ;;  %v3826_v23 = vadd.f32 %v3825_v58, %v3800_v63  ;;  %v3921_v25 = vmul.f32 %v7659_v16, %v7347_v28  ;;  %v7661_v28 = vld [vmem:[#allocation37_spill] sm:$0xff] }
 0x2ab   :  { %4308 = vmatmul.f32.gmra.mxu2 %v3909_v18 }
 0x2ac   :  { %6185 = vmatpush.msra.mxu3 %v7409_v41  ;;  %v7660_v41 = vld [vmem:[#allocation34_spill] sm:$0xff] }
 0x2ae   :  { %6186 = vmatpush.msra.mxu3 %v7416_v15  ;;  %v3907_v15 = vmul.f32 %v7660_v41, %v7284_v12 }
 0x2af   :  { %4230 = vmatmul.f32.gmra.mxu3 %v3906_v14 }
 0x2b0   :  { %6187 = vmatpush.msra.mxu3 %v7422_v13 }
 0x2b2   :  { %6188 = vmatpush.msra.mxu3 %v7432_v5 }
 0x2b3   :  { %4311 = vmatmul.f32.gmra.mxu2 %v3924_v48 }
 0x2b4   :  { %6189 = vmatpush.msra.mxu3 %v7437_v7  ;;  %v3922_v7 = vmul.f32 %v7661_v28, %v7308_v62 }
 0x2b6   :  { %6190 = vmatpush.msra.mxu3 %v7446_v21 }
 0x2b7   :  { %4233 = vmatmul.f32.gmra.mxu3 %v3921_v25 }
 0x2b8   :  { %6191 = vmatpush.msra.mxu3 %v7451_v1  ;;  %v3942_v1 = vpop.f32.mrf.mxu0 }
 0x2b9   :  { %v3969_v27 = vadd.f32 %v3968_v51, %v3942_v1 }
 0x2ba   :  { %6192 = vmatpush.msra.mxu3 %v7459_v20 }
 0x2bb   :  { %v3848_v46 = vpop.f32.mrf.mxu2 }
 0x2bc   :  { %6193 = vmatpush.msra.mxu3 %v7464_v3  ;;  %v3849_v8 = vadd.f32 %v3848_v46, %v3823_v26 }
 0x2be   :  { %6194 = vmatpush.msra.mxu3 %v7471_v17  ;;  %v3971_v17 = vpop.f32.mrf.mxu1 }
 0x2c0   :  { %6195 = vmatpush.msra.mxu3 %v7480_v53  ;;  %v3945_v56 = vpop.f32.mrf.mxu0 }
 0x2c1   :  { %4256 = vmatmul.f32.vlgmr.msra.gmra.mxu3 %v3907_v15  ;;  %v3972_v63 = vadd.f32 %v3971_v17, %v3945_v56 }
 0x2c4   :  { %v3851_v13 = vpop.f32.mrf.mxu2 }
 0x2c5   :  { %v3852_v5 = vadd.f32 %v3851_v13, %v3826_v23 }
 0x2c6   :  { %v3974_v55 = vpop.f32.mrf.mxu1 }
 0x2c8   :  { %v3948_v54 = vpop.f32.mrf.mxu0 }
 0x2c9   :  { %4259 = vmatmul.f32.gmra.mxu3 %v3922_v7 }
 0x2cd   :  { %v3994_v20 = vpop.f32.mrf.mxu2 }
 0x2ce   :  { %v4072_v62 = vpop.f32.mrf.mxu1  ;;  %v3995_v34 = vadd.f32 %v3994_v20, %v3969_v27 }
 0x2d0   :  { %v4046_v57 = vpop.f32.mrf.mxu0 }
 0x2d5   :  { %v3871_v21 = vpop.f32.mrf.mxu3 }
 0x2d6   :  { %v4075_v47 = vpop.f32.mrf.mxu1  ;;  %v3872_v39 = vadd.f32 %v3871_v21, %v3846_v22 }
 0x2d7   :  { %v3997_v60 = vpop.f32.mrf.mxu2 }
 0x2d8   :  { %v4049_v4 = vpop.f32.mrf.mxu0  ;;  %v4315_v38 = vmax.f32 %v3872_v39, 1e-16  ;;  %v3998_v22 = vadd.f32 %v3997_v60, %v3972_v63 }
 0x2da   :  { %6214 = vrsqrt.f32 %v4315_v38  ;;  %vm4324_vm10 = vweird.f32 %v4315_v38 }
 0x2de   :  { %v7534_v42 = vpop.f32.mrf.mxu1 }
 0x2df   :  { %v3874_v3 = vpop.f32.mrf.mxu3 }
 0x2e0   :  { %v3875_v40 = vadd.f32 %v3874_v3, %v3849_v8  ;;  %v6215_v26 = vpop.eup %6214  ;;  %v3975_v8 = vadd.f32 %v3974_v55, %v3948_v54 }
 0x2e1   :  { %v4052_v32 = vpop.f32.mrf.mxu0  ;;  %v4319_v30 = vmul.f32 %v6215_v26, %v4315_v38  ;;  %vm4325_vm9 = vweird.f32 %v6215_v26 }
 0x2e2   :  { %v4000_v43 = vpop.f32.mrf.mxu2  ;;  %v4316_v46 = vmax.f32 %v3875_v40, 1e-16  ;;  %vm4326_vm11 = vmor %vm4324_vm10, %vm4325_vm9 }
 0x2e3   :  { %v4320_v31 = vmul.f32 %v6215_v26, %v4319_v30  ;;  %v4001_v28 = vadd.f32 %v4000_v43, %v3975_v8 }
 0x2e4   :  { %6216 = vrsqrt.f32 %v4316_v46  ;;  %vm4334_vm13 = vweird.f32 %v4316_v46 }
 0x2e5   :  { %v4321_v48 = vmul.f32 0.5, %v4320_v31 }
 0x2e7   :  { %v4322_v13 = vsub.f32 1.5, %v4321_v48 }
 0x2e9   :  { %v3877_v6 = vpop.f32.mrf.mxu3  ;;  %v4323_v56 = vmul.f32 %v6215_v26, %v4322_v13  ;;  %v4365_v13 = vstv %s7551_s0 }
 0x2ea   :  { %v7530_v12 = vadd.f32 %v3877_v6, %v3852_v5  ;;  %v6217_v6 = vpop.eup %6216 }
 0x2eb   :  { %vm4335_vm12 = vweird.f32 %v6217_v6 }
 0x2ec   :  { %v4098_v53 = vpop.f32.mrf.mxu2  ;;  %v4317_v60 = vmax.f32 %v7530_v12, 1e-16  ;;  %vm4336_vm14 = vmor %vm4334_vm13, %vm4335_vm12 }
 0x2ee   :  { %6218 = vrsqrt.f32 %v4317_v60  ;;  %vm4344_vm0 = vweird.f32 %v4317_v60 }
 0x2ef   :  { %v4176_v44 = vpop.f32.mrf.mxu1 }
 0x2f0   :  { %v4150_v2 = vpop.f32.mrf.mxu0 }
 0x2f2   :  { %v4020_v45 = vpop.f32.mrf.mxu3 }
 0x2f3   :  { %v4021_v9 = vadd.f32 %v4020_v45, %v3995_v34 }
 0x2f4   :  { %v6219_v34 = vpop.eup %6218 }
 0x2f5   :  { %v4101_v37 = vpop.f32.mrf.mxu2  ;;  %v4047_v10 = vadd.f32 %v4046_v57, %v4021_v9  ;;  %v6207_v57 = vld [vmem:[#allocation7] ss:$0 sm:$0xff]  ;;  %vm4345_vm15 = vweird.f32 %v6219_v34 }
 0x2f6   :  { %vm4346_vm1 = vmor %vm4344_vm0, %vm4345_vm15 }
 0x2f7   :  { %v4073_v19 = vadd.f32 %v4072_v62, %v4047_v10 }
 0x2f9   :  { %v4099_v59 = vadd.f32 %v4098_v53, %v4073_v19  ;;  %v4179_v52 = vpop.f32.mrf.mxu1  ;;  %v4327_v53 = vsel %vm4326_vm11, %v6215_v26, %v4323_v56 }
 0x2fa   :  { %v4153_v50 = vpop.f32.mrf.mxu0 }
 0x2fd   :  { %v4023_v35 = vpop.f32.mrf.mxu3 }
 0x2fe   :  { %v4024_v36 = vadd.f32 %v4023_v35, %v3998_v22 }
 0x2ff   :  { %v7532_v33 = vpop.f32.mrf.mxu2 }
 0x300   :  { %v4050_v41 = vadd.f32 %v4049_v4, %v4024_v36  ;;  %v4329_v4 = vmul.f32 %v6217_v6, %v4316_v46 }
 0x302   :  { %v4076_v20 = vadd.f32 %v4075_v47, %v4050_v41  ;;  %v4330_v12 = vmul.f32 %v6217_v6, %v4329_v4 }
 0x303   :  { %v4182_v16 = vpop.f32.mrf.mxu1 }
 0x304   :  { %v4156_v23 = vpop.f32.mrf.mxu0  ;;  %v4102_v55 = vadd.f32 %v4101_v37, %v4076_v20 }
 0x307   :  { %v4026_v29 = vpop.f32.mrf.mxu3 }
 0x308   :  { %v4027_v1 = vadd.f32 %v4026_v29, %v4001_v28 }
 0x30a   :  { %v4053_v54 = vadd.f32 %v4052_v32, %v4027_v1 }
 0x30b   :  { %v4202_v49 = vpop.f32.mrf.mxu2 }
 0x30c   :  { %v4079_v47 = vadd.f32 %v7534_v42, %v4053_v54 }
 0x30e   :  { %v4105_v39 = vadd.f32 %v7532_v33, %v4079_v47 }
 0x311   :  { %v4124_v24 = vpop.f32.mrf.mxu3 }
 0x312   :  { %v4125_v0 = vadd.f32 %v4124_v24, %v4099_v59  ;;  %v4339_v24 = vmul.f32 %v6219_v34, %v4317_v60 }
 0x314   :  { %v4205_v11 = vpop.f32.mrf.mxu2  ;;  %v4151_v18 = vadd.f32 %v4150_v2, %v4125_v0  ;;  %v4331_v2 = vmul.f32 0.5, %v4330_v12  ;;  %v4340_v10 = vmul.f32 %v6219_v34, %v4339_v24 }
 0x316   :  { %v4177_v14 = vadd.f32 %v4176_v44, %v4151_v18  ;;  %v4254_v21 = vpop.f32.mrf.mxu0  ;;  %v4280_v3 = vpop.f32.mrf.mxu1 }
 0x318   :  { %v4203_v15 = vadd.f32 %v4202_v49, %v4177_v14  ;;  %v4332_v49 = vsub.f32 1.5, %v4331_v2 }
 0x31a   :  { %v4127_v61 = vpop.f32.mrf.mxu3  ;;  %v4333_v30 = vmul.f32 %v6217_v6, %v4332_v49 }
 0x31b   :  { %v4128_v62 = vadd.f32 %v4127_v61, %v4102_v55 }
 0x31d   :  { %v4154_v27 = vadd.f32 %v4153_v50, %v4128_v62  ;;  %v4341_v50 = vmul.f32 0.5, %v4340_v10 }
 0x31e   :  { %v4208_v25 = vpop.f32.mrf.mxu2  ;;  %v4283_v61 = vpop.f32.mrf.mxu1 }
 0x31f   :  { %v4180_v37 = vadd.f32 %v4179_v52, %v4154_v27  ;;  %v4342_v52 = vsub.f32 1.5, %v4341_v50 }
 0x321   :  { %v4206_v44 = vadd.f32 %v4205_v11, %v4180_v37  ;;  %v4343_v48 = vmul.f32 %v6219_v34, %v4342_v52 }
 0x322   :  { %v4130_v58 = vpop.f32.mrf.mxu3 }
 0x323   :  { %v4131_v32 = vadd.f32 %v4130_v58, %v4105_v39  ;;  %v4337_v58 = vsel %vm4336_vm14, %v6217_v6, %v4333_v30  ;;  %v4347_v46 = vsel %vm4346_vm1, %v6219_v34, %v4343_v48 }
 0x325   :  { %v4157_v38 = vadd.f32 %v4156_v23, %v4131_v32 }
 0x326   :  { %v4306_v40 = vpop.f32.mrf.mxu2  ;;  %v4286_v14 = vpop.f32.mrf.mxu1 }
 0x327   :  { %v4183_v42 = vadd.f32 %v4182_v16, %v4157_v38 }
 0x329   :  { %v4209_v33 = vadd.f32 %v4208_v25, %v4183_v42 }
 0x32a   :  { %v4228_v5 = vpop.f32.mrf.mxu3 }
 0x32b   :  { %v4229_v7 = vadd.f32 %v4228_v5, %v4203_v15 }
 0x32d   :  { %v4255_v51 = vadd.f32 %v4254_v21, %v4229_v7 }
 0x32e   :  { %v4309_v0 = vpop.f32.mrf.mxu2 }
 0x32f   :  { %v4281_v17 = vadd.f32 %v4280_v3, %v4255_v51 }
 0x331   :  { %v4307_v45 = vadd.f32 %v4306_v40, %v4281_v17 }
 0x332   :  { %v4231_v43 = vpop.f32.mrf.mxu3 }
 0x333   :  { %v4348_v35 = vmul.f32 %v4327_v53, %v4307_v45  ;;  %v4232_v19 = vadd.f32 %v4231_v43, %v4206_v44 }
 0x335   :  { %v4355_v29 = vmul.f32 %v6207_v57, %v4348_v35 }
 0x336   :  { %v4312_v8 = vpop.f32.mrf.mxu2 }
 0x337   :  { %4358 = vadd.xlane.f32.xlu1 %v4355_v29 }
 0x33a   :  { %v4234_v9 = vpop.f32.mrf.mxu3 }
 0x33b   :  { %v4235_v31 = vadd.f32 %v4234_v9, %v4209_v33 }
 0x344   :  { %v4257_v26 = vpop.f32.mrf.mxu3 }
 0x345   :  { %v4258_v59 = vadd.f32 %v4257_v26, %v4232_v19 }
 0x347   :  { %v4284_v63 = vadd.f32 %v4283_v61, %v4258_v59 }
 0x349   :  { %v4310_v18 = vadd.f32 %v4309_v0, %v4284_v63 }
 0x34b   :  { %v4349_v11 = vmul.f32 %v4337_v58, %v4310_v18 }
 0x34c   :  { %v4260_v22 = vpop.f32.mrf.mxu3 }
 0x34d   :  { %v4261_v23 = vadd.f32 %v4260_v22, %v4235_v31  ;;  %v4356_v36 = vmul.f32 %v6207_v57, %v4349_v11 }
 0x34f   :  { %v4287_v16 = vadd.f32 %v4286_v14, %v4261_v23  ;;  %4360 = vadd.xlane.f32.xlu2 %v4356_v36 }
 0x351   :  { %v4313_v41 = vadd.f32 %v4312_v8, %v4287_v16 }
 0x353   :  { %v4350_v25 = vmul.f32 %v4347_v46, %v4313_v41 }
 0x355   :  { %v4357_v15 = vmul.f32 %v6207_v57, %v4350_v25 }
 0x357   :  { %4362 = vadd.xlane.f32.xlu2 %v4357_v15 }
 0x3aa   :  { %v4359_v5 = vpop.xlane.xlu1 %4358 }
 0x3ab   :  { %v4366_v28 = vadd.f32 %v4365_v13, %v4359_v5 }
 0x3ad   :  { %4370 = vst.msk [vmem:[%s7557_s6] sm:$0xff] %vm4369_vm2, %v4366_v28 }
 0x3c2   :  { %v4361_v7 = vpop.xlane.xlu2 %4360 }
 0x3c3   :  { %v4367_v21 = vadd.f32 %v4365_v13, %v4361_v7 }
 0x3c5   :  { %4371 = vst.msk [vmem:[%s7557_s6 + $0x8] sm:$0xff] %vm4369_vm2, %v4367_v21 }
 0x3ca   :  { %v4363_v1 = vpop.xlane.xlu2 %4362 }
 0x3cb   :  { %v4368_v20 = vadd.f32 %v4365_v13, %v4363_v1 }
 0x3cd   :  { %4372 = vst.msk [vmem:[%s7557_s6 + $0x10] sm:$0xff] %vm4369_vm2, %v4368_v20 }
 0x3ce   :  { %4377 = vsyncpa [#allocation4], 1 }
 0x3cf   :  { %4378 = vsyncpa [#allocation6], 1 }
 0x3d0   :  { %4379 = vsyncpa [#allocation9], 1 }

</bundles_post_ra>
